<compile_context>
chip_gen: v7x
topology: tpu7x:2x2x1
jax: 0.10.0
libtpu: 0.0.40
codegen_flags: <defaults>
</compile_context>

<pallas_src>
import functools

import jax
import jax.numpy as jnp
from jax import lax
from jax.experimental import pallas as pl
from jax.experimental.pallas import tpu as pltpu


# ----------------------------------------------------------------------------
# Shared bidirectional-LSTM recurrence (runs entirely inside one kernel call).
# ----------------------------------------------------------------------------
def _bilstm_core(len_ref, x_ref, wih_ref, b_ref, whh_ref, gx_sc,
                 out_f_ref, out_b_ref, *, T, B, H):
    """len_ref : (2B, 1) int32  lengths tiled [fwd; bwd]
       x_ref   : (T*B, Din)     time-major inputs, flattened
       wih_ref : (Din, 8H)      [W_ih_fwd | W_ih_bwd]
       b_ref   : (1, 8H)        [b_fwd | b_bwd]  (b_ih + b_hh pre-summed)
       whh_ref : (H, 8H)        [W_hh_fwd | W_hh_bwd]
       gx_sc   : (T*B, 8H)      VMEM scratch for the hoisted input projection
       out_*   : (T, B, H) per-step outputs per direction, or None (last layer)
       returns final hidden state (2B, H): rows [0:B]=fwd, [B:2B]=bwd."""
    H4 = 4 * H

    # Hoisted input projection: one matmul for all timesteps & both directions.
    gx_sc[...] = (jnp.dot(x_ref[...], wih_ref[...],
                          preferred_element_type=jnp.float32) + b_ref[...])

    lens = len_ref[...]                                          # (2B, 1) i32
    row = lax.broadcasted_iota(jnp.int32, (2 * B, 1), 0)
    is_fwd = row < B                                             # (2B, 1) bool

    # Lane constants for the single-tanh gate trick:
    #   sigmoid(x) = 0.5*(1 + tanh(x/2))  on i/f/o lanes,  tanh(x) on g lanes.
    lane = lax.broadcasted_iota(jnp.int32, (1, H4), 1)
    is_g = jnp.logical_and(lane >= 2 * H, lane < 3 * H)
    scale = jnp.where(is_g, 1.0, 0.5).astype(jnp.float32)        # (1, 4H)
    shift = jnp.where(is_g, 0.0, 0.5).astype(jnp.float32)        # (1, 4H)

    def step(s, carry):
        h, c = carry                                             # (2B, H) each
        rs = T - 1 - s                                           # bwd time idx
        rf = pl.multiple_of(s * B, B)
        rb = pl.multiple_of(rs * B, B)

        gx_f = gx_sc[pl.ds(rf, B), 0:H4]                         # (B, 4H)
        gx_b = gx_sc[pl.ds(rb, B), H4:2 * H4]                    # (B, 4H)
        gx = jnp.concatenate([gx_f, gx_b], axis=0)               # (2B, 4H)

        # One recurrent matmul covering both directions.
        gh_full = jnp.dot(h, whh_ref[...],
                          preferred_element_type=jnp.float32)    # (2B, 8H)
        gh = jnp.where(is_fwd, gh_full[:, 0:H4], gh_full[:, H4:2 * H4])
        gates = gx + gh                                          # (2B, 4H)

        act = jnp.tanh(gates * scale) * scale + shift            # i,f,g,o acts
        i_g = act[:, 0:H]
        f_g = act[:, H:2 * H]
        g_g = act[:, 2 * H:3 * H]
        o_g = act[:, 3 * H:4 * H]

        c_new = f_g * c + i_g * g_g
        h_new = o_g * jnp.tanh(c_new)

        # Packed-sequence semantics: state only advances while t < length.
        t_vec = jnp.where(is_fwd, s, rs)                         # (2B, 1)
        mask = t_vec < lens
        h2 = jnp.where(mask, h_new, h)
        c2 = jnp.where(mask, c_new, c)

        if out_f_ref is not None:
            out_vals = jnp.where(mask, h2, 0.0)                  # zero padding
            out_f_ref[s] = out_vals[0:B]                         # fwd @ t = s
            out_b_ref[rs] = out_vals[B:2 * B]                    # bwd @ t = rs
        return h2, c2

    h0 = jnp.zeros((2 * B, H), jnp.float32)
    c0 = jnp.zeros((2 * B, H), jnp.float32)
    h_fin, _ = lax.fori_loop(0, T, step, (h0, c0), unroll=True)
    return h_fin


def _bilstm_layer_kernel(len_ref, x_ref, wih_ref, b_ref, whh_ref,
                         out_f_ref, out_b_ref, gx_sc, *, T, B, H):
    _bilstm_core(len_ref, x_ref, wih_ref, b_ref, whh_ref, gx_sc,
                 out_f_ref, out_b_ref, T=T, B=B, H=H)


def _bilstm_head_kernel(len_ref, x_ref, wih_ref, b_ref, whh_ref,
                        fcw_ref, fcb_ref, logits_ref, gx_sc, *, T, B, H):
    # Last layer: per-step outputs are unused; fuse the fc into the epilogue.
    h_fin = _bilstm_core(len_ref, x_ref, wih_ref, b_ref, whh_ref, gx_sc,
                         None, None, T=T, B=B, H=H)
    hidden = jnp.concatenate([h_fin[0:B], h_fin[B:2 * B]], axis=1)   # (B, 2H)
    logits_ref[...] = (jnp.dot(hidden, fcw_ref[...],
                               preferred_element_type=jnp.float32)
                       + fcb_ref[...])


# ----------------------------------------------------------------------------
# Wrappers (one pallas_call per layer; everything stays time-major).
# ----------------------------------------------------------------------------
def bilstm_layer(x2d, len2, lp, *, T, B):
    H = lp["w_hh"].shape[0]
    kernel = functools.partial(_bilstm_layer_kernel, T=T, B=B, H=H)
    out_f, out_b = pl.pallas_call(
        kernel,
        out_shape=(jax.ShapeDtypeStruct((T, B, H), jnp.float32),
                   jax.ShapeDtypeStruct((T, B, H), jnp.float32)),
        scratch_shapes=[pltpu.VMEM((T * B, 8 * H), jnp.float32)],
    )(len2, x2d, lp["w_ih"], lp["b"], lp["w_hh"])
    # Next-layer input: [fwd_t | bwd_t] features, flattened time-major.
    return jnp.concatenate([out_f, out_b], axis=-1).reshape(T * B, 2 * H)


def bilstm_head(x2d, len2, lp, fc_w, fc_b, *, T, B):
    H = lp["w_hh"].shape[0]
    O = fc_w.shape[1]
    kernel = functools.partial(_bilstm_head_kernel, T=T, B=B, H=H)
    return pl.pallas_call(
        kernel,
        out_shape=jax.ShapeDtypeStruct((B, O), jnp.float32),
        scratch_shapes=[pltpu.VMEM((T * B, 8 * H), jnp.float32)],
    )(len2, x2d, lp["w_ih"], lp["b"], lp["w_hh"], fc_w, fc_b)


def lstm_model_forward(tokens, lengths, params):
    B, T = tokens.shape
    # Embedding gather (XLA glue; padding_idx row is zero). Dropout = identity.
    x_tm = jnp.take(params["embedding"], tokens.T, axis=0)        # (T, B, E)
    x2d = x_tm.reshape(T * B, -1)
    len2 = jnp.concatenate([lengths, lengths]).astype(jnp.int32).reshape(2 * B, 1)

    layers = params["lstm"]
    for lp in layers[:-1]:
        x2d = bilstm_layer(x2d, len2, lp, T=T, B=B)
        # inter-layer dropout: identity in eval mode
    # hidden[-2]/hidden[-1] (last layer fwd/bwd finals) -> fc, fused in-kernel.
    return bilstm_head(x2d, len2, layers[-1], params["fc_w"], params["fc_b"],
                       T=T, B=B)


# ----------------------------------------------------------------------------
# Deterministic parameter construction (weights pre-stacked [fwd | bwd]).
# ----------------------------------------------------------------------------
def init_params(key, vocab_size, embedding_dim, hidden_dim, output_dim,
                n_layers, pad_idx):
    keys = jax.random.split(key, 3 + 2 * n_layers)
    k_emb, k_fcw, k_fcb = keys[0], keys[1], keys[2]
    bound = 1.0 / jnp.sqrt(hidden_dim)

    emb = 0.1 * jax.random.normal(k_emb, (vocab_size, embedding_dim),
                                  jnp.float32)
    emb = emb.at[pad_idx].set(0.0)

    def one_direction(k, d_in):
        kk = jax.random.split(k, 3)
        w_ih = jax.random.uniform(kk[0], (d_in, 4 * hidden_dim),
                                  jnp.float32, -bound, bound)
        w_hh = jax.random.uniform(kk[1], (hidden_dim, 4 * hidden_dim),
                                  jnp.float32, -bound, bound)
        bias = jax.random.uniform(kk[2], (1, 4 * hidden_dim),
                                  jnp.float32, -2 * bound, 2 * bound)
        return w_ih, w_hh, bias

    lstm_params = []
    for layer in range(n_layers):
        d_in = embedding_dim if layer == 0 else 2 * hidden_dim
        wif, whf, bf = one_direction(keys[3 + 2 * layer], d_in)
        wib, whb, bb = one_direction(keys[4 + 2 * layer], d_in)
        lstm_params.append({
            "w_ih": jnp.concatenate([wif, wib], axis=1),   # (Din, 8H)
            "w_hh": jnp.concatenate([whf, whb], axis=1),   # (H, 8H)
            "b":    jnp.concatenate([bf, bb], axis=1),     # (1, 8H)
        })

    fc_w = jax.random.uniform(k_fcw, (2 * hidden_dim, output_dim),
                              jnp.float32, -bound, bound)
    fc_b = jax.random.uniform(k_fcb, (1, output_dim),
                              jnp.float32, -bound, bound)
    return {"embedding": emb, "lstm": lstm_params, "fc_w": fc_w, "fc_b": fc_b}


if __name__ == "__main__":
    vocab_size, embedding_dim, hidden_dim, output_dim = 50, 16, 32, 3
    n_layers, pad_idx = 2, 0
    B, T = 8, 8

    key = jax.random.PRNGKey(0)
    k_tok, k_params = jax.random.split(key)

    lengths = jnp.array([8, 5, 7, 3, 8, 2, 6, 4], dtype=jnp.int32)
    tokens = jax.random.randint(k_tok, (B, T), 1, vocab_size, dtype=jnp.int32)
    t_idx = jnp.arange(T)[None, :]
    tokens = jnp.where(t_idx < lengths[:, None], tokens, pad_idx)

    params = init_params(k_params, vocab_size, embedding_dim, hidden_dim,
                         output_dim, n_layers, pad_idx)

    forward = jax.jit(lstm_model_forward)
    logits = forward(tokens, lengths, params)
    jax.block_until_ready(logits)
    assert logits.shape == (B, output_dim)
    print("KERNEL_OK")
</pallas_src>

<mosaic_0001>
module attributes {stable_mosaic.version = 11 : i64} {
  func.func @_bilstm_head_kernel(%arg0: memref<16x1xi32, #tpu.memory_space<vmem>>, %arg1: memref<64x64xf32, #tpu.memory_space<vmem>>, %arg2: memref<64x256xf32, #tpu.memory_space<vmem>>, %arg3: memref<1x256xf32, #tpu.memory_space<vmem>>, %arg4: memref<32x256xf32, #tpu.memory_space<vmem>>, %arg5: memref<64x3xf32, #tpu.memory_space<vmem>>, %arg6: memref<1x3xf32, #tpu.memory_space<vmem>>, %arg7: memref<8x3xf32, #tpu.memory_space<vmem>>, %arg8: memref<64x256xf32, #tpu.memory_space<vmem>>) attributes {dimension_semantics = [], scalar_prefetch = 0 : i64, scratch_operands = 1 : i64, tpu.core_type = #tpu.core_type<tc>} {
    %c0 = arith.constant 0 : index
    %c0_0 = arith.constant 0 : index
    %0 = vector.load %arg1[%c0, %c0_0] : memref<64x64xf32, #tpu.memory_space<vmem>>, vector<64x64xf32>
    %c0_1 = arith.constant 0 : index
    %c0_2 = arith.constant 0 : index
    %1 = vector.load %arg2[%c0_1, %c0_2] : memref<64x256xf32, #tpu.memory_space<vmem>>, vector<64x256xf32>
    %cst = arith.constant dense<0.000000e+00> : vector<64x256xf32>
    %2 = tpu.matmul %0, %1, %cst {dimension_numbers = #tpu.dot_dimension_numbers<[1], [0], [0], [1], [0, 0, 1, 1], [], []>} : vector<64x64xf32>, vector<64x256xf32>, vector<64x256xf32> -> vector<64x256xf32>
    %c0_3 = arith.constant 0 : index
    %c0_4 = arith.constant 0 : index
    %3 = vector.load %arg3[%c0_3, %c0_4] : memref<1x256xf32, #tpu.memory_space<vmem>>, vector<1x256xf32>
    %4 = vector.broadcast %3 : vector<1x256xf32> to vector<64x256xf32>
    %5 = arith.addf %2, %4 : vector<64x256xf32>
    %c0_5 = arith.constant 0 : index
    %c0_6 = arith.constant 0 : index
    %6 = vector.load %arg8[%c0_5, %c0_6] : memref<64x256xf32, #tpu.memory_space<vmem>>, vector<64x256xf32>
    tpu.vector_store %arg8[%c0_5, %c0_6], %5 {strides = array<i32>} : memref<64x256xf32, #tpu.memory_space<vmem>>, vector<64x256xf32>,
    %c0_7 = arith.constant 0 : index
    %c0_8 = arith.constant 0 : index
    %7 = vector.load %arg0[%c0_7, %c0_8] : memref<16x1xi32, #tpu.memory_space<vmem>>, vector<16x1xi32>
    %8 = tpu.iota {dimensions = array<i32: 0>} : vector<16x1xi32>
    %c8_i32 = arith.constant 8 : i32
    %9 = vector.broadcast %c8_i32 : i32 to vector<16x1xi32>
    %10 = arith.cmpi slt, %8, %9 : vector<16x1xi32>
    %11 = tpu.iota {dimensions = array<i32: 1>} : vector<1x128xi32>
    %c64_i32 = arith.constant 64 : i32
    %12 = vector.broadcast %c64_i32 : i32 to vector<1x128xi32>
    %13 = arith.cmpi sge, %11, %12 : vector<1x128xi32>
    %c96_i32 = arith.constant 96 : i32
    %14 = vector.broadcast %c96_i32 : i32 to vector<1x128xi32>
    %15 = arith.cmpi slt, %11, %14 : vector<1x128xi32>
    %16 = arith.andi %13, %15 : vector<1x128xi1>
    %cst_9 = arith.constant 1.000000e+00 : f32
    %cst_10 = arith.constant 5.000000e-01 : f32
    %17 = vector.broadcast %cst_9 : f32 to vector<1x128xf32>
    %18 = vector.broadcast %cst_10 : f32 to vector<1x128xf32>
    %19 = arith.select %16, %17, %18 : vector<1x128xi1>, vector<1x128xf32>
    %cst_11 = arith.constant 0.000000e+00 : f32
    %cst_12 = arith.constant 5.000000e-01 : f32
    %20 = vector.broadcast %cst_11 : f32 to vector<1x128xf32>
    %21 = vector.broadcast %cst_12 : f32 to vector<1x128xf32>
    %22 = arith.select %16, %20, %21 : vector<1x128xi1>, vector<1x128xf32>
    %cst_13 = arith.constant 0.000000e+00 : f32
    %23 = vector.broadcast %cst_13 : f32 to vector<16x32xf32>
    %cst_14 = arith.constant 0.000000e+00 : f32
    %24 = vector.broadcast %cst_14 : f32 to vector<16x32xf32>
    %c0_i32 = arith.constant 0 : i32
    %c7_i32 = arith.constant 7 : i32
    %25 = arith.subi %c7_i32, %c0_i32 : i32
    %c8_i32_15 = arith.constant 8 : i32
    %26 = arith.muli %c0_i32, %c8_i32_15 : i32
    %27 = tpu.assume_multiple %26, 8 : i32
    %c8_i32_16 = arith.constant 8 : i32
    %28 = arith.muli %25, %c8_i32_16 : i32
    %29 = tpu.assume_multiple %28, 8 : i32
    %30 = arith.index_cast %27 : i32 to index
    %c0_17 = arith.constant 0 : index
    %31 = vector.load %arg8[%30, %c0_17] : memref<64x256xf32, #tpu.memory_space<vmem>>, vector<8x128xf32>
    %32 = arith.index_cast %29 : i32 to index
    %c128 = arith.constant 128 : index
    %33 = vector.load %arg8[%32, %c128] : memref<64x256xf32, #tpu.memory_space<vmem>>, vector<8x128xf32>
    %34 = tpu.concatenate %31, %33 in 0 : vector<8x128xf32>, vector<8x128xf32> -> vector<16x128xf32>
    %c0_18 = arith.constant 0 : index
    %c0_19 = arith.constant 0 : index
    %35 = vector.load %arg4[%c0_18, %c0_19] : memref<32x256xf32, #tpu.memory_space<vmem>>, vector<32x256xf32>
    %cst_20 = arith.constant dense<0.000000e+00> : vector<16x256xf32>
    %36 = tpu.matmul %23, %35, %cst_20 {dimension_numbers = #tpu.dot_dimension_numbers<[1], [0], [0], [1], [0, 0, 1, 1], [], []>} : vector<16x32xf32>, vector<32x256xf32>, vector<16x256xf32> -> vector<16x256xf32>
    %37 = vector.extract_strided_slice %36 {offsets = [0, 0], sizes = [16, 128], strides = [1, 1]} : vector<16x256xf32> to vector<16x128xf32>
    %38 = vector.extract_strided_slice %36 {offsets = [0, 128], sizes = [16, 128], strides = [1, 1]} : vector<16x256xf32> to vector<16x128xf32>
    %39 = vector.shape_cast %10 : vector<16x1xi1> to vector<16x1xi1>
    %40 = vector.broadcast %39 : vector<16x1xi1> to vector<16x128xi1>
    %41 = arith.select %40, %37, %38 : vector<16x128xi1>, vector<16x128xf32>
    %42 = arith.addf %34, %41 : vector<16x128xf32>
    %43 = vector.broadcast %19 : vector<1x128xf32> to vector<16x128xf32>
    %44 = arith.mulf %42, %43 : vector<16x128xf32>
    %45 = math.tanh %44 : vector<16x128xf32>
    %46 = vector.broadcast %19 : vector<1x128xf32> to vector<16x128xf32>
    %47 = arith.mulf %45, %46 : vector<16x128xf32>
    %48 = vector.broadcast %22 : vector<1x128xf32> to vector<16x128xf32>
    %49 = arith.addf %47, %48 : vector<16x128xf32>
    %50 = vector.extract_strided_slice %49 {offsets = [0, 0], sizes = [16, 32], strides = [1, 1]} : vector<16x128xf32> to vector<16x32xf32>
    %51 = vector.extract_strided_slice %49 {offsets = [0, 32], sizes = [16, 32], strides = [1, 1]} : vector<16x128xf32> to vector<16x32xf32>
    %52 = vector.extract_strided_slice %49 {offsets = [0, 64], sizes = [16, 32], strides = [1, 1]} : vector<16x128xf32> to vector<16x32xf32>
    %53 = vector.extract_strided_slice %49 {offsets = [0, 96], sizes = [16, 32], strides = [1, 1]} : vector<16x128xf32> to vector<16x32xf32>
    %54 = arith.mulf %51, %24 : vector<16x32xf32>
    %55 = arith.mulf %50, %52 : vector<16x32xf32>
    %56 = arith.addf %54, %55 : vector<16x32xf32>
    %57 = math.tanh %56 : vector<16x32xf32>
    %58 = arith.mulf %53, %57 : vector<16x32xf32>
    %59 = vector.broadcast %c0_i32 : i32 to vector<16x1xi32>
    %60 = vector.broadcast %25 : i32 to vector<16x1xi32>
    %61 = arith.select %10, %59, %60 : vector<16x1xi1>, vector<16x1xi32>
    %62 = arith.cmpi slt, %61, %7 : vector<16x1xi32>
    %63 = vector.shape_cast %62 : vector<16x1xi1> to vector<16x1xi1>
    %64 = vector.broadcast %63 : vector<16x1xi1> to vector<16x32xi1>
    %65 = arith.select %64, %58, %23 : vector<16x32xi1>, vector<16x32xf32>
    %66 = vector.shape_cast %62 : vector<16x1xi1> to vector<16x1xi1>
    %67 = vector.broadcast %66 : vector<16x1xi1> to vector<16x32xi1>
    %68 = arith.select %67, %56, %24 : vector<16x32xi1>, vector<16x32xf32>
    %c1_i32 = arith.constant 1 : i32
    %c7_i32_21 = arith.constant 7 : i32
    %69 = arith.subi %c7_i32_21, %c1_i32 : i32
    %c8_i32_22 = arith.constant 8 : i32
    %70 = arith.muli %c1_i32, %c8_i32_22 : i32
    %71 = tpu.assume_multiple %70, 8 : i32
    %c8_i32_23 = arith.constant 8 : i32
    %72 = arith.muli %69, %c8_i32_23 : i32
    %73 = tpu.assume_multiple %72, 8 : i32
    %74 = arith.index_cast %71 : i32 to index
    %c0_24 = arith.constant 0 : index
    %75 = vector.load %arg8[%74, %c0_24] : memref<64x256xf32, #tpu.memory_space<vmem>>, vector<8x128xf32>
    %76 = arith.index_cast %73 : i32 to index
    %c128_25 = arith.constant 128 : index
    %77 = vector.load %arg8[%76, %c128_25] : memref<64x256xf32, #tpu.memory_space<vmem>>, vector<8x128xf32>
    %78 = tpu.concatenate %75, %77 in 0 : vector<8x128xf32>, vector<8x128xf32> -> vector<16x128xf32>
    %c0_26 = arith.constant 0 : index
    %c0_27 = arith.constant 0 : index
    %79 = vector.load %arg4[%c0_26, %c0_27] : memref<32x256xf32, #tpu.memory_space<vmem>>, vector<32x256xf32>
    %cst_28 = arith.constant dense<0.000000e+00> : vector<16x256xf32>
    %80 = tpu.matmul %65, %79, %cst_28 {dimension_numbers = #tpu.dot_dimension_numbers<[1], [0], [0], [1], [0, 0, 1, 1], [], []>} : vector<16x32xf32>, vector<32x256xf32>, vector<16x256xf32> -> vector<16x256xf32>
    %81 = vector.extract_strided_slice %80 {offsets = [0, 0], sizes = [16, 128], strides = [1, 1]} : vector<16x256xf32> to vector<16x128xf32>
    %82 = vector.extract_strided_slice %80 {offsets = [0, 128], sizes = [16, 128], strides = [1, 1]} : vector<16x256xf32> to vector<16x128xf32>
    %83 = vector.shape_cast %10 : vector<16x1xi1> to vector<16x1xi1>
    %84 = vector.broadcast %83 : vector<16x1xi1> to vector<16x128xi1>
    %85 = arith.select %84, %81, %82 : vector<16x128xi1>, vector<16x128xf32>
    %86 = arith.addf %78, %85 : vector<16x128xf32>
    %87 = vector.broadcast %19 : vector<1x128xf32> to vector<16x128xf32>
    %88 = arith.mulf %86, %87 : vector<16x128xf32>
    %89 = math.tanh %88 : vector<16x128xf32>
    %90 = vector.broadcast %19 : vector<1x128xf32> to vector<16x128xf32>
    %91 = arith.mulf %89, %90 : vector<16x128xf32>
    %92 = vector.broadcast %22 : vector<1x128xf32> to vector<16x128xf32>
    %93 = arith.addf %91, %92 : vector<16x128xf32>
    %94 = vector.extract_strided_slice %93 {offsets = [0, 0], sizes = [16, 32], strides = [1, 1]} : vector<16x128xf32> to vector<16x32xf32>
    %95 = vector.extract_strided_slice %93 {offsets = [0, 32], sizes = [16, 32], strides = [1, 1]} : vector<16x128xf32> to vector<16x32xf32>
    %96 = vector.extract_strided_slice %93 {offsets = [0, 64], sizes = [16, 32], strides = [1, 1]} : vector<16x128xf32> to vector<16x32xf32>
    %97 = vector.extract_strided_slice %93 {offsets = [0, 96], sizes = [16, 32], strides = [1, 1]} : vector<16x128xf32> to vector<16x32xf32>
    %98 = arith.mulf %95, %68 : vector<16x32xf32>
    %99 = arith.mulf %94, %96 : vector<16x32xf32>
    %100 = arith.addf %98, %99 : vector<16x32xf32>
    %101 = math.tanh %100 : vector<16x32xf32>
    %102 = arith.mulf %97, %101 : vector<16x32xf32>
    %103 = vector.broadcast %c1_i32 : i32 to vector<16x1xi32>
    %104 = vector.broadcast %69 : i32 to vector<16x1xi32>
    %105 = arith.select %10, %103, %104 : vector<16x1xi1>, vector<16x1xi32>
    %106 = arith.cmpi slt, %105, %7 : vector<16x1xi32>
    %107 = vector.shape_cast %106 : vector<16x1xi1> to vector<16x1xi1>
    %108 = vector.broadcast %107 : vector<16x1xi1> to vector<16x32xi1>
    %109 = arith.select %108, %102, %65 : vector<16x32xi1>, vector<16x32xf32>
    %110 = vector.shape_cast %106 : vector<16x1xi1> to vector<16x1xi1>
    %111 = vector.broadcast %110 : vector<16x1xi1> to vector<16x32xi1>
    %112 = arith.select %111, %100, %68 : vector<16x32xi1>, vector<16x32xf32>
    %c2_i32 = arith.constant 2 : i32
    %c7_i32_29 = arith.constant 7 : i32
    %113 = arith.subi %c7_i32_29, %c2_i32 : i32
    %c8_i32_30 = arith.constant 8 : i32
    %114 = arith.muli %c2_i32, %c8_i32_30 : i32
    %115 = tpu.assume_multiple %114, 8 : i32
    %c8_i32_31 = arith.constant 8 : i32
    %116 = arith.muli %113, %c8_i32_31 : i32
    %117 = tpu.assume_multiple %116, 8 : i32
    %118 = arith.index_cast %115 : i32 to index
    %c0_32 = arith.constant 0 : index
    %119 = vector.load %arg8[%118, %c0_32] : memref<64x256xf32, #tpu.memory_space<vmem>>, vector<8x128xf32>
    %120 = arith.index_cast %117 : i32 to index
    %c128_33 = arith.constant 128 : index
    %121 = vector.load %arg8[%120, %c128_33] : memref<64x256xf32, #tpu.memory_space<vmem>>, vector<8x128xf32>
    %122 = tpu.concatenate %119, %121 in 0 : vector<8x128xf32>, vector<8x128xf32> -> vector<16x128xf32>
    %c0_34 = arith.constant 0 : index
    %c0_35 = arith.constant 0 : index
    %123 = vector.load %arg4[%c0_34, %c0_35] : memref<32x256xf32, #tpu.memory_space<vmem>>, vector<32x256xf32>
    %cst_36 = arith.constant dense<0.000000e+00> : vector<16x256xf32>
    %124 = tpu.matmul %109, %123, %cst_36 {dimension_numbers = #tpu.dot_dimension_numbers<[1], [0], [0], [1], [0, 0, 1, 1], [], []>} : vector<16x32xf32>, vector<32x256xf32>, vector<16x256xf32> -> vector<16x256xf32>
    %125 = vector.extract_strided_slice %124 {offsets = [0, 0], sizes = [16, 128], strides = [1, 1]} : vector<16x256xf32> to vector<16x128xf32>
    %126 = vector.extract_strided_slice %124 {offsets = [0, 128], sizes = [16, 128], strides = [1, 1]} : vector<16x256xf32> to vector<16x128xf32>
    %127 = vector.shape_cast %10 : vector<16x1xi1> to vector<16x1xi1>
    %128 = vector.broadcast %127 : vector<16x1xi1> to vector<16x128xi1>
    %129 = arith.select %128, %125, %126 : vector<16x128xi1>, vector<16x128xf32>
    %130 = arith.addf %122, %129 : vector<16x128xf32>
    %131 = vector.broadcast %19 : vector<1x128xf32> to vector<16x128xf32>
    %132 = arith.mulf %130, %131 : vector<16x128xf32>
    %133 = math.tanh %132 : vector<16x128xf32>
    %134 = vector.broadcast %19 : vector<1x128xf32> to vector<16x128xf32>
    %135 = arith.mulf %133, %134 : vector<16x128xf32>
    %136 = vector.broadcast %22 : vector<1x128xf32> to vector<16x128xf32>
    %137 = arith.addf %135, %136 : vector<16x128xf32>
    %138 = vector.extract_strided_slice %137 {offsets = [0, 0], sizes = [16, 32], strides = [1, 1]} : vector<16x128xf32> to vector<16x32xf32>
    %139 = vector.extract_strided_slice %137 {offsets = [0, 32], sizes = [16, 32], strides = [1, 1]} : vector<16x128xf32> to vector<16x32xf32>
    %140 = vector.extract_strided_slice %137 {offsets = [0, 64], sizes = [16, 32], strides = [1, 1]} : vector<16x128xf32> to vector<16x32xf32>
    %141 = vector.extract_strided_slice %137 {offsets = [0, 96], sizes = [16, 32], strides = [1, 1]} : vector<16x128xf32> to vector<16x32xf32>
    %142 = arith.mulf %139, %112 : vector<16x32xf32>
    %143 = arith.mulf %138, %140 : vector<16x32xf32>
    %144 = arith.addf %142, %143 : vector<16x32xf32>
    %145 = math.tanh %144 : vector<16x32xf32>
    %146 = arith.mulf %141, %145 : vector<16x32xf32>
    %147 = vector.broadcast %c2_i32 : i32 to vector<16x1xi32>
    %148 = vector.broadcast %113 : i32 to vector<16x1xi32>
    %149 = arith.select %10, %147, %148 : vector<16x1xi1>, vector<16x1xi32>
    %150 = arith.cmpi slt, %149, %7 : vector<16x1xi32>
    %151 = vector.shape_cast %150 : vector<16x1xi1> to vector<16x1xi1>
    %152 = vector.broadcast %151 : vector<16x1xi1> to vector<16x32xi1>
    %153 = arith.select %152, %146, %109 : vector<16x32xi1>, vector<16x32xf32>
    %154 = vector.shape_cast %150 : vector<16x1xi1> to vector<16x1xi1>
    %155 = vector.broadcast %154 : vector<16x1xi1> to vector<16x32xi1>
    %156 = arith.select %155, %144, %112 : vector<16x32xi1>, vector<16x32xf32>
    %c3_i32 = arith.constant 3 : i32
    %c7_i32_37 = arith.constant 7 : i32
    %157 = arith.subi %c7_i32_37, %c3_i32 : i32
    %c8_i32_38 = arith.constant 8 : i32
    %158 = arith.muli %c3_i32, %c8_i32_38 : i32
    %159 = tpu.assume_multiple %158, 8 : i32
    %c8_i32_39 = arith.constant 8 : i32
    %160 = arith.muli %157, %c8_i32_39 : i32
    %161 = tpu.assume_multiple %160, 8 : i32
    %162 = arith.index_cast %159 : i32 to index
    %c0_40 = arith.constant 0 : index
    %163 = vector.load %arg8[%162, %c0_40] : memref<64x256xf32, #tpu.memory_space<vmem>>, vector<8x128xf32>
    %164 = arith.index_cast %161 : i32 to index
    %c128_41 = arith.constant 128 : index
    %165 = vector.load %arg8[%164, %c128_41] : memref<64x256xf32, #tpu.memory_space<vmem>>, vector<8x128xf32>
    %166 = tpu.concatenate %163, %165 in 0 : vector<8x128xf32>, vector<8x128xf32> -> vector<16x128xf32>
    %c0_42 = arith.constant 0 : index
    %c0_43 = arith.constant 0 : index
    %167 = vector.load %arg4[%c0_42, %c0_43] : memref<32x256xf32, #tpu.memory_space<vmem>>, vector<32x256xf32>
    %cst_44 = arith.constant dense<0.000000e+00> : vector<16x256xf32>
    %168 = tpu.matmul %153, %167, %cst_44 {dimension_numbers = #tpu.dot_dimension_numbers<[1], [0], [0], [1], [0, 0, 1, 1], [], []>} : vector<16x32xf32>, vector<32x256xf32>, vector<16x256xf32> -> vector<16x256xf32>
    %169 = vector.extract_strided_slice %168 {offsets = [0, 0], sizes = [16, 128], strides = [1, 1]} : vector<16x256xf32> to vector<16x128xf32>
    %170 = vector.extract_strided_slice %168 {offsets = [0, 128], sizes = [16, 128], strides = [1, 1]} : vector<16x256xf32> to vector<16x128xf32>
    %171 = vector.shape_cast %10 : vector<16x1xi1> to vector<16x1xi1>
    %172 = vector.broadcast %171 : vector<16x1xi1> to vector<16x128xi1>
    %173 = arith.select %172, %169, %170 : vector<16x128xi1>, vector<16x128xf32>
    %174 = arith.addf %166, %173 : vector<16x128xf32>
    %175 = vector.broadcast %19 : vector<1x128xf32> to vector<16x128xf32>
    %176 = arith.mulf %174, %175 : vector<16x128xf32>
    %177 = math.tanh %176 : vector<16x128xf32>
    %178 = vector.broadcast %19 : vector<1x128xf32> to vector<16x128xf32>
    %179 = arith.mulf %177, %178 : vector<16x128xf32>
    %180 = vector.broadcast %22 : vector<1x128xf32> to vector<16x128xf32>
    %181 = arith.addf %179, %180 : vector<16x128xf32>
    %182 = vector.extract_strided_slice %181 {offsets = [0, 0], sizes = [16, 32], strides = [1, 1]} : vector<16x128xf32> to vector<16x32xf32>
    %183 = vector.extract_strided_slice %181 {offsets = [0, 32], sizes = [16, 32], strides = [1, 1]} : vector<16x128xf32> to vector<16x32xf32>
    %184 = vector.extract_strided_slice %181 {offsets = [0, 64], sizes = [16, 32], strides = [1, 1]} : vector<16x128xf32> to vector<16x32xf32>
    %185 = vector.extract_strided_slice %181 {offsets = [0, 96], sizes = [16, 32], strides = [1, 1]} : vector<16x128xf32> to vector<16x32xf32>
    %186 = arith.mulf %183, %156 : vector<16x32xf32>
    %187 = arith.mulf %182, %184 : vector<16x32xf32>
    %188 = arith.addf %186, %187 : vector<16x32xf32>
    %189 = math.tanh %188 : vector<16x32xf32>
    %190 = arith.mulf %185, %189 : vector<16x32xf32>
    %191 = vector.broadcast %c3_i32 : i32 to vector<16x1xi32>
    %192 = vector.broadcast %157 : i32 to vector<16x1xi32>
    %193 = arith.select %10, %191, %192 : vector<16x1xi1>, vector<16x1xi32>
    %194 = arith.cmpi slt, %193, %7 : vector<16x1xi32>
    %195 = vector.shape_cast %194 : vector<16x1xi1> to vector<16x1xi1>
    %196 = vector.broadcast %195 : vector<16x1xi1> to vector<16x32xi1>
    %197 = arith.select %196, %190, %153 : vector<16x32xi1>, vector<16x32xf32>
    %198 = vector.shape_cast %194 : vector<16x1xi1> to vector<16x1xi1>
    %199 = vector.broadcast %198 : vector<16x1xi1> to vector<16x32xi1>
    %200 = arith.select %199, %188, %156 : vector<16x32xi1>, vector<16x32xf32>
    %c4_i32 = arith.constant 4 : i32
    %c7_i32_45 = arith.constant 7 : i32
    %201 = arith.subi %c7_i32_45, %c4_i32 : i32
    %c8_i32_46 = arith.constant 8 : i32
    %202 = arith.muli %c4_i32, %c8_i32_46 : i32
    %203 = tpu.assume_multiple %202, 8 : i32
    %c8_i32_47 = arith.constant 8 : i32
    %204 = arith.muli %201, %c8_i32_47 : i32
    %205 = tpu.assume_multiple %204, 8 : i32
    %206 = arith.index_cast %203 : i32 to index
    %c0_48 = arith.constant 0 : index
    %207 = vector.load %arg8[%206, %c0_48] : memref<64x256xf32, #tpu.memory_space<vmem>>, vector<8x128xf32>
    %208 = arith.index_cast %205 : i32 to index
    %c128_49 = arith.constant 128 : index
    %209 = vector.load %arg8[%208, %c128_49] : memref<64x256xf32, #tpu.memory_space<vmem>>, vector<8x128xf32>
    %210 = tpu.concatenate %207, %209 in 0 : vector<8x128xf32>, vector<8x128xf32> -> vector<16x128xf32>
    %c0_50 = arith.constant 0 : index
    %c0_51 = arith.constant 0 : index
    %211 = vector.load %arg4[%c0_50, %c0_51] : memref<32x256xf32, #tpu.memory_space<vmem>>, vector<32x256xf32>
    %cst_52 = arith.constant dense<0.000000e+00> : vector<16x256xf32>
    %212 = tpu.matmul %197, %211, %cst_52 {dimension_numbers = #tpu.dot_dimension_numbers<[1], [0], [0], [1], [0, 0, 1, 1], [], []>} : vector<16x32xf32>, vector<32x256xf32>, vector<16x256xf32> -> vector<16x256xf32>
    %213 = vector.extract_strided_slice %212 {offsets = [0, 0], sizes = [16, 128], strides = [1, 1]} : vector<16x256xf32> to vector<16x128xf32>
    %214 = vector.extract_strided_slice %212 {offsets = [0, 128], sizes = [16, 128], strides = [1, 1]} : vector<16x256xf32> to vector<16x128xf32>
    %215 = vector.shape_cast %10 : vector<16x1xi1> to vector<16x1xi1>
    %216 = vector.broadcast %215 : vector<16x1xi1> to vector<16x128xi1>
    %217 = arith.select %216, %213, %214 : vector<16x128xi1>, vector<16x128xf32>
    %218 = arith.addf %210, %217 : vector<16x128xf32>
    %219 = vector.broadcast %19 : vector<1x128xf32> to vector<16x128xf32>
    %220 = arith.mulf %218, %219 : vector<16x128xf32>
    %221 = math.tanh %220 : vector<16x128xf32>
    %222 = vector.broadcast %19 : vector<1x128xf32> to vector<16x128xf32>
    %223 = arith.mulf %221, %222 : vector<16x128xf32>
    %224 = vector.broadcast %22 : vector<1x128xf32> to vector<16x128xf32>
    %225 = arith.addf %223, %224 : vector<16x128xf32>
    %226 = vector.extract_strided_slice %225 {offsets = [0, 0], sizes = [16, 32], strides = [1, 1]} : vector<16x128xf32> to vector<16x32xf32>
    %227 = vector.extract_strided_slice %225 {offsets = [0, 32], sizes = [16, 32], strides = [1, 1]} : vector<16x128xf32> to vector<16x32xf32>
    %228 = vector.extract_strided_slice %225 {offsets = [0, 64], sizes = [16, 32], strides = [1, 1]} : vector<16x128xf32> to vector<16x32xf32>
    %229 = vector.extract_strided_slice %225 {offsets = [0, 96], sizes = [16, 32], strides = [1, 1]} : vector<16x128xf32> to vector<16x32xf32>
    %230 = arith.mulf %227, %200 : vector<16x32xf32>
    %231 = arith.mulf %226, %228 : vector<16x32xf32>
    %232 = arith.addf %230, %231 : vector<16x32xf32>
    %233 = math.tanh %232 : vector<16x32xf32>
    %234 = arith.mulf %229, %233 : vector<16x32xf32>
    %235 = vector.broadcast %c4_i32 : i32 to vector<16x1xi32>
    %236 = vector.broadcast %201 : i32 to vector<16x1xi32>
    %237 = arith.select %10, %235, %236 : vector<16x1xi1>, vector<16x1xi32>
    %238 = arith.cmpi slt, %237, %7 : vector<16x1xi32>
    %239 = vector.shape_cast %238 : vector<16x1xi1> to vector<16x1xi1>
    %240 = vector.broadcast %239 : vector<16x1xi1> to vector<16x32xi1>
    %241 = arith.select %240, %234, %197 : vector<16x32xi1>, vector<16x32xf32>
    %242 = vector.shape_cast %238 : vector<16x1xi1> to vector<16x1xi1>
    %243 = vector.broadcast %242 : vector<16x1xi1> to vector<16x32xi1>
    %244 = arith.select %243, %232, %200 : vector<16x32xi1>, vector<16x32xf32>
    %c5_i32 = arith.constant 5 : i32
    %c7_i32_53 = arith.constant 7 : i32
    %245 = arith.subi %c7_i32_53, %c5_i32 : i32
    %c8_i32_54 = arith.constant 8 : i32
    %246 = arith.muli %c5_i32, %c8_i32_54 : i32
    %247 = tpu.assume_multiple %246, 8 : i32
    %c8_i32_55 = arith.constant 8 : i32
    %248 = arith.muli %245, %c8_i32_55 : i32
    %249 = tpu.assume_multiple %248, 8 : i32
    %250 = arith.index_cast %247 : i32 to index
    %c0_56 = arith.constant 0 : index
    %251 = vector.load %arg8[%250, %c0_56] : memref<64x256xf32, #tpu.memory_space<vmem>>, vector<8x128xf32>
    %252 = arith.index_cast %249 : i32 to index
    %c128_57 = arith.constant 128 : index
    %253 = vector.load %arg8[%252, %c128_57] : memref<64x256xf32, #tpu.memory_space<vmem>>, vector<8x128xf32>
    %254 = tpu.concatenate %251, %253 in 0 : vector<8x128xf32>, vector<8x128xf32> -> vector<16x128xf32>
    %c0_58 = arith.constant 0 : index
    %c0_59 = arith.constant 0 : index
    %255 = vector.load %arg4[%c0_58, %c0_59] : memref<32x256xf32, #tpu.memory_space<vmem>>, vector<32x256xf32>
    %cst_60 = arith.constant dense<0.000000e+00> : vector<16x256xf32>
    %256 = tpu.matmul %241, %255, %cst_60 {dimension_numbers = #tpu.dot_dimension_numbers<[1], [0], [0], [1], [0, 0, 1, 1], [], []>} : vector<16x32xf32>, vector<32x256xf32>, vector<16x256xf32> -> vector<16x256xf32>
    %257 = vector.extract_strided_slice %256 {offsets = [0, 0], sizes = [16, 128], strides = [1, 1]} : vector<16x256xf32> to vector<16x128xf32>
    %258 = vector.extract_strided_slice %256 {offsets = [0, 128], sizes = [16, 128], strides = [1, 1]} : vector<16x256xf32> to vector<16x128xf32>
    %259 = vector.shape_cast %10 : vector<16x1xi1> to vector<16x1xi1>
    %260 = vector.broadcast %259 : vector<16x1xi1> to vector<16x128xi1>
    %261 = arith.select %260, %257, %258 : vector<16x128xi1>, vector<16x128xf32>
    %262 = arith.addf %254, %261 : vector<16x128xf32>
    %263 = vector.broadcast %19 : vector<1x128xf32> to vector<16x128xf32>
    %264 = arith.mulf %262, %263 : vector<16x128xf32>
    %265 = math.tanh %264 : vector<16x128xf32>
    %266 = vector.broadcast %19 : vector<1x128xf32> to vector<16x128xf32>
    %267 = arith.mulf %265, %266 : vector<16x128xf32>
    %268 = vector.broadcast %22 : vector<1x128xf32> to vector<16x128xf32>
    %269 = arith.addf %267, %268 : vector<16x128xf32>
    %270 = vector.extract_strided_slice %269 {offsets = [0, 0], sizes = [16, 32], strides = [1, 1]} : vector<16x128xf32> to vector<16x32xf32>
    %271 = vector.extract_strided_slice %269 {offsets = [0, 32], sizes = [16, 32], strides = [1, 1]} : vector<16x128xf32> to vector<16x32xf32>
    %272 = vector.extract_strided_slice %269 {offsets = [0, 64], sizes = [16, 32], strides = [1, 1]} : vector<16x128xf32> to vector<16x32xf32>
    %273 = vector.extract_strided_slice %269 {offsets = [0, 96], sizes = [16, 32], strides = [1, 1]} : vector<16x128xf32> to vector<16x32xf32>
    %274 = arith.mulf %271, %244 : vector<16x32xf32>
    %275 = arith.mulf %270, %272 : vector<16x32xf32>
    %276 = arith.addf %274, %275 : vector<16x32xf32>
    %277 = math.tanh %276 : vector<16x32xf32>
    %278 = arith.mulf %273, %277 : vector<16x32xf32>
    %279 = vector.broadcast %c5_i32 : i32 to vector<16x1xi32>
    %280 = vector.broadcast %245 : i32 to vector<16x1xi32>
    %281 = arith.select %10, %279, %280 : vector<16x1xi1>, vector<16x1xi32>
    %282 = arith.cmpi slt, %281, %7 : vector<16x1xi32>
    %283 = vector.shape_cast %282 : vector<16x1xi1> to vector<16x1xi1>
    %284 = vector.broadcast %283 : vector<16x1xi1> to vector<16x32xi1>
    %285 = arith.select %284, %278, %241 : vector<16x32xi1>, vector<16x32xf32>
    %286 = vector.shape_cast %282 : vector<16x1xi1> to vector<16x1xi1>
    %287 = vector.broadcast %286 : vector<16x1xi1> to vector<16x32xi1>
    %288 = arith.select %287, %276, %244 : vector<16x32xi1>, vector<16x32xf32>
    %c6_i32 = arith.constant 6 : i32
    %c7_i32_61 = arith.constant 7 : i32
    %289 = arith.subi %c7_i32_61, %c6_i32 : i32
    %c8_i32_62 = arith.constant 8 : i32
    %290 = arith.muli %c6_i32, %c8_i32_62 : i32
    %291 = tpu.assume_multiple %290, 8 : i32
    %c8_i32_63 = arith.constant 8 : i32
    %292 = arith.muli %289, %c8_i32_63 : i32
    %293 = tpu.assume_multiple %292, 8 : i32
    %294 = arith.index_cast %291 : i32 to index
    %c0_64 = arith.constant 0 : index
    %295 = vector.load %arg8[%294, %c0_64] : memref<64x256xf32, #tpu.memory_space<vmem>>, vector<8x128xf32>
    %296 = arith.index_cast %293 : i32 to index
    %c128_65 = arith.constant 128 : index
    %297 = vector.load %arg8[%296, %c128_65] : memref<64x256xf32, #tpu.memory_space<vmem>>, vector<8x128xf32>
    %298 = tpu.concatenate %295, %297 in 0 : vector<8x128xf32>, vector<8x128xf32> -> vector<16x128xf32>
    %c0_66 = arith.constant 0 : index
    %c0_67 = arith.constant 0 : index
    %299 = vector.load %arg4[%c0_66, %c0_67] : memref<32x256xf32, #tpu.memory_space<vmem>>, vector<32x256xf32>
    %cst_68 = arith.constant dense<0.000000e+00> : vector<16x256xf32>
    %300 = tpu.matmul %285, %299, %cst_68 {dimension_numbers = #tpu.dot_dimension_numbers<[1], [0], [0], [1], [0, 0, 1, 1], [], []>} : vector<16x32xf32>, vector<32x256xf32>, vector<16x256xf32> -> vector<16x256xf32>
    %301 = vector.extract_strided_slice %300 {offsets = [0, 0], sizes = [16, 128], strides = [1, 1]} : vector<16x256xf32> to vector<16x128xf32>
    %302 = vector.extract_strided_slice %300 {offsets = [0, 128], sizes = [16, 128], strides = [1, 1]} : vector<16x256xf32> to vector<16x128xf32>
    %303 = vector.shape_cast %10 : vector<16x1xi1> to vector<16x1xi1>
    %304 = vector.broadcast %303 : vector<16x1xi1> to vector<16x128xi1>
    %305 = arith.select %304, %301, %302 : vector<16x128xi1>, vector<16x128xf32>
    %306 = arith.addf %298, %305 : vector<16x128xf32>
    %307 = vector.broadcast %19 : vector<1x128xf32> to vector<16x128xf32>
    %308 = arith.mulf %306, %307 : vector<16x128xf32>
    %309 = math.tanh %308 : vector<16x128xf32>
    %310 = vector.broadcast %19 : vector<1x128xf32> to vector<16x128xf32>
    %311 = arith.mulf %309, %310 : vector<16x128xf32>
    %312 = vector.broadcast %22 : vector<1x128xf32> to vector<16x128xf32>
    %313 = arith.addf %311, %312 : vector<16x128xf32>
    %314 = vector.extract_strided_slice %313 {offsets = [0, 0], sizes = [16, 32], strides = [1, 1]} : vector<16x128xf32> to vector<16x32xf32>
    %315 = vector.extract_strided_slice %313 {offsets = [0, 32], sizes = [16, 32], strides = [1, 1]} : vector<16x128xf32> to vector<16x32xf32>
    %316 = vector.extract_strided_slice %313 {offsets = [0, 64], sizes = [16, 32], strides = [1, 1]} : vector<16x128xf32> to vector<16x32xf32>
    %317 = vector.extract_strided_slice %313 {offsets = [0, 96], sizes = [16, 32], strides = [1, 1]} : vector<16x128xf32> to vector<16x32xf32>
    %318 = arith.mulf %315, %288 : vector<16x32xf32>
    %319 = arith.mulf %314, %316 : vector<16x32xf32>
    %320 = arith.addf %318, %319 : vector<16x32xf32>
    %321 = math.tanh %320 : vector<16x32xf32>
    %322 = arith.mulf %317, %321 : vector<16x32xf32>
    %323 = vector.broadcast %c6_i32 : i32 to vector<16x1xi32>
    %324 = vector.broadcast %289 : i32 to vector<16x1xi32>
    %325 = arith.select %10, %323, %324 : vector<16x1xi1>, vector<16x1xi32>
    %326 = arith.cmpi slt, %325, %7 : vector<16x1xi32>
    %327 = vector.shape_cast %326 : vector<16x1xi1> to vector<16x1xi1>
    %328 = vector.broadcast %327 : vector<16x1xi1> to vector<16x32xi1>
    %329 = arith.select %328, %322, %285 : vector<16x32xi1>, vector<16x32xf32>
    %330 = vector.shape_cast %326 : vector<16x1xi1> to vector<16x1xi1>
    %331 = vector.broadcast %330 : vector<16x1xi1> to vector<16x32xi1>
    %332 = arith.select %331, %320, %288 : vector<16x32xi1>, vector<16x32xf32>
    %c7_i32_69 = arith.constant 7 : i32
    %c7_i32_70 = arith.constant 7 : i32
    %333 = arith.subi %c7_i32_70, %c7_i32_69 : i32
    %c8_i32_71 = arith.constant 8 : i32
    %334 = arith.muli %c7_i32_69, %c8_i32_71 : i32
    %335 = tpu.assume_multiple %334, 8 : i32
    %c8_i32_72 = arith.constant 8 : i32
    %336 = arith.muli %333, %c8_i32_72 : i32
    %337 = tpu.assume_multiple %336, 8 : i32
    %338 = arith.index_cast %335 : i32 to index
    %c0_73 = arith.constant 0 : index
    %339 = vector.load %arg8[%338, %c0_73] : memref<64x256xf32, #tpu.memory_space<vmem>>, vector<8x128xf32>
    %340 = arith.index_cast %337 : i32 to index
    %c128_74 = arith.constant 128 : index
    %341 = vector.load %arg8[%340, %c128_74] : memref<64x256xf32, #tpu.memory_space<vmem>>, vector<8x128xf32>
    %342 = tpu.concatenate %339, %341 in 0 : vector<8x128xf32>, vector<8x128xf32> -> vector<16x128xf32>
    %c0_75 = arith.constant 0 : index
    %c0_76 = arith.constant 0 : index
    %343 = vector.load %arg4[%c0_75, %c0_76] : memref<32x256xf32, #tpu.memory_space<vmem>>, vector<32x256xf32>
    %cst_77 = arith.constant dense<0.000000e+00> : vector<16x256xf32>
    %344 = tpu.matmul %329, %343, %cst_77 {dimension_numbers = #tpu.dot_dimension_numbers<[1], [0], [0], [1], [0, 0, 1, 1], [], []>} : vector<16x32xf32>, vector<32x256xf32>, vector<16x256xf32> -> vector<16x256xf32>
    %345 = vector.extract_strided_slice %344 {offsets = [0, 0], sizes = [16, 128], strides = [1, 1]} : vector<16x256xf32> to vector<16x128xf32>
    %346 = vector.extract_strided_slice %344 {offsets = [0, 128], sizes = [16, 128], strides = [1, 1]} : vector<16x256xf32> to vector<16x128xf32>
    %347 = vector.shape_cast %10 : vector<16x1xi1> to vector<16x1xi1>
    %348 = vector.broadcast %347 : vector<16x1xi1> to vector<16x128xi1>
    %349 = arith.select %348, %345, %346 : vector<16x128xi1>, vector<16x128xf32>
    %350 = arith.addf %342, %349 : vector<16x128xf32>
    %351 = vector.broadcast %19 : vector<1x128xf32> to vector<16x128xf32>
    %352 = arith.mulf %350, %351 : vector<16x128xf32>
    %353 = math.tanh %352 : vector<16x128xf32>
    %354 = vector.broadcast %19 : vector<1x128xf32> to vector<16x128xf32>
    %355 = arith.mulf %353, %354 : vector<16x128xf32>
    %356 = vector.broadcast %22 : vector<1x128xf32> to vector<16x128xf32>
    %357 = arith.addf %355, %356 : vector<16x128xf32>
    %358 = vector.extract_strided_slice %357 {offsets = [0, 0], sizes = [16, 32], strides = [1, 1]} : vector<16x128xf32> to vector<16x32xf32>
    %359 = vector.extract_strided_slice %357 {offsets = [0, 32], sizes = [16, 32], strides = [1, 1]} : vector<16x128xf32> to vector<16x32xf32>
    %360 = vector.extract_strided_slice %357 {offsets = [0, 64], sizes = [16, 32], strides = [1, 1]} : vector<16x128xf32> to vector<16x32xf32>
    %361 = vector.extract_strided_slice %357 {offsets = [0, 96], sizes = [16, 32], strides = [1, 1]} : vector<16x128xf32> to vector<16x32xf32>
    %362 = arith.mulf %359, %332 : vector<16x32xf32>
    %363 = arith.mulf %358, %360 : vector<16x32xf32>
    %364 = arith.addf %362, %363 : vector<16x32xf32>
    %365 = math.tanh %364 : vector<16x32xf32>
    %366 = arith.mulf %361, %365 : vector<16x32xf32>
    %367 = vector.broadcast %c7_i32_69 : i32 to vector<16x1xi32>
    %368 = vector.broadcast %333 : i32 to vector<16x1xi32>
    %369 = arith.select %10, %367, %368 : vector<16x1xi1>, vector<16x1xi32>
    %370 = arith.cmpi slt, %369, %7 : vector<16x1xi32>
    %371 = vector.shape_cast %370 : vector<16x1xi1> to vector<16x1xi1>
    %372 = vector.broadcast %371 : vector<16x1xi1> to vector<16x32xi1>
    %373 = arith.select %372, %366, %329 : vector<16x32xi1>, vector<16x32xf32>
    %374 = vector.shape_cast %370 : vector<16x1xi1> to vector<16x1xi1>
    %375 = vector.broadcast %374 : vector<16x1xi1> to vector<16x32xi1>
    %376 = arith.select %375, %364, %332 : vector<16x32xi1>, vector<16x32xf32>
    %c8_i32_78 = arith.constant 8 : i32
    %377 = vector.extract_strided_slice %373 {offsets = [0, 0], sizes = [8, 32], strides = [1, 1]} : vector<16x32xf32> to vector<8x32xf32>
    %378 = vector.extract_strided_slice %373 {offsets = [8, 0], sizes = [8, 32], strides = [1, 1]} : vector<16x32xf32> to vector<8x32xf32>
    %379 = tpu.concatenate %377, %378 in 1 : vector<8x32xf32>, vector<8x32xf32> -> vector<8x64xf32>
    %c0_79 = arith.constant 0 : index
    %c0_80 = arith.constant 0 : index
    %380 = vector.load %arg5[%c0_79, %c0_80] : memref<64x3xf32, #tpu.memory_space<vmem>>, vector<64x3xf32>
    %cst_81 = arith.constant dense<0.000000e+00> : vector<8x3xf32>
    %381 = tpu.matmul %379, %380, %cst_81 {dimension_numbers = #tpu.dot_dimension_numbers<[1], [0], [0], [1], [0, 0, 1, 1], [], []>} : vector<8x64xf32>, vector<64x3xf32>, vector<8x3xf32> -> vector<8x3xf32>
    %c0_82 = arith.constant 0 : index
    %c0_83 = arith.constant 0 : index
    %382 = vector.load %arg6[%c0_82, %c0_83] : memref<1x3xf32, #tpu.memory_space<vmem>>, vector<1x3xf32>
    %383 = vector.broadcast %382 : vector<1x3xf32> to vector<8x3xf32>
    %384 = arith.addf %381, %383 : vector<8x3xf32>
    %c0_84 = arith.constant 0 : index
    %c0_85 = arith.constant 0 : index
    %385 = vector.load %arg7[%c0_84, %c0_85] : memref<8x3xf32, #tpu.memory_space<vmem>>, vector<8x3xf32>
    tpu.vector_store %arg7[%c0_84, %c0_85], %384 {strides = array<i32>} : memref<8x3xf32, #tpu.memory_space<vmem>>, vector<8x3xf32>,
    return
  }
}

module attributes {stable_mosaic.version = 11 : i64} {
  func.func @_bilstm_layer_kernel(%arg0: memref<16x1xi32, #tpu.memory_space<vmem>>, %arg1: memref<64x16xf32, #tpu.memory_space<vmem>>, %arg2: memref<16x256xf32, #tpu.memory_space<vmem>>, %arg3: memref<1x256xf32, #tpu.memory_space<vmem>>, %arg4: memref<32x256xf32, #tpu.memory_space<vmem>>, %arg5: memref<8x8x32xf32, #tpu.memory_space<vmem>>, %arg6: memref<8x8x32xf32, #tpu.memory_space<vmem>>, %arg7: memref<64x256xf32, #tpu.memory_space<vmem>>) attributes {dimension_semantics = [], scalar_prefetch = 0 : i64, scratch_operands = 1 : i64, tpu.core_type = #tpu.core_type<tc>} {
    %c0 = arith.constant 0 : index
    %c0_0 = arith.constant 0 : index
    %0 = vector.load %arg1[%c0, %c0_0] : memref<64x16xf32, #tpu.memory_space<vmem>>, vector<64x16xf32>
    %c0_1 = arith.constant 0 : index
    %c0_2 = arith.constant 0 : index
    %1 = vector.load %arg2[%c0_1, %c0_2] : memref<16x256xf32, #tpu.memory_space<vmem>>, vector<16x256xf32>
    %cst = arith.constant dense<0.000000e+00> : vector<64x256xf32>
    %2 = tpu.matmul %0, %1, %cst {dimension_numbers = #tpu.dot_dimension_numbers<[1], [0], [0], [1], [0, 0, 1, 1], [], []>} : vector<64x16xf32>, vector<16x256xf32>, vector<64x256xf32> -> vector<64x256xf32>
    %c0_3 = arith.constant 0 : index
    %c0_4 = arith.constant 0 : index
    %3 = vector.load %arg3[%c0_3, %c0_4] : memref<1x256xf32, #tpu.memory_space<vmem>>, vector<1x256xf32>
    %4 = vector.broadcast %3 : vector<1x256xf32> to vector<64x256xf32>
    %5 = arith.addf %2, %4 : vector<64x256xf32>
    %c0_5 = arith.constant 0 : index
    %c0_6 = arith.constant 0 : index
    %6 = vector.load %arg7[%c0_5, %c0_6] : memref<64x256xf32, #tpu.memory_space<vmem>>, vector<64x256xf32>
    tpu.vector_store %arg7[%c0_5, %c0_6], %5 {strides = array<i32>} : memref<64x256xf32, #tpu.memory_space<vmem>>, vector<64x256xf32>,
    %c0_7 = arith.constant 0 : index
    %c0_8 = arith.constant 0 : index
    %7 = vector.load %arg0[%c0_7, %c0_8] : memref<16x1xi32, #tpu.memory_space<vmem>>, vector<16x1xi32>
    %8 = tpu.iota {dimensions = array<i32: 0>} : vector<16x1xi32>
    %c8_i32 = arith.constant 8 : i32
    %9 = vector.broadcast %c8_i32 : i32 to vector<16x1xi32>
    %10 = arith.cmpi slt, %8, %9 : vector<16x1xi32>
    %11 = tpu.iota {dimensions = array<i32: 1>} : vector<1x128xi32>
    %c64_i32 = arith.constant 64 : i32
    %12 = vector.broadcast %c64_i32 : i32 to vector<1x128xi32>
    %13 = arith.cmpi sge, %11, %12 : vector<1x128xi32>
    %c96_i32 = arith.constant 96 : i32
    %14 = vector.broadcast %c96_i32 : i32 to vector<1x128xi32>
    %15 = arith.cmpi slt, %11, %14 : vector<1x128xi32>
    %16 = arith.andi %13, %15 : vector<1x128xi1>
    %cst_9 = arith.constant 1.000000e+00 : f32
    %cst_10 = arith.constant 5.000000e-01 : f32
    %17 = vector.broadcast %cst_9 : f32 to vector<1x128xf32>
    %18 = vector.broadcast %cst_10 : f32 to vector<1x128xf32>
    %19 = arith.select %16, %17, %18 : vector<1x128xi1>, vector<1x128xf32>
    %cst_11 = arith.constant 0.000000e+00 : f32
    %cst_12 = arith.constant 5.000000e-01 : f32
    %20 = vector.broadcast %cst_11 : f32 to vector<1x128xf32>
    %21 = vector.broadcast %cst_12 : f32 to vector<1x128xf32>
    %22 = arith.select %16, %20, %21 : vector<1x128xi1>, vector<1x128xf32>
    %cst_13 = arith.constant 0.000000e+00 : f32
    %23 = vector.broadcast %cst_13 : f32 to vector<16x32xf32>
    %cst_14 = arith.constant 0.000000e+00 : f32
    %24 = vector.broadcast %cst_14 : f32 to vector<16x32xf32>
    %c0_i32 = arith.constant 0 : i32
    %c7_i32 = arith.constant 7 : i32
    %25 = arith.subi %c7_i32, %c0_i32 : i32
    %c8_i32_15 = arith.constant 8 : i32
    %26 = arith.muli %c0_i32, %c8_i32_15 : i32
    %27 = tpu.assume_multiple %26, 8 : i32
    %c8_i32_16 = arith.constant 8 : i32
    %28 = arith.muli %25, %c8_i32_16 : i32
    %29 = tpu.assume_multiple %28, 8 : i32
    %30 = arith.index_cast %27 : i32 to index
    %c0_17 = arith.constant 0 : index
    %31 = vector.load %arg7[%30, %c0_17] : memref<64x256xf32, #tpu.memory_space<vmem>>, vector<8x128xf32>
    %32 = arith.index_cast %29 : i32 to index
    %c128 = arith.constant 128 : index
    %33 = vector.load %arg7[%32, %c128] : memref<64x256xf32, #tpu.memory_space<vmem>>, vector<8x128xf32>
    %34 = tpu.concatenate %31, %33 in 0 : vector<8x128xf32>, vector<8x128xf32> -> vector<16x128xf32>
    %c0_18 = arith.constant 0 : index
    %c0_19 = arith.constant 0 : index
    %35 = vector.load %arg4[%c0_18, %c0_19] : memref<32x256xf32, #tpu.memory_space<vmem>>, vector<32x256xf32>
    %cst_20 = arith.constant dense<0.000000e+00> : vector<16x256xf32>
    %36 = tpu.matmul %23, %35, %cst_20 {dimension_numbers = #tpu.dot_dimension_numbers<[1], [0], [0], [1], [0, 0, 1, 1], [], []>} : vector<16x32xf32>, vector<32x256xf32>, vector<16x256xf32> -> vector<16x256xf32>
    %37 = vector.extract_strided_slice %36 {offsets = [0, 0], sizes = [16, 128], strides = [1, 1]} : vector<16x256xf32> to vector<16x128xf32>
    %38 = vector.extract_strided_slice %36 {offsets = [0, 128], sizes = [16, 128], strides = [1, 1]} : vector<16x256xf32> to vector<16x128xf32>
    %39 = vector.shape_cast %10 : vector<16x1xi1> to vector<16x1xi1>
    %40 = vector.broadcast %39 : vector<16x1xi1> to vector<16x128xi1>
    %41 = arith.select %40, %37, %38 : vector<16x128xi1>, vector<16x128xf32>
    %42 = arith.addf %34, %41 : vector<16x128xf32>
    %43 = vector.broadcast %19 : vector<1x128xf32> to vector<16x128xf32>
    %44 = arith.mulf %42, %43 : vector<16x128xf32>
    %45 = math.tanh %44 : vector<16x128xf32>
    %46 = vector.broadcast %19 : vector<1x128xf32> to vector<16x128xf32>
    %47 = arith.mulf %45, %46 : vector<16x128xf32>
    %48 = vector.broadcast %22 : vector<1x128xf32> to vector<16x128xf32>
    %49 = arith.addf %47, %48 : vector<16x128xf32>
    %50 = vector.extract_strided_slice %49 {offsets = [0, 0], sizes = [16, 32], strides = [1, 1]} : vector<16x128xf32> to vector<16x32xf32>
    %51 = vector.extract_strided_slice %49 {offsets = [0, 32], sizes = [16, 32], strides = [1, 1]} : vector<16x128xf32> to vector<16x32xf32>
    %52 = vector.extract_strided_slice %49 {offsets = [0, 64], sizes = [16, 32], strides = [1, 1]} : vector<16x128xf32> to vector<16x32xf32>
    %53 = vector.extract_strided_slice %49 {offsets = [0, 96], sizes = [16, 32], strides = [1, 1]} : vector<16x128xf32> to vector<16x32xf32>
    %54 = arith.mulf %51, %24 : vector<16x32xf32>
    %55 = arith.mulf %50, %52 : vector<16x32xf32>
    %56 = arith.addf %54, %55 : vector<16x32xf32>
    %57 = math.tanh %56 : vector<16x32xf32>
    %58 = arith.mulf %53, %57 : vector<16x32xf32>
    %59 = vector.broadcast %c0_i32 : i32 to vector<16x1xi32>
    %60 = vector.broadcast %25 : i32 to vector<16x1xi32>
    %61 = arith.select %10, %59, %60 : vector<16x1xi1>, vector<16x1xi32>
    %62 = arith.cmpi slt, %61, %7 : vector<16x1xi32>
    %63 = vector.shape_cast %62 : vector<16x1xi1> to vector<16x1xi1>
    %64 = vector.broadcast %63 : vector<16x1xi1> to vector<16x32xi1>
    %65 = arith.select %64, %58, %23 : vector<16x32xi1>, vector<16x32xf32>
    %66 = vector.shape_cast %62 : vector<16x1xi1> to vector<16x1xi1>
    %67 = vector.broadcast %66 : vector<16x1xi1> to vector<16x32xi1>
    %68 = arith.select %67, %56, %24 : vector<16x32xi1>, vector<16x32xf32>
    %cst_21 = arith.constant 0.000000e+00 : f32
    %69 = vector.shape_cast %62 : vector<16x1xi1> to vector<16x1xi1>
    %70 = vector.broadcast %69 : vector<16x1xi1> to vector<16x32xi1>
    %71 = vector.broadcast %cst_21 : f32 to vector<16x32xf32>
    %72 = arith.select %70, %65, %71 : vector<16x32xi1>, vector<16x32xf32>
    %73 = vector.extract_strided_slice %72 {offsets = [0, 0], sizes = [8, 32], strides = [1, 1]} : vector<16x32xf32> to vector<8x32xf32>
    %74 = arith.index_cast %c0_i32 : i32 to index
    %c0_22 = arith.constant 0 : index
    %c0_23 = arith.constant 0 : index
    %75 = vector.load %arg5[%74, %c0_22, %c0_23] : memref<8x8x32xf32, #tpu.memory_space<vmem>>, vector<1x8x32xf32>
    %76 = vector.shape_cast %75 : vector<1x8x32xf32> to vector<8x32xf32>
    %77 = vector.shape_cast %73 : vector<8x32xf32> to vector<1x8x32xf32>
    tpu.vector_store %arg5[%74, %c0_22, %c0_23], %77 {strides = array<i32>} : memref<8x8x32xf32, #tpu.memory_space<vmem>>, vector<1x8x32xf32>,
    %78 = vector.extract_strided_slice %72 {offsets = [8, 0], sizes = [8, 32], strides = [1, 1]} : vector<16x32xf32> to vector<8x32xf32>
    %79 = arith.index_cast %25 : i32 to index
    %c0_24 = arith.constant 0 : index
    %c0_25 = arith.constant 0 : index
    %80 = vector.load %arg6[%79, %c0_24, %c0_25] : memref<8x8x32xf32, #tpu.memory_space<vmem>>, vector<1x8x32xf32>
    %81 = vector.shape_cast %80 : vector<1x8x32xf32> to vector<8x32xf32>
    %82 = vector.shape_cast %78 : vector<8x32xf32> to vector<1x8x32xf32>
    tpu.vector_store %arg6[%79, %c0_24, %c0_25], %82 {strides = array<i32>} : memref<8x8x32xf32, #tpu.memory_space<vmem>>, vector<1x8x32xf32>,
    %c1_i32 = arith.constant 1 : i32
    %c7_i32_26 = arith.constant 7 : i32
    %83 = arith.subi %c7_i32_26, %c1_i32 : i32
    %c8_i32_27 = arith.constant 8 : i32
    %84 = arith.muli %c1_i32, %c8_i32_27 : i32
    %85 = tpu.assume_multiple %84, 8 : i32
    %c8_i32_28 = arith.constant 8 : i32
    %86 = arith.muli %83, %c8_i32_28 : i32
    %87 = tpu.assume_multiple %86, 8 : i32
    %88 = arith.index_cast %85 : i32 to index
    %c0_29 = arith.constant 0 : index
    %89 = vector.load %arg7[%88, %c0_29] : memref<64x256xf32, #tpu.memory_space<vmem>>, vector<8x128xf32>
    %90 = arith.index_cast %87 : i32 to index
    %c128_30 = arith.constant 128 : index
    %91 = vector.load %arg7[%90, %c128_30] : memref<64x256xf32, #tpu.memory_space<vmem>>, vector<8x128xf32>
    %92 = tpu.concatenate %89, %91 in 0 : vector<8x128xf32>, vector<8x128xf32> -> vector<16x128xf32>
    %c0_31 = arith.constant 0 : index
    %c0_32 = arith.constant 0 : index
    %93 = vector.load %arg4[%c0_31, %c0_32] : memref<32x256xf32, #tpu.memory_space<vmem>>, vector<32x256xf32>
    %cst_33 = arith.constant dense<0.000000e+00> : vector<16x256xf32>
    %94 = tpu.matmul %65, %93, %cst_33 {dimension_numbers = #tpu.dot_dimension_numbers<[1], [0], [0], [1], [0, 0, 1, 1], [], []>} : vector<16x32xf32>, vector<32x256xf32>, vector<16x256xf32> -> vector<16x256xf32>
    %95 = vector.extract_strided_slice %94 {offsets = [0, 0], sizes = [16, 128], strides = [1, 1]} : vector<16x256xf32> to vector<16x128xf32>
    %96 = vector.extract_strided_slice %94 {offsets = [0, 128], sizes = [16, 128], strides = [1, 1]} : vector<16x256xf32> to vector<16x128xf32>
    %97 = vector.shape_cast %10 : vector<16x1xi1> to vector<16x1xi1>
    %98 = vector.broadcast %97 : vector<16x1xi1> to vector<16x128xi1>
    %99 = arith.select %98, %95, %96 : vector<16x128xi1>, vector<16x128xf32>
    %100 = arith.addf %92, %99 : vector<16x128xf32>
    %101 = vector.broadcast %19 : vector<1x128xf32> to vector<16x128xf32>
    %102 = arith.mulf %100, %101 : vector<16x128xf32>
    %103 = math.tanh %102 : vector<16x128xf32>
    %104 = vector.broadcast %19 : vector<1x128xf32> to vector<16x128xf32>
    %105 = arith.mulf %103, %104 : vector<16x128xf32>
    %106 = vector.broadcast %22 : vector<1x128xf32> to vector<16x128xf32>
    %107 = arith.addf %105, %106 : vector<16x128xf32>
    %108 = vector.extract_strided_slice %107 {offsets = [0, 0], sizes = [16, 32], strides = [1, 1]} : vector<16x128xf32> to vector<16x32xf32>
    %109 = vector.extract_strided_slice %107 {offsets = [0, 32], sizes = [16, 32], strides = [1, 1]} : vector<16x128xf32> to vector<16x32xf32>
    %110 = vector.extract_strided_slice %107 {offsets = [0, 64], sizes = [16, 32], strides = [1, 1]} : vector<16x128xf32> to vector<16x32xf32>
    %111 = vector.extract_strided_slice %107 {offsets = [0, 96], sizes = [16, 32], strides = [1, 1]} : vector<16x128xf32> to vector<16x32xf32>
    %112 = arith.mulf %109, %68 : vector<16x32xf32>
    %113 = arith.mulf %108, %110 : vector<16x32xf32>
    %114 = arith.addf %112, %113 : vector<16x32xf32>
    %115 = math.tanh %114 : vector<16x32xf32>
    %116 = arith.mulf %111, %115 : vector<16x32xf32>
    %117 = vector.broadcast %c1_i32 : i32 to vector<16x1xi32>
    %118 = vector.broadcast %83 : i32 to vector<16x1xi32>
    %119 = arith.select %10, %117, %118 : vector<16x1xi1>, vector<16x1xi32>
    %120 = arith.cmpi slt, %119, %7 : vector<16x1xi32>
    %121 = vector.shape_cast %120 : vector<16x1xi1> to vector<16x1xi1>
    %122 = vector.broadcast %121 : vector<16x1xi1> to vector<16x32xi1>
    %123 = arith.select %122, %116, %65 : vector<16x32xi1>, vector<16x32xf32>
    %124 = vector.shape_cast %120 : vector<16x1xi1> to vector<16x1xi1>
    %125 = vector.broadcast %124 : vector<16x1xi1> to vector<16x32xi1>
    %126 = arith.select %125, %114, %68 : vector<16x32xi1>, vector<16x32xf32>
    %cst_34 = arith.constant 0.000000e+00 : f32
    %127 = vector.shape_cast %120 : vector<16x1xi1> to vector<16x1xi1>
    %128 = vector.broadcast %127 : vector<16x1xi1> to vector<16x32xi1>
    %129 = vector.broadcast %cst_34 : f32 to vector<16x32xf32>
    %130 = arith.select %128, %123, %129 : vector<16x32xi1>, vector<16x32xf32>
    %131 = vector.extract_strided_slice %130 {offsets = [0, 0], sizes = [8, 32], strides = [1, 1]} : vector<16x32xf32> to vector<8x32xf32>
    %132 = arith.index_cast %c1_i32 : i32 to index
    %c0_35 = arith.constant 0 : index
    %c0_36 = arith.constant 0 : index
    %133 = vector.load %arg5[%132, %c0_35, %c0_36] : memref<8x8x32xf32, #tpu.memory_space<vmem>>, vector<1x8x32xf32>
    %134 = vector.shape_cast %133 : vector<1x8x32xf32> to vector<8x32xf32>
    %135 = vector.shape_cast %131 : vector<8x32xf32> to vector<1x8x32xf32>
    tpu.vector_store %arg5[%132, %c0_35, %c0_36], %135 {strides = array<i32>} : memref<8x8x32xf32, #tpu.memory_space<vmem>>, vector<1x8x32xf32>,
    %136 = vector.extract_strided_slice %130 {offsets = [8, 0], sizes = [8, 32], strides = [1, 1]} : vector<16x32xf32> to vector<8x32xf32>
    %137 = arith.index_cast %83 : i32 to index
    %c0_37 = arith.constant 0 : index
    %c0_38 = arith.constant 0 : index
    %138 = vector.load %arg6[%137, %c0_37, %c0_38] : memref<8x8x32xf32, #tpu.memory_space<vmem>>, vector<1x8x32xf32>
    %139 = vector.shape_cast %138 : vector<1x8x32xf32> to vector<8x32xf32>
    %140 = vector.shape_cast %136 : vector<8x32xf32> to vector<1x8x32xf32>
    tpu.vector_store %arg6[%137, %c0_37, %c0_38], %140 {strides = array<i32>} : memref<8x8x32xf32, #tpu.memory_space<vmem>>, vector<1x8x32xf32>,
    %c2_i32 = arith.constant 2 : i32
    %c7_i32_39 = arith.constant 7 : i32
    %141 = arith.subi %c7_i32_39, %c2_i32 : i32
    %c8_i32_40 = arith.constant 8 : i32
    %142 = arith.muli %c2_i32, %c8_i32_40 : i32
    %143 = tpu.assume_multiple %142, 8 : i32
    %c8_i32_41 = arith.constant 8 : i32
    %144 = arith.muli %141, %c8_i32_41 : i32
    %145 = tpu.assume_multiple %144, 8 : i32
    %146 = arith.index_cast %143 : i32 to index
    %c0_42 = arith.constant 0 : index
    %147 = vector.load %arg7[%146, %c0_42] : memref<64x256xf32, #tpu.memory_space<vmem>>, vector<8x128xf32>
    %148 = arith.index_cast %145 : i32 to index
    %c128_43 = arith.constant 128 : index
    %149 = vector.load %arg7[%148, %c128_43] : memref<64x256xf32, #tpu.memory_space<vmem>>, vector<8x128xf32>
    %150 = tpu.concatenate %147, %149 in 0 : vector<8x128xf32>, vector<8x128xf32> -> vector<16x128xf32>
    %c0_44 = arith.constant 0 : index
    %c0_45 = arith.constant 0 : index
    %151 = vector.load %arg4[%c0_44, %c0_45] : memref<32x256xf32, #tpu.memory_space<vmem>>, vector<32x256xf32>
    %cst_46 = arith.constant dense<0.000000e+00> : vector<16x256xf32>
    %152 = tpu.matmul %123, %151, %cst_46 {dimension_numbers = #tpu.dot_dimension_numbers<[1], [0], [0], [1], [0, 0, 1, 1], [], []>} : vector<16x32xf32>, vector<32x256xf32>, vector<16x256xf32> -> vector<16x256xf32>
    %153 = vector.extract_strided_slice %152 {offsets = [0, 0], sizes = [16, 128], strides = [1, 1]} : vector<16x256xf32> to vector<16x128xf32>
    %154 = vector.extract_strided_slice %152 {offsets = [0, 128], sizes = [16, 128], strides = [1, 1]} : vector<16x256xf32> to vector<16x128xf32>
    %155 = vector.shape_cast %10 : vector<16x1xi1> to vector<16x1xi1>
    %156 = vector.broadcast %155 : vector<16x1xi1> to vector<16x128xi1>
    %157 = arith.select %156, %153, %154 : vector<16x128xi1>, vector<16x128xf32>
    %158 = arith.addf %150, %157 : vector<16x128xf32>
    %159 = vector.broadcast %19 : vector<1x128xf32> to vector<16x128xf32>
    %160 = arith.mulf %158, %159 : vector<16x128xf32>
    %161 = math.tanh %160 : vector<16x128xf32>
    %162 = vector.broadcast %19 : vector<1x128xf32> to vector<16x128xf32>
    %163 = arith.mulf %161, %162 : vector<16x128xf32>
    %164 = vector.broadcast %22 : vector<1x128xf32> to vector<16x128xf32>
    %165 = arith.addf %163, %164 : vector<16x128xf32>
    %166 = vector.extract_strided_slice %165 {offsets = [0, 0], sizes = [16, 32], strides = [1, 1]} : vector<16x128xf32> to vector<16x32xf32>
    %167 = vector.extract_strided_slice %165 {offsets = [0, 32], sizes = [16, 32], strides = [1, 1]} : vector<16x128xf32> to vector<16x32xf32>
    %168 = vector.extract_strided_slice %165 {offsets = [0, 64], sizes = [16, 32], strides = [1, 1]} : vector<16x128xf32> to vector<16x32xf32>
    %169 = vector.extract_strided_slice %165 {offsets = [0, 96], sizes = [16, 32], strides = [1, 1]} : vector<16x128xf32> to vector<16x32xf32>
    %170 = arith.mulf %167, %126 : vector<16x32xf32>
    %171 = arith.mulf %166, %168 : vector<16x32xf32>
    %172 = arith.addf %170, %171 : vector<16x32xf32>
    %173 = math.tanh %172 : vector<16x32xf32>
    %174 = arith.mulf %169, %173 : vector<16x32xf32>
    %175 = vector.broadcast %c2_i32 : i32 to vector<16x1xi32>
    %176 = vector.broadcast %141 : i32 to vector<16x1xi32>
    %177 = arith.select %10, %175, %176 : vector<16x1xi1>, vector<16x1xi32>
    %178 = arith.cmpi slt, %177, %7 : vector<16x1xi32>
    %179 = vector.shape_cast %178 : vector<16x1xi1> to vector<16x1xi1>
    %180 = vector.broadcast %179 : vector<16x1xi1> to vector<16x32xi1>
    %181 = arith.select %180, %174, %123 : vector<16x32xi1>, vector<16x32xf32>
    %182 = vector.shape_cast %178 : vector<16x1xi1> to vector<16x1xi1>
    %183 = vector.broadcast %182 : vector<16x1xi1> to vector<16x32xi1>
    %184 = arith.select %183, %172, %126 : vector<16x32xi1>, vector<16x32xf32>
    %cst_47 = arith.constant 0.000000e+00 : f32
    %185 = vector.shape_cast %178 : vector<16x1xi1> to vector<16x1xi1>
    %186 = vector.broadcast %185 : vector<16x1xi1> to vector<16x32xi1>
    %187 = vector.broadcast %cst_47 : f32 to vector<16x32xf32>
    %188 = arith.select %186, %181, %187 : vector<16x32xi1>, vector<16x32xf32>
    %189 = vector.extract_strided_slice %188 {offsets = [0, 0], sizes = [8, 32], strides = [1, 1]} : vector<16x32xf32> to vector<8x32xf32>
    %190 = arith.index_cast %c2_i32 : i32 to index
    %c0_48 = arith.constant 0 : index
    %c0_49 = arith.constant 0 : index
    %191 = vector.load %arg5[%190, %c0_48, %c0_49] : memref<8x8x32xf32, #tpu.memory_space<vmem>>, vector<1x8x32xf32>
    %192 = vector.shape_cast %191 : vector<1x8x32xf32> to vector<8x32xf32>
    %193 = vector.shape_cast %189 : vector<8x32xf32> to vector<1x8x32xf32>
    tpu.vector_store %arg5[%190, %c0_48, %c0_49], %193 {strides = array<i32>} : memref<8x8x32xf32, #tpu.memory_space<vmem>>, vector<1x8x32xf32>,
    %194 = vector.extract_strided_slice %188 {offsets = [8, 0], sizes = [8, 32], strides = [1, 1]} : vector<16x32xf32> to vector<8x32xf32>
    %195 = arith.index_cast %141 : i32 to index
    %c0_50 = arith.constant 0 : index
    %c0_51 = arith.constant 0 : index
    %196 = vector.load %arg6[%195, %c0_50, %c0_51] : memref<8x8x32xf32, #tpu.memory_space<vmem>>, vector<1x8x32xf32>
    %197 = vector.shape_cast %196 : vector<1x8x32xf32> to vector<8x32xf32>
    %198 = vector.shape_cast %194 : vector<8x32xf32> to vector<1x8x32xf32>
    tpu.vector_store %arg6[%195, %c0_50, %c0_51], %198 {strides = array<i32>} : memref<8x8x32xf32, #tpu.memory_space<vmem>>, vector<1x8x32xf32>,
    %c3_i32 = arith.constant 3 : i32
    %c7_i32_52 = arith.constant 7 : i32
    %199 = arith.subi %c7_i32_52, %c3_i32 : i32
    %c8_i32_53 = arith.constant 8 : i32
    %200 = arith.muli %c3_i32, %c8_i32_53 : i32
    %201 = tpu.assume_multiple %200, 8 : i32
    %c8_i32_54 = arith.constant 8 : i32
    %202 = arith.muli %199, %c8_i32_54 : i32
    %203 = tpu.assume_multiple %202, 8 : i32
    %204 = arith.index_cast %201 : i32 to index
    %c0_55 = arith.constant 0 : index
    %205 = vector.load %arg7[%204, %c0_55] : memref<64x256xf32, #tpu.memory_space<vmem>>, vector<8x128xf32>
    %206 = arith.index_cast %203 : i32 to index
    %c128_56 = arith.constant 128 : index
    %207 = vector.load %arg7[%206, %c128_56] : memref<64x256xf32, #tpu.memory_space<vmem>>, vector<8x128xf32>
    %208 = tpu.concatenate %205, %207 in 0 : vector<8x128xf32>, vector<8x128xf32> -> vector<16x128xf32>
    %c0_57 = arith.constant 0 : index
    %c0_58 = arith.constant 0 : index
    %209 = vector.load %arg4[%c0_57, %c0_58] : memref<32x256xf32, #tpu.memory_space<vmem>>, vector<32x256xf32>
    %cst_59 = arith.constant dense<0.000000e+00> : vector<16x256xf32>
    %210 = tpu.matmul %181, %209, %cst_59 {dimension_numbers = #tpu.dot_dimension_numbers<[1], [0], [0], [1], [0, 0, 1, 1], [], []>} : vector<16x32xf32>, vector<32x256xf32>, vector<16x256xf32> -> vector<16x256xf32>
    %211 = vector.extract_strided_slice %210 {offsets = [0, 0], sizes = [16, 128], strides = [1, 1]} : vector<16x256xf32> to vector<16x128xf32>
    %212 = vector.extract_strided_slice %210 {offsets = [0, 128], sizes = [16, 128], strides = [1, 1]} : vector<16x256xf32> to vector<16x128xf32>
    %213 = vector.shape_cast %10 : vector<16x1xi1> to vector<16x1xi1>
    %214 = vector.broadcast %213 : vector<16x1xi1> to vector<16x128xi1>
    %215 = arith.select %214, %211, %212 : vector<16x128xi1>, vector<16x128xf32>
    %216 = arith.addf %208, %215 : vector<16x128xf32>
    %217 = vector.broadcast %19 : vector<1x128xf32> to vector<16x128xf32>
    %218 = arith.mulf %216, %217 : vector<16x128xf32>
    %219 = math.tanh %218 : vector<16x128xf32>
    %220 = vector.broadcast %19 : vector<1x128xf32> to vector<16x128xf32>
    %221 = arith.mulf %219, %220 : vector<16x128xf32>
    %222 = vector.broadcast %22 : vector<1x128xf32> to vector<16x128xf32>
    %223 = arith.addf %221, %222 : vector<16x128xf32>
    %224 = vector.extract_strided_slice %223 {offsets = [0, 0], sizes = [16, 32], strides = [1, 1]} : vector<16x128xf32> to vector<16x32xf32>
    %225 = vector.extract_strided_slice %223 {offsets = [0, 32], sizes = [16, 32], strides = [1, 1]} : vector<16x128xf32> to vector<16x32xf32>
    %226 = vector.extract_strided_slice %223 {offsets = [0, 64], sizes = [16, 32], strides = [1, 1]} : vector<16x128xf32> to vector<16x32xf32>
    %227 = vector.extract_strided_slice %223 {offsets = [0, 96], sizes = [16, 32], strides = [1, 1]} : vector<16x128xf32> to vector<16x32xf32>
    %228 = arith.mulf %225, %184 : vector<16x32xf32>
    %229 = arith.mulf %224, %226 : vector<16x32xf32>
    %230 = arith.addf %228, %229 : vector<16x32xf32>
    %231 = math.tanh %230 : vector<16x32xf32>
    %232 = arith.mulf %227, %231 : vector<16x32xf32>
    %233 = vector.broadcast %c3_i32 : i32 to vector<16x1xi32>
    %234 = vector.broadcast %199 : i32 to vector<16x1xi32>
    %235 = arith.select %10, %233, %234 : vector<16x1xi1>, vector<16x1xi32>
    %236 = arith.cmpi slt, %235, %7 : vector<16x1xi32>
    %237 = vector.shape_cast %236 : vector<16x1xi1> to vector<16x1xi1>
    %238 = vector.broadcast %237 : vector<16x1xi1> to vector<16x32xi1>
    %239 = arith.select %238, %232, %181 : vector<16x32xi1>, vector<16x32xf32>
    %240 = vector.shape_cast %236 : vector<16x1xi1> to vector<16x1xi1>
    %241 = vector.broadcast %240 : vector<16x1xi1> to vector<16x32xi1>
    %242 = arith.select %241, %230, %184 : vector<16x32xi1>, vector<16x32xf32>
    %cst_60 = arith.constant 0.000000e+00 : f32
    %243 = vector.shape_cast %236 : vector<16x1xi1> to vector<16x1xi1>
    %244 = vector.broadcast %243 : vector<16x1xi1> to vector<16x32xi1>
    %245 = vector.broadcast %cst_60 : f32 to vector<16x32xf32>
    %246 = arith.select %244, %239, %245 : vector<16x32xi1>, vector<16x32xf32>
    %247 = vector.extract_strided_slice %246 {offsets = [0, 0], sizes = [8, 32], strides = [1, 1]} : vector<16x32xf32> to vector<8x32xf32>
    %248 = arith.index_cast %c3_i32 : i32 to index
    %c0_61 = arith.constant 0 : index
    %c0_62 = arith.constant 0 : index
    %249 = vector.load %arg5[%248, %c0_61, %c0_62] : memref<8x8x32xf32, #tpu.memory_space<vmem>>, vector<1x8x32xf32>
    %250 = vector.shape_cast %249 : vector<1x8x32xf32> to vector<8x32xf32>
    %251 = vector.shape_cast %247 : vector<8x32xf32> to vector<1x8x32xf32>
    tpu.vector_store %arg5[%248, %c0_61, %c0_62], %251 {strides = array<i32>} : memref<8x8x32xf32, #tpu.memory_space<vmem>>, vector<1x8x32xf32>,
    %252 = vector.extract_strided_slice %246 {offsets = [8, 0], sizes = [8, 32], strides = [1, 1]} : vector<16x32xf32> to vector<8x32xf32>
    %253 = arith.index_cast %199 : i32 to index
    %c0_63 = arith.constant 0 : index
    %c0_64 = arith.constant 0 : index
    %254 = vector.load %arg6[%253, %c0_63, %c0_64] : memref<8x8x32xf32, #tpu.memory_space<vmem>>, vector<1x8x32xf32>
    %255 = vector.shape_cast %254 : vector<1x8x32xf32> to vector<8x32xf32>
    %256 = vector.shape_cast %252 : vector<8x32xf32> to vector<1x8x32xf32>
    tpu.vector_store %arg6[%253, %c0_63, %c0_64], %256 {strides = array<i32>} : memref<8x8x32xf32, #tpu.memory_space<vmem>>, vector<1x8x32xf32>,
    %c4_i32 = arith.constant 4 : i32
    %c7_i32_65 = arith.constant 7 : i32
    %257 = arith.subi %c7_i32_65, %c4_i32 : i32
    %c8_i32_66 = arith.constant 8 : i32
    %258 = arith.muli %c4_i32, %c8_i32_66 : i32
    %259 = tpu.assume_multiple %258, 8 : i32
    %c8_i32_67 = arith.constant 8 : i32
    %260 = arith.muli %257, %c8_i32_67 : i32
    %261 = tpu.assume_multiple %260, 8 : i32
    %262 = arith.index_cast %259 : i32 to index
    %c0_68 = arith.constant 0 : index
    %263 = vector.load %arg7[%262, %c0_68] : memref<64x256xf32, #tpu.memory_space<vmem>>, vector<8x128xf32>
    %264 = arith.index_cast %261 : i32 to index
    %c128_69 = arith.constant 128 : index
    %265 = vector.load %arg7[%264, %c128_69] : memref<64x256xf32, #tpu.memory_space<vmem>>, vector<8x128xf32>
    %266 = tpu.concatenate %263, %265 in 0 : vector<8x128xf32>, vector<8x128xf32> -> vector<16x128xf32>
    %c0_70 = arith.constant 0 : index
    %c0_71 = arith.constant 0 : index
    %267 = vector.load %arg4[%c0_70, %c0_71] : memref<32x256xf32, #tpu.memory_space<vmem>>, vector<32x256xf32>
    %cst_72 = arith.constant dense<0.000000e+00> : vector<16x256xf32>
    %268 = tpu.matmul %239, %267, %cst_72 {dimension_numbers = #tpu.dot_dimension_numbers<[1], [0], [0], [1], [0, 0, 1, 1], [], []>} : vector<16x32xf32>, vector<32x256xf32>, vector<16x256xf32> -> vector<16x256xf32>
    %269 = vector.extract_strided_slice %268 {offsets = [0, 0], sizes = [16, 128], strides = [1, 1]} : vector<16x256xf32> to vector<16x128xf32>
    %270 = vector.extract_strided_slice %268 {offsets = [0, 128], sizes = [16, 128], strides = [1, 1]} : vector<16x256xf32> to vector<16x128xf32>
    %271 = vector.shape_cast %10 : vector<16x1xi1> to vector<16x1xi1>
    %272 = vector.broadcast %271 : vector<16x1xi1> to vector<16x128xi1>
    %273 = arith.select %272, %269, %270 : vector<16x128xi1>, vector<16x128xf32>
    %274 = arith.addf %266, %273 : vector<16x128xf32>
    %275 = vector.broadcast %19 : vector<1x128xf32> to vector<16x128xf32>
    %276 = arith.mulf %274, %275 : vector<16x128xf32>
    %277 = math.tanh %276 : vector<16x128xf32>
    %278 = vector.broadcast %19 : vector<1x128xf32> to vector<16x128xf32>
    %279 = arith.mulf %277, %278 : vector<16x128xf32>
    %280 = vector.broadcast %22 : vector<1x128xf32> to vector<16x128xf32>
    %281 = arith.addf %279, %280 : vector<16x128xf32>
    %282 = vector.extract_strided_slice %281 {offsets = [0, 0], sizes = [16, 32], strides = [1, 1]} : vector<16x128xf32> to vector<16x32xf32>
    %283 = vector.extract_strided_slice %281 {offsets = [0, 32], sizes = [16, 32], strides = [1, 1]} : vector<16x128xf32> to vector<16x32xf32>
    %284 = vector.extract_strided_slice %281 {offsets = [0, 64], sizes = [16, 32], strides = [1, 1]} : vector<16x128xf32> to vector<16x32xf32>
    %285 = vector.extract_strided_slice %281 {offsets = [0, 96], sizes = [16, 32], strides = [1, 1]} : vector<16x128xf32> to vector<16x32xf32>
    %286 = arith.mulf %283, %242 : vector<16x32xf32>
    %287 = arith.mulf %282, %284 : vector<16x32xf32>
    %288 = arith.addf %286, %287 : vector<16x32xf32>
    %289 = math.tanh %288 : vector<16x32xf32>
    %290 = arith.mulf %285, %289 : vector<16x32xf32>
    %291 = vector.broadcast %c4_i32 : i32 to vector<16x1xi32>
    %292 = vector.broadcast %257 : i32 to vector<16x1xi32>
    %293 = arith.select %10, %291, %292 : vector<16x1xi1>, vector<16x1xi32>
    %294 = arith.cmpi slt, %293, %7 : vector<16x1xi32>
    %295 = vector.shape_cast %294 : vector<16x1xi1> to vector<16x1xi1>
    %296 = vector.broadcast %295 : vector<16x1xi1> to vector<16x32xi1>
    %297 = arith.select %296, %290, %239 : vector<16x32xi1>, vector<16x32xf32>
    %298 = vector.shape_cast %294 : vector<16x1xi1> to vector<16x1xi1>
    %299 = vector.broadcast %298 : vector<16x1xi1> to vector<16x32xi1>
    %300 = arith.select %299, %288, %242 : vector<16x32xi1>, vector<16x32xf32>
    %cst_73 = arith.constant 0.000000e+00 : f32
    %301 = vector.shape_cast %294 : vector<16x1xi1> to vector<16x1xi1>
    %302 = vector.broadcast %301 : vector<16x1xi1> to vector<16x32xi1>
    %303 = vector.broadcast %cst_73 : f32 to vector<16x32xf32>
    %304 = arith.select %302, %297, %303 : vector<16x32xi1>, vector<16x32xf32>
    %305 = vector.extract_strided_slice %304 {offsets = [0, 0], sizes = [8, 32], strides = [1, 1]} : vector<16x32xf32> to vector<8x32xf32>
    %306 = arith.index_cast %c4_i32 : i32 to index
    %c0_74 = arith.constant 0 : index
    %c0_75 = arith.constant 0 : index
    %307 = vector.load %arg5[%306, %c0_74, %c0_75] : memref<8x8x32xf32, #tpu.memory_space<vmem>>, vector<1x8x32xf32>
    %308 = vector.shape_cast %307 : vector<1x8x32xf32> to vector<8x32xf32>
    %309 = vector.shape_cast %305 : vector<8x32xf32> to vector<1x8x32xf32>
    tpu.vector_store %arg5[%306, %c0_74, %c0_75], %309 {strides = array<i32>} : memref<8x8x32xf32, #tpu.memory_space<vmem>>, vector<1x8x32xf32>,
    %310 = vector.extract_strided_slice %304 {offsets = [8, 0], sizes = [8, 32], strides = [1, 1]} : vector<16x32xf32> to vector<8x32xf32>
    %311 = arith.index_cast %257 : i32 to index
    %c0_76 = arith.constant 0 : index
    %c0_77 = arith.constant 0 : index
    %312 = vector.load %arg6[%311, %c0_76, %c0_77] : memref<8x8x32xf32, #tpu.memory_space<vmem>>, vector<1x8x32xf32>
    %313 = vector.shape_cast %312 : vector<1x8x32xf32> to vector<8x32xf32>
    %314 = vector.shape_cast %310 : vector<8x32xf32> to vector<1x8x32xf32>
    tpu.vector_store %arg6[%311, %c0_76, %c0_77], %314 {strides = array<i32>} : memref<8x8x32xf32, #tpu.memory_space<vmem>>, vector<1x8x32xf32>,
    %c5_i32 = arith.constant 5 : i32
    %c7_i32_78 = arith.constant 7 : i32
    %315 = arith.subi %c7_i32_78, %c5_i32 : i32
    %c8_i32_79 = arith.constant 8 : i32
    %316 = arith.muli %c5_i32, %c8_i32_79 : i32
    %317 = tpu.assume_multiple %316, 8 : i32
    %c8_i32_80 = arith.constant 8 : i32
    %318 = arith.muli %315, %c8_i32_80 : i32
    %319 = tpu.assume_multiple %318, 8 : i32
    %320 = arith.index_cast %317 : i32 to index
    %c0_81 = arith.constant 0 : index
    %321 = vector.load %arg7[%320, %c0_81] : memref<64x256xf32, #tpu.memory_space<vmem>>, vector<8x128xf32>
    %322 = arith.index_cast %319 : i32 to index
    %c128_82 = arith.constant 128 : index
    %323 = vector.load %arg7[%322, %c128_82] : memref<64x256xf32, #tpu.memory_space<vmem>>, vector<8x128xf32>
    %324 = tpu.concatenate %321, %323 in 0 : vector<8x128xf32>, vector<8x128xf32> -> vector<16x128xf32>
    %c0_83 = arith.constant 0 : index
    %c0_84 = arith.constant 0 : index
    %325 = vector.load %arg4[%c0_83, %c0_84] : memref<32x256xf32, #tpu.memory_space<vmem>>, vector<32x256xf32>
    %cst_85 = arith.constant dense<0.000000e+00> : vector<16x256xf32>
    %326 = tpu.matmul %297, %325, %cst_85 {dimension_numbers = #tpu.dot_dimension_numbers<[1], [0], [0], [1], [0, 0, 1, 1], [], []>} : vector<16x32xf32>, vector<32x256xf32>, vector<16x256xf32> -> vector<16x256xf32>
    %327 = vector.extract_strided_slice %326 {offsets = [0, 0], sizes = [16, 128], strides = [1, 1]} : vector<16x256xf32> to vector<16x128xf32>
    %328 = vector.extract_strided_slice %326 {offsets = [0, 128], sizes = [16, 128], strides = [1, 1]} : vector<16x256xf32> to vector<16x128xf32>
    %329 = vector.shape_cast %10 : vector<16x1xi1> to vector<16x1xi1>
    %330 = vector.broadcast %329 : vector<16x1xi1> to vector<16x128xi1>
    %331 = arith.select %330, %327, %328 : vector<16x128xi1>, vector<16x128xf32>
    %332 = arith.addf %324, %331 : vector<16x128xf32>
    %333 = vector.broadcast %19 : vector<1x128xf32> to vector<16x128xf32>
    %334 = arith.mulf %332, %333 : vector<16x128xf32>
    %335 = math.tanh %334 : vector<16x128xf32>
    %336 = vector.broadcast %19 : vector<1x128xf32> to vector<16x128xf32>
    %337 = arith.mulf %335, %336 : vector<16x128xf32>
    %338 = vector.broadcast %22 : vector<1x128xf32> to vector<16x128xf32>
    %339 = arith.addf %337, %338 : vector<16x128xf32>
    %340 = vector.extract_strided_slice %339 {offsets = [0, 0], sizes = [16, 32], strides = [1, 1]} : vector<16x128xf32> to vector<16x32xf32>
    %341 = vector.extract_strided_slice %339 {offsets = [0, 32], sizes = [16, 32], strides = [1, 1]} : vector<16x128xf32> to vector<16x32xf32>
    %342 = vector.extract_strided_slice %339 {offsets = [0, 64], sizes = [16, 32], strides = [1, 1]} : vector<16x128xf32> to vector<16x32xf32>
    %343 = vector.extract_strided_slice %339 {offsets = [0, 96], sizes = [16, 32], strides = [1, 1]} : vector<16x128xf32> to vector<16x32xf32>
    %344 = arith.mulf %341, %300 : vector<16x32xf32>
    %345 = arith.mulf %340, %342 : vector<16x32xf32>
    %346 = arith.addf %344, %345 : vector<16x32xf32>
    %347 = math.tanh %346 : vector<16x32xf32>
    %348 = arith.mulf %343, %347 : vector<16x32xf32>
    %349 = vector.broadcast %c5_i32 : i32 to vector<16x1xi32>
    %350 = vector.broadcast %315 : i32 to vector<16x1xi32>
    %351 = arith.select %10, %349, %350 : vector<16x1xi1>, vector<16x1xi32>
    %352 = arith.cmpi slt, %351, %7 : vector<16x1xi32>
    %353 = vector.shape_cast %352 : vector<16x1xi1> to vector<16x1xi1>
    %354 = vector.broadcast %353 : vector<16x1xi1> to vector<16x32xi1>
    %355 = arith.select %354, %348, %297 : vector<16x32xi1>, vector<16x32xf32>
    %356 = vector.shape_cast %352 : vector<16x1xi1> to vector<16x1xi1>
    %357 = vector.broadcast %356 : vector<16x1xi1> to vector<16x32xi1>
    %358 = arith.select %357, %346, %300 : vector<16x32xi1>, vector<16x32xf32>
    %cst_86 = arith.constant 0.000000e+00 : f32
    %359 = vector.shape_cast %352 : vector<16x1xi1> to vector<16x1xi1>
    %360 = vector.broadcast %359 : vector<16x1xi1> to vector<16x32xi1>
    %361 = vector.broadcast %cst_86 : f32 to vector<16x32xf32>
    %362 = arith.select %360, %355, %361 : vector<16x32xi1>, vector<16x32xf32>
    %363 = vector.extract_strided_slice %362 {offsets = [0, 0], sizes = [8, 32], strides = [1, 1]} : vector<16x32xf32> to vector<8x32xf32>
    %364 = arith.index_cast %c5_i32 : i32 to index
    %c0_87 = arith.constant 0 : index
    %c0_88 = arith.constant 0 : index
    %365 = vector.load %arg5[%364, %c0_87, %c0_88] : memref<8x8x32xf32, #tpu.memory_space<vmem>>, vector<1x8x32xf32>
    %366 = vector.shape_cast %365 : vector<1x8x32xf32> to vector<8x32xf32>
    %367 = vector.shape_cast %363 : vector<8x32xf32> to vector<1x8x32xf32>
    tpu.vector_store %arg5[%364, %c0_87, %c0_88], %367 {strides = array<i32>} : memref<8x8x32xf32, #tpu.memory_space<vmem>>, vector<1x8x32xf32>,
    %368 = vector.extract_strided_slice %362 {offsets = [8, 0], sizes = [8, 32], strides = [1, 1]} : vector<16x32xf32> to vector<8x32xf32>
    %369 = arith.index_cast %315 : i32 to index
    %c0_89 = arith.constant 0 : index
    %c0_90 = arith.constant 0 : index
    %370 = vector.load %arg6[%369, %c0_89, %c0_90] : memref<8x8x32xf32, #tpu.memory_space<vmem>>, vector<1x8x32xf32>
    %371 = vector.shape_cast %370 : vector<1x8x32xf32> to vector<8x32xf32>
    %372 = vector.shape_cast %368 : vector<8x32xf32> to vector<1x8x32xf32>
    tpu.vector_store %arg6[%369, %c0_89, %c0_90], %372 {strides = array<i32>} : memref<8x8x32xf32, #tpu.memory_space<vmem>>, vector<1x8x32xf32>,
    %c6_i32 = arith.constant 6 : i32
    %c7_i32_91 = arith.constant 7 : i32
    %373 = arith.subi %c7_i32_91, %c6_i32 : i32
    %c8_i32_92 = arith.constant 8 : i32
    %374 = arith.muli %c6_i32, %c8_i32_92 : i32
    %375 = tpu.assume_multiple %374, 8 : i32
    %c8_i32_93 = arith.constant 8 : i32
    %376 = arith.muli %373, %c8_i32_93 : i32
    %377 = tpu.assume_multiple %376, 8 : i32
    %378 = arith.index_cast %375 : i32 to index
    %c0_94 = arith.constant 0 : index
    %379 = vector.load %arg7[%378, %c0_94] : memref<64x256xf32, #tpu.memory_space<vmem>>, vector<8x128xf32>
    %380 = arith.index_cast %377 : i32 to index
    %c128_95 = arith.constant 128 : index
    %381 = vector.load %arg7[%380, %c128_95] : memref<64x256xf32, #tpu.memory_space<vmem>>, vector<8x128xf32>
    %382 = tpu.concatenate %379, %381 in 0 : vector<8x128xf32>, vector<8x128xf32> -> vector<16x128xf32>
    %c0_96 = arith.constant 0 : index
    %c0_97 = arith.constant 0 : index
    %383 = vector.load %arg4[%c0_96, %c0_97] : memref<32x256xf32, #tpu.memory_space<vmem>>, vector<32x256xf32>
    %cst_98 = arith.constant dense<0.000000e+00> : vector<16x256xf32>
    %384 = tpu.matmul %355, %383, %cst_98 {dimension_numbers = #tpu.dot_dimension_numbers<[1], [0], [0], [1], [0, 0, 1, 1], [], []>} : vector<16x32xf32>, vector<32x256xf32>, vector<16x256xf32> -> vector<16x256xf32>
    %385 = vector.extract_strided_slice %384 {offsets = [0, 0], sizes = [16, 128], strides = [1, 1]} : vector<16x256xf32> to vector<16x128xf32>
    %386 = vector.extract_strided_slice %384 {offsets = [0, 128], sizes = [16, 128], strides = [1, 1]} : vector<16x256xf32> to vector<16x128xf32>
    %387 = vector.shape_cast %10 : vector<16x1xi1> to vector<16x1xi1>
    %388 = vector.broadcast %387 : vector<16x1xi1> to vector<16x128xi1>
    %389 = arith.select %388, %385, %386 : vector<16x128xi1>, vector<16x128xf32>
    %390 = arith.addf %382, %389 : vector<16x128xf32>
    %391 = vector.broadcast %19 : vector<1x128xf32> to vector<16x128xf32>
    %392 = arith.mulf %390, %391 : vector<16x128xf32>
    %393 = math.tanh %392 : vector<16x128xf32>
    %394 = vector.broadcast %19 : vector<1x128xf32> to vector<16x128xf32>
    %395 = arith.mulf %393, %394 : vector<16x128xf32>
    %396 = vector.broadcast %22 : vector<1x128xf32> to vector<16x128xf32>
    %397 = arith.addf %395, %396 : vector<16x128xf32>
    %398 = vector.extract_strided_slice %397 {offsets = [0, 0], sizes = [16, 32], strides = [1, 1]} : vector<16x128xf32> to vector<16x32xf32>
    %399 = vector.extract_strided_slice %397 {offsets = [0, 32], sizes = [16, 32], strides = [1, 1]} : vector<16x128xf32> to vector<16x32xf32>
    %400 = vector.extract_strided_slice %397 {offsets = [0, 64], sizes = [16, 32], strides = [1, 1]} : vector<16x128xf32> to vector<16x32xf32>
    %401 = vector.extract_strided_slice %397 {offsets = [0, 96], sizes = [16, 32], strides = [1, 1]} : vector<16x128xf32> to vector<16x32xf32>
    %402 = arith.mulf %399, %358 : vector<16x32xf32>
    %403 = arith.mulf %398, %400 : vector<16x32xf32>
    %404 = arith.addf %402, %403 : vector<16x32xf32>
    %405 = math.tanh %404 : vector<16x32xf32>
    %406 = arith.mulf %401, %405 : vector<16x32xf32>
    %407 = vector.broadcast %c6_i32 : i32 to vector<16x1xi32>
    %408 = vector.broadcast %373 : i32 to vector<16x1xi32>
    %409 = arith.select %10, %407, %408 : vector<16x1xi1>, vector<16x1xi32>
    %410 = arith.cmpi slt, %409, %7 : vector<16x1xi32>
    %411 = vector.shape_cast %410 : vector<16x1xi1> to vector<16x1xi1>
    %412 = vector.broadcast %411 : vector<16x1xi1> to vector<16x32xi1>
    %413 = arith.select %412, %406, %355 : vector<16x32xi1>, vector<16x32xf32>
    %414 = vector.shape_cast %410 : vector<16x1xi1> to vector<16x1xi1>
    %415 = vector.broadcast %414 : vector<16x1xi1> to vector<16x32xi1>
    %416 = arith.select %415, %404, %358 : vector<16x32xi1>, vector<16x32xf32>
    %cst_99 = arith.constant 0.000000e+00 : f32
    %417 = vector.shape_cast %410 : vector<16x1xi1> to vector<16x1xi1>
    %418 = vector.broadcast %417 : vector<16x1xi1> to vector<16x32xi1>
    %419 = vector.broadcast %cst_99 : f32 to vector<16x32xf32>
    %420 = arith.select %418, %413, %419 : vector<16x32xi1>, vector<16x32xf32>
    %421 = vector.extract_strided_slice %420 {offsets = [0, 0], sizes = [8, 32], strides = [1, 1]} : vector<16x32xf32> to vector<8x32xf32>
    %422 = arith.index_cast %c6_i32 : i32 to index
    %c0_100 = arith.constant 0 : index
    %c0_101 = arith.constant 0 : index
    %423 = vector.load %arg5[%422, %c0_100, %c0_101] : memref<8x8x32xf32, #tpu.memory_space<vmem>>, vector<1x8x32xf32>
    %424 = vector.shape_cast %423 : vector<1x8x32xf32> to vector<8x32xf32>
    %425 = vector.shape_cast %421 : vector<8x32xf32> to vector<1x8x32xf32>
    tpu.vector_store %arg5[%422, %c0_100, %c0_101], %425 {strides = array<i32>} : memref<8x8x32xf32, #tpu.memory_space<vmem>>, vector<1x8x32xf32>,
    %426 = vector.extract_strided_slice %420 {offsets = [8, 0], sizes = [8, 32], strides = [1, 1]} : vector<16x32xf32> to vector<8x32xf32>
    %427 = arith.index_cast %373 : i32 to index
    %c0_102 = arith.constant 0 : index
    %c0_103 = arith.constant 0 : index
    %428 = vector.load %arg6[%427, %c0_102, %c0_103] : memref<8x8x32xf32, #tpu.memory_space<vmem>>, vector<1x8x32xf32>
    %429 = vector.shape_cast %428 : vector<1x8x32xf32> to vector<8x32xf32>
    %430 = vector.shape_cast %426 : vector<8x32xf32> to vector<1x8x32xf32>
    tpu.vector_store %arg6[%427, %c0_102, %c0_103], %430 {strides = array<i32>} : memref<8x8x32xf32, #tpu.memory_space<vmem>>, vector<1x8x32xf32>,
    %c7_i32_104 = arith.constant 7 : i32
    %c7_i32_105 = arith.constant 7 : i32
    %431 = arith.subi %c7_i32_105, %c7_i32_104 : i32
    %c8_i32_106 = arith.constant 8 : i32
    %432 = arith.muli %c7_i32_104, %c8_i32_106 : i32
    %433 = tpu.assume_multiple %432, 8 : i32
    %c8_i32_107 = arith.constant 8 : i32
    %434 = arith.muli %431, %c8_i32_107 : i32
    %435 = tpu.assume_multiple %434, 8 : i32
    %436 = arith.index_cast %433 : i32 to index
    %c0_108 = arith.constant 0 : index
    %437 = vector.load %arg7[%436, %c0_108] : memref<64x256xf32, #tpu.memory_space<vmem>>, vector<8x128xf32>
    %438 = arith.index_cast %435 : i32 to index
    %c128_109 = arith.constant 128 : index
    %439 = vector.load %arg7[%438, %c128_109] : memref<64x256xf32, #tpu.memory_space<vmem>>, vector<8x128xf32>
    %440 = tpu.concatenate %437, %439 in 0 : vector<8x128xf32>, vector<8x128xf32> -> vector<16x128xf32>
    %c0_110 = arith.constant 0 : index
    %c0_111 = arith.constant 0 : index
    %441 = vector.load %arg4[%c0_110, %c0_111] : memref<32x256xf32, #tpu.memory_space<vmem>>, vector<32x256xf32>
    %cst_112 = arith.constant dense<0.000000e+00> : vector<16x256xf32>
    %442 = tpu.matmul %413, %441, %cst_112 {dimension_numbers = #tpu.dot_dimension_numbers<[1], [0], [0], [1], [0, 0, 1, 1], [], []>} : vector<16x32xf32>, vector<32x256xf32>, vector<16x256xf32> -> vector<16x256xf32>
    %443 = vector.extract_strided_slice %442 {offsets = [0, 0], sizes = [16, 128], strides = [1, 1]} : vector<16x256xf32> to vector<16x128xf32>
    %444 = vector.extract_strided_slice %442 {offsets = [0, 128], sizes = [16, 128], strides = [1, 1]} : vector<16x256xf32> to vector<16x128xf32>
    %445 = vector.shape_cast %10 : vector<16x1xi1> to vector<16x1xi1>
    %446 = vector.broadcast %445 : vector<16x1xi1> to vector<16x128xi1>
    %447 = arith.select %446, %443, %444 : vector<16x128xi1>, vector<16x128xf32>
    %448 = arith.addf %440, %447 : vector<16x128xf32>
    %449 = vector.broadcast %19 : vector<1x128xf32> to vector<16x128xf32>
    %450 = arith.mulf %448, %449 : vector<16x128xf32>
    %451 = math.tanh %450 : vector<16x128xf32>
    %452 = vector.broadcast %19 : vector<1x128xf32> to vector<16x128xf32>
    %453 = arith.mulf %451, %452 : vector<16x128xf32>
    %454 = vector.broadcast %22 : vector<1x128xf32> to vector<16x128xf32>
    %455 = arith.addf %453, %454 : vector<16x128xf32>
    %456 = vector.extract_strided_slice %455 {offsets = [0, 0], sizes = [16, 32], strides = [1, 1]} : vector<16x128xf32> to vector<16x32xf32>
    %457 = vector.extract_strided_slice %455 {offsets = [0, 32], sizes = [16, 32], strides = [1, 1]} : vector<16x128xf32> to vector<16x32xf32>
    %458 = vector.extract_strided_slice %455 {offsets = [0, 64], sizes = [16, 32], strides = [1, 1]} : vector<16x128xf32> to vector<16x32xf32>
    %459 = vector.extract_strided_slice %455 {offsets = [0, 96], sizes = [16, 32], strides = [1, 1]} : vector<16x128xf32> to vector<16x32xf32>
    %460 = arith.mulf %457, %416 : vector<16x32xf32>
    %461 = arith.mulf %456, %458 : vector<16x32xf32>
    %462 = arith.addf %460, %461 : vector<16x32xf32>
    %463 = math.tanh %462 : vector<16x32xf32>
    %464 = arith.mulf %459, %463 : vector<16x32xf32>
    %465 = vector.broadcast %c7_i32_104 : i32 to vector<16x1xi32>
    %466 = vector.broadcast %431 : i32 to vector<16x1xi32>
    %467 = arith.select %10, %465, %466 : vector<16x1xi1>, vector<16x1xi32>
    %468 = arith.cmpi slt, %467, %7 : vector<16x1xi32>
    %469 = vector.shape_cast %468 : vector<16x1xi1> to vector<16x1xi1>
    %470 = vector.broadcast %469 : vector<16x1xi1> to vector<16x32xi1>
    %471 = arith.select %470, %464, %413 : vector<16x32xi1>, vector<16x32xf32>
    %472 = vector.shape_cast %468 : vector<16x1xi1> to vector<16x1xi1>
    %473 = vector.broadcast %472 : vector<16x1xi1> to vector<16x32xi1>
    %474 = arith.select %473, %462, %416 : vector<16x32xi1>, vector<16x32xf32>
    %cst_113 = arith.constant 0.000000e+00 : f32
    %475 = vector.shape_cast %468 : vector<16x1xi1> to vector<16x1xi1>
    %476 = vector.broadcast %475 : vector<16x1xi1> to vector<16x32xi1>
    %477 = vector.broadcast %cst_113 : f32 to vector<16x32xf32>
    %478 = arith.select %476, %471, %477 : vector<16x32xi1>, vector<16x32xf32>
    %479 = vector.extract_strided_slice %478 {offsets = [0, 0], sizes = [8, 32], strides = [1, 1]} : vector<16x32xf32> to vector<8x32xf32>
    %480 = arith.index_cast %c7_i32_104 : i32 to index
    %c0_114 = arith.constant 0 : index
    %c0_115 = arith.constant 0 : index
    %481 = vector.load %arg5[%480, %c0_114, %c0_115] : memref<8x8x32xf32, #tpu.memory_space<vmem>>, vector<1x8x32xf32>
    %482 = vector.shape_cast %481 : vector<1x8x32xf32> to vector<8x32xf32>
    %483 = vector.shape_cast %479 : vector<8x32xf32> to vector<1x8x32xf32>
    tpu.vector_store %arg5[%480, %c0_114, %c0_115], %483 {strides = array<i32>} : memref<8x8x32xf32, #tpu.memory_space<vmem>>, vector<1x8x32xf32>,
    %484 = vector.extract_strided_slice %478 {offsets = [8, 0], sizes = [8, 32], strides = [1, 1]} : vector<16x32xf32> to vector<8x32xf32>
    %485 = arith.index_cast %431 : i32 to index
    %c0_116 = arith.constant 0 : index
    %c0_117 = arith.constant 0 : index
    %486 = vector.load %arg6[%485, %c0_116, %c0_117] : memref<8x8x32xf32, #tpu.memory_space<vmem>>, vector<1x8x32xf32>
    %487 = vector.shape_cast %486 : vector<1x8x32xf32> to vector<8x32xf32>
    %488 = vector.shape_cast %484 : vector<8x32xf32> to vector<1x8x32xf32>
    tpu.vector_store %arg6[%485, %c0_116, %c0_117], %488 {strides = array<i32>} : memref<8x8x32xf32, #tpu.memory_space<vmem>>, vector<1x8x32xf32>,
    %c8_i32_118 = arith.constant 8 : i32
    return
  }
}

</mosaic_0001>

<bundles_post_ra>
// kernel: lstm_model_forward.2
= control target key start
LH: loop header
LB: loop body
LE: loop exit
PB: predicated region body
PF: predicated region fallthrough
CT: control target
= control target key end

     0   :  { %v1828_v3 = vmov 0.0   ;;  %vm46_vm0 = vcmask 130048   ;;  %v1829_v27 = vmov 0   ;;  %v36_v28 = vlaneseq  ;;  %s1832_s15 = smov 32   ;;  %s2618_s2 = inlined_call_operand.vmem [shape: f32[16,256], index: 2, kind: input, shape index: {}]   ;;  %s2619_s4 = inlined_call_operand.vmem [shape: f32[32,256], index: 4, kind: input, shape index: {}]   ;;  %s2620_s1 = inlined_call_operand.vmem [shape: f32[64,16], index: 1, kind: input, shape index: {}]   ;;  %s2621_s3 = inlined_call_operand.vmem [shape: f32[1,256], index: 3, kind: input, shape index: {}]   ;;  %s2622_s0 = inlined_call_operand.vmem [shape: s32[16,1], index: 0, kind: input, shape index: {}]   ;;  %s2623_s5 = inlined_call_operand.vmem [shape: f32[8,8,32], index: 5, kind: output, shape index: {0}]   ;;  %s2624_s6 = inlined_call_operand.vmem [shape: f32[8,8,32], index: 6, kind: output, shape index: {1}]  }
   0x1   :  { %v31_v0 = vld [vmem:[%s2618_s2 + $0x8] sm:$0xff]  ;;  %v33_v1 = vld [vmem:[%s2618_s2 + $0x18] sm:$0xff]  ;;  %135 = vmatprep.mubr.f32.mxu0 %v1828_v3  ;;  %298 = vmatprep.mubr.f32.mxu1 %v1828_v3  ;;  %v30_v6 = vld [vmem:[%s2618_s2] sm:$0xff]  ;;  %v1830_v42 = vmov 0.5   ;;  %vm230_vm8 = vcmask 261120  }
   0x2   :  { %v223_v2 = vld [vmem:[%s2619_s4 + $0x8] sm:$0xff]  ;;  %v1689_v4 = vpack.c.bf16 %v33_v1, %v31_v0  ;;  %v225_v5 = vld [vmem:[%s2619_s4 + $0x18] sm:$0xff]  ;;  %v32_v7 = vld [vmem:[%s2618_s2 + $0x10] sm:$0xff]  ;;  %1762 = vset.pattern.permute.xlu0 %v1829_v27  ;;  %1763 = vset.pattern.permute.xlu1 %v1829_v27  ;;  %v37_v29 = vshrl.u32 %v36_v28, 7  ;;  %v208_v32 = vand.u32 127, %v36_v28 }
   0x3   :  { %v1888_v8 = vpack.c.bf16 %v225_v5, %v223_v2  ;;  %v1691_v9 = vpack.c.bf16 %v32_v7, %v30_v6  ;;  %v222_v10 = vld [vmem:[%s2619_s4] sm:$0xff]  ;;  %v224_v11 = vld [vmem:[%s2619_s4 + $0x10] sm:$0xff]  ;;  %v227_v13 = vld [vmem:[%s2619_s4 + $0x28] sm:$0xff] }
   0x4   :  { %1690 = vmatprep.subr.bf16.mxu0 %v1689_v4  ;;  %v1896_v12 = vpack.c.bf16 %v224_v11, %v222_v10  ;;  %v229_v14 = vld [vmem:[%s2619_s4 + $0x38] sm:$0xff]  ;;  %v226_v15 = vld [vmem:[%s2619_s4 + $0x20] sm:$0xff]  ;;  %v228_v18 = vld [vmem:[%s2619_s4 + $0x30] sm:$0xff]  ;;  %v42_v30 = vsub.s32 1, %v37_v29  ;;  %v38_v33 = vsub.s32 0, %v37_v29  ;;  %vm209_vm1 = vcmp.ge.s32.totalorder %v208_v32, 64 }
   0x5   :  { %1694 = vmatprep.subr.bf16.mxu1 %v1888_v8  ;;  %1692 = vmatpush1.bf16.msra.mxu0 %v1691_v9  ;;  %v22_v16 = vld [vmem:[%s2620_s1] sm:$0xff]  ;;  %v1911_v17 = vpack.c.bf16 %v229_v14, %v227_v13  ;;  %v1917_v19 = vpack.c.bf16 %v228_v18, %v226_v15  ;;  %v23_v20 = vld [vmem:[%s2620_s1 + $0x8] sm:$0xff]  ;;  %v24_v21 = vld [vmem:[%s2620_s1 + $0x10] sm:$0xff]  ;;  %vm210_vm2 = vcmp.lt.s32.totalorder %v208_v32, 96 }
   0x6   :  { %1696 = vmatpush1.bf16.msra.mxu1 %v1896_v12  ;;  %1726 = vmatprep.subr.bf16.mxu0 %v1888_v8  ;;  %v25_v22 = vld [vmem:[%s2620_s1 + $0x18] sm:$0xff]  ;;  %v26_v23 = vld [vmem:[%s2620_s1 + $0x20] sm:$0xff]  ;;  %v27_v24 = vld [vmem:[%s2620_s1 + $0x28] sm:$0xff] }
   0x7   :  { %1698 = vmatprep.subr.bf16.mxu1 %v1911_v17  ;;  %v28_v25 = vld [vmem:[%s2620_s1 + $0x30] sm:$0xff]  ;;  %v29_v26 = vld [vmem:[%s2620_s1 + $0x38] sm:$0xff]  ;;  %v34_v31 = vld [vmem:[%s2621_s3] sm:$0x3]  ;;  %s1831_s1 = smov 64  }
   0x8   :  { %1637 = vmatmul.mubr.msk.f32.vlgmr.msra.gmra.mrb[0].mxu0 %vm46_vm0, %v22_v16  ;;  %v43_v34 = vrot.slane %v34_v31, %v42_v30  ;;  %v39_v35 = vrot.slane %v34_v31, %v38_v33  ;;  %vm1976_vm3 = vmand %vm209_vm1, %vm210_vm2  ;;  %v2035_v32 = vld [vmem:[%s2622_s0 + $0x8] sm:$0xff] }
   0x9   :  { %141 = vmatprep.mubr.f32.mxu0 %v1828_v3  ;;  %1728 = vmatpush1.bf16.msra.mxu0 %v1896_v12  ;;  %v1984_v43 = vsel %vm1976_vm3, 1.0, %v1830_v42  ;;  %v2005_v2 = vsel %vm1976_vm3, 0.0, %v1830_v42  ;;  %vm1646_vm5 = vcmp.gt.s32.totalorder %v2035_v32, 7  ;;  %vm1651_vm10 = vcmp.gt.s32.totalorder %v2035_v32, 6 }
   0xa   :  { %1700 = vmatpush1.bf16.msra.mxu1 %v1917_v19  ;;  %1730 = vmatprep.subr.bf16.mxu0 %v1911_v17  ;;  %vm1657_vm14 = vcmp.gt.s32.totalorder %v2035_v32, 5  ;;  %vm1663_vm2 = vcmp.gt.s32.totalorder %v2035_v32, 4 }
   0xb   :  { %1702 = vmatprep.subr.bf16.mxu1 %v1888_v8 }
   0xc   :  { %1638 = vmatmul.mubr.msk.f32.gmra.mrb[2].mxu0 %vm46_vm0, %v23_v20 }
   0xd   :  { %299 = vmatmul.mubr.f32.vlgmr.msra.gmra.mrb[0].mxu1 %v1828_v3  ;;  %147 = vmatprep.mubr.f32.mxu0 %v1828_v3 }
   0xe   :  { %304 = vmatprep.mubr.f32.mxu1 %v1828_v3  ;;  %1704 = vmatpush1.bf16.msra.mxu1 %v1896_v12 }
   0xf   :  { %1706 = vmatprep.subr.bf16.mxu1 %v1911_v17  ;;  %1732 = vmatpush1.bf16.msra.mxu0 %v1917_v19 }
  0x10   :  { %1639 = vmatmul.mubr.msk.f32.gmra.mrb[4].mxu0 %vm46_vm0, %v24_v21 }
  0x11   :  { %153 = vmatprep.mubr.f32.mxu0 %v1828_v3  ;;  %305 = vmatmul.mubr.f32.gmra.mrb[2].mxu1 %v1828_v3 }
  0x12   :  { %1708 = vmatpush1.bf16.msra.mxu1 %v1917_v19  ;;  %474 = vmatprep.mubr.f32.mxu1 %v1828_v3 }
  0x13   :  { %1710 = vmatprep.subr.bf16.mxu1 %v1888_v8 }
  0x14   :  { %1640 = vmatmul.mubr.msk.f32.gmra.mrb[6].mxu0 %vm46_vm0, %v25_v22 }
  0x15   :  { %159 = vmatprep.mubr.f32.mxu0 %v1828_v3 }
  0x18   :  { %1641 = vmatmul.mubr.msk.f32.gmra.mrb[8].mxu0 %vm46_vm0, %v26_v23 }
  0x19   :  { %165 = vmatprep.mubr.f32.mxu0 %v1828_v3 }
  0x1c   :  { %1642 = vmatmul.mubr.msk.f32.gmra.mrb[10].mxu0 %vm46_vm0, %v27_v24 }
  0x1d   :  { %171 = vmatprep.mubr.f32.mxu0 %v1828_v3 }
  0x20   :  { %1643 = vmatmul.mubr.msk.f32.gmra.mrb[12].mxu0 %vm46_vm0, %v28_v25  ;;  %v2024_v25 = vld [vmem:[%s2622_s0] sm:$0xff] }
  0x21   :  { %177 = vmatprep.mubr.f32.mxu0 %v1828_v3  ;;  %vm1645_vm4 = vcmp.gt.s32.totalorder %v2024_v25, 0  ;;  %vm1650_vm9 = vcmp.gt.s32.totalorder %v2024_v25, 1  ;;  %vm1656_vm13 = vcmp.gt.s32.totalorder %v2024_v25, 2  ;;  %vm1662_vm1 = vcmp.gt.s32.totalorder %v2024_v25, 3 }
  0x22   :  { %v365_v29 = vsel %vm1645_vm4, 1, %v1829_v27 }
  0x24   :  { %1644 = vmatmul.mubr.msk.f32.gmra.mrb[14].mxu0 %vm46_vm0, %v29_v26 }
  0x25   :  { %1011 = vmatprep.mubr.f32.mxu0 %v1828_v3 }
  0xdb   :  { %v137_v36 = vpop.f32.mrb[0].mxu0 }
  0xdc   :  { %v139_v37 = vpop.f32.mrb[1].mxu0  ;;  %v138_v40 = vadd.f32 %v137_v36, %v39_v35 }
  0xdd   :  { %v1980_v39 = vadd.f32 %v139_v37, %v43_v34 }
  0xdf   :  { %v143_v41 = vpop.f32.mrb[2].mxu0 }
  0xe0   :  { %v1986_v44 = vadd.f32 %v143_v41, %v39_v35  ;;  %v300_v45 = vpop.f32.mrb[0].mxu1  ;;  %v145_v46 = vpop.f32.mrb[3].mxu0 }
  0xe1   :  { %v317_v47 = vadd.f32 %v300_v45, %v138_v40  ;;  %v1988_v48 = vadd.f32 %v145_v46, %v43_v34  ;;  %v302_v49 = vpop.f32.mrb[1].mxu1 }
  0xe3   :  { %v319_v50 = vmul.f32 %v317_v47, %v1984_v43  ;;  %v149_v51 = vpop.f32.mrb[4].mxu0 }
  0xe4   :  { %v1991_v52 = vadd.f32 %v149_v51, %v39_v35  ;;  %v151_v53 = vpop.f32.mrb[5].mxu0  ;;  %v306_v54 = vpop.f32.mrb[2].mxu1 }
  0xe5   :  { %1764 = vtanh.f32 %v319_v50  ;;  %v1993_v55 = vadd.f32 %v151_v53, %v43_v34  ;;  %v308_v56 = vpop.f32.mrb[3].mxu1 }
  0xe7   :  { %v155_v57 = vpop.f32.mrb[6].mxu0 }
  0xe8   :  { %v1995_v58 = vadd.f32 %v155_v57, %v39_v35  ;;  %v157_v59 = vpop.f32.mrb[7].mxu0 }
  0xe9   :  { %v1997_v60 = vadd.f32 %v157_v59, %v43_v34 }
  0xeb   :  { %v161_v61 = vpop.f32.mrb[8].mxu0 }
  0xec   :  { %v1999_v62 = vadd.f32 %v161_v61, %v39_v35  ;;  %v163_v63 = vpop.f32.mrb[9].mxu0 }
  0xed   :  { %v2001_v0 = vadd.f32 %v163_v63, %v43_v34 }
  0xef   :  { %v1765_v1 = vpop.eup %1764  ;;  %v167_v4 = vpop.f32.mrb[10].mxu0 }
  0xf0   :  { %v2007_v5 = vadd.f32 %v167_v4, %v39_v35  ;;  %v169_v6 = vpop.f32.mrb[11].mxu0  ;;  %v323_v7 = vmul.f32 %v1765_v1, %v1984_v43 }
  0xf1   :  { %v2010_v9 = vadd.f32 %v169_v6, %v43_v34 }
  0xf2   :  { %v325_v10 = vadd.f32 %v323_v7, %v2005_v2 }
  0xf3   :  { %v173_v11 = vpop.f32.mrb[12].mxu0 }
  0xf4   :  { %v2013_v13 = vadd.f32 %v173_v11, %v39_v35  ;;  %331 = vrot.lane.b32.xlu0 %v325_v10, %s1831_s1  ;;  %v175_v14 = vpop.f32.mrb[13].mxu0  ;;  %v327_v36 = vmul.f32 0.0, %v325_v10 }
  0xf5   :  { %v2016_v15 = vadd.f32 %v175_v14, %v43_v34 }
  0xf7   :  { %v179_v16 = vpop.f32.mrb[14].mxu0 }
  0xf8   :  { %v2018_v18 = vadd.f32 %v179_v16, %v39_v35  ;;  %v181_v20 = vpop.f32.mrb[15].mxu0  ;;  %v366_v35 = vsel %vm1646_vm5, 1, %v1829_v27  ;;  %vm1668_vm5 = vcmp.gt.s32.totalorder %v2024_v25, 4 }
  0xf9   :  { %v182_v21 = vadd.f32 %v181_v20, %v43_v34 }
  0xfb   :  { %v318_v22 = vadd.f32 %v308_v56, %v182_v21 }
  0xfd   :  { %v320_v23 = vmul.f32 %v318_v22, %v1984_v43 }
  0xff   :  { %1766 = vtanh.f32 %v320_v23 }
 0x109   :  { %v1767_v24 = vpop.eup %1766 }
 0x10a   :  { %v324_v26 = vmul.f32 %v1767_v24, %v1984_v43 }
 0x10c   :  { %v326_v28 = vadd.f32 %v324_v26, %v2005_v2 }
 0x10e   :  { %333 = vrot.lane.b32.xlu0 %v326_v28, %s1831_s1  ;;  %v328_v41 = vmul.f32 0.0, %v326_v28 }
 0x112   :  { %368 = vperm.xlu0 %1762, %v365_v29  }
 0x166   :  { %v332_v30 = vpop.permute.xlu0 %331 }
 0x167   :  { %v337_v31 = vmul.f32 %v332_v30, %v325_v10  ;;  %v538_v30 = vsel %vm1651_vm10, 1, %v1829_v27  ;;  %vm1674_vm10 = vcmp.gt.s32.totalorder %v2024_v25, 5 }
 0x169   :  { %341 = vrot.lane.b32.xlu1 %v337_v31, %s1832_s15 }
 0x180   :  { %v334_v33 = vpop.permute.xlu0 %333 }
 0x181   :  { %v338_v34 = vmul.f32 %v334_v33, %v326_v28 }
 0x183   :  { %343 = vrot.lane.b32.xlu1 %v338_v34, %s1832_s15 }
 0x187   :  { %371 = vperm.xlu1 %1763, %v366_v35  }
 0x191   :  { %v369_v49 = vpop.permute.xlu0 %368 }
 0x192   :  { %vm373_vm6 = vcmp.eq.s32.totalorder %v369_v49, 1 }
 0x1db   :  { %v342_v37 = vpop.permute.xlu1 %341 }
 0x1dc   :  { %v2040_v38 = vadd.f32 %v342_v37, %v327_v36 }
 0x1de   :  { %1768 = vtanh.f32 %v2040_v38  ;;  %v2096_v31 = vsel %vm373_vm6, %v2040_v38, 0.0 }
 0x1e8   :  { %v1769_v40 = vpop.eup %1768 }
 0x1e9   :  { %353 = vrot.lane.b32.xlu1 %v1769_v40, %s1831_s1 }
 0x1f5   :  { %v344_v42 = vpop.permute.xlu1 %343 }
 0x1f6   :  { %v2044_v45 = vadd.f32 %v344_v42, %v328_v41 }
 0x1f8   :  { %1770 = vtanh.f32 %v2044_v45 }
 0x202   :  { %v1771_v46 = vpop.eup %1770 }
 0x203   :  { %355 = vrot.lane.b32.xlu0 %v1771_v46, %s1831_s1 }
 0x206   :  { %v2048_v47 = vpop.permute.xlu1 %371 }
 0x207   :  { %vm374_vm7 = vcmp.eq.s32.totalorder %v2048_v47, 1 }
 0x208   :  { %v2106_v37 = vsel %vm374_vm7, %v2044_v45, 0.0 }
 0x25b   :  { %v354_v50 = vpop.permute.xlu1 %353 }
 0x25c   :  { %v359_v51 = vmul.f32 %v354_v50, %v325_v10 }
 0x25e   :  { %v2051_v53 = vsel %vm373_vm6, %v359_v51, 0.0  ;;  %vm1669_vm6 = vcmp.gt.s32.totalorder %v2035_v32, 3 }
 0x25f   :  { %380 = vrot.lane.b32.xlu1 %v2051_v53, %s1832_s15 }
 0x275   :  { %v356_v54 = vpop.permute.xlu0 %355 }
 0x276   :  { %v360_v56 = vmul.f32 %v356_v54, %v326_v28  ;;  %v537_v28 = vsel %vm1650_vm9, 1, %v1829_v27 }
 0x278   :  { %v2058_v57 = vsel %vm374_vm7, %v360_v56, 0.0 }
 0x279   :  { %385 = vrot.lane.b32.xlu0 %v2058_v57, %s1832_s15 }
 0x2d1   :  { %v381_v59 = vpop.permute.xlu1 %380 }
 0x2d2   :  { %383 = vst.msk [vmem:[%s2623_s5] sm:$0xff] %vm230_vm8, %v381_v59  ;;  %1648 = vmatmul.mubr.msk.f32.vlgmr.msra.gmra.mrb[4].mxu1 %vm230_vm8, %v381_v59 }
 0x2d3   :  { %480 = vmatprep.mubr.f32.mxu1 %v1828_v3  ;;  %1712 = vmatpush1.bf16.msra.mxu1 %v1896_v12 }
 0x2d4   :  { %1714 = vmatprep.subr.bf16.mxu1 %v1911_v17 }
 0x2d7   :  { %1716 = vmatpush1.bf16.msra.mxu1 %v1917_v19 }
 0x2d8   :  { %1718 = vmatprep.subr.bf16.mxu1 %v1888_v8 }
 0x2eb   :  { %v386_v61 = vpop.permute.xlu0 %385 }
 0x2ec   :  { %1647 = vst.msk [vmem:[%s2624_s6 + $0x38] sm:$0xff] %vm230_vm8, %v386_v61  ;;  %1649 = vmatmul.mubr.msk.f32.gmra.mrb[6].mxu1 %vm230_vm8, %v386_v61 }
 0x2ed   :  { %655 = vmatprep.mubr.f32.mxu1 %v1828_v3 }
 0x3a5   :  { %v476_v63 = vpop.f32.mrb[4].mxu1 }
 0x3a6   :  { %v489_v1 = vadd.f32 %v476_v63, %v1986_v44  ;;  %v478_v4 = vpop.f32.mrb[5].mxu1 }
 0x3a8   :  { %v491_v6 = vmul.f32 %v489_v1, %v1984_v43 }
 0x3aa   :  { %1772 = vtanh.f32 %v491_v6 }
 0x3b4   :  { %v1773_v7 = vpop.eup %1772 }
 0x3b5   :  { %v495_v10 = vmul.f32 %v1773_v7, %v1984_v43 }
 0x3b7   :  { %v497_v11 = vadd.f32 %v495_v10, %v2005_v2 }
 0x3b9   :  { %503 = vrot.lane.b32.xlu1 %v497_v11, %s1831_s1  ;;  %v499_v33 = vmul.f32 %v497_v11, %v2096_v31 }
 0x3bf   :  { %v482_v14 = vpop.f32.mrb[6].mxu1 }
 0x3c0   :  { %v484_v16 = vpop.f32.mrb[7].mxu1 }
 0x3c1   :  { %v490_v20 = vadd.f32 %v484_v16, %v2016_v15 }
 0x3c3   :  { %v492_v21 = vmul.f32 %v490_v20, %v1984_v43 }
 0x3c5   :  { %1774 = vtanh.f32 %v492_v21 }
 0x3cf   :  { %v1775_v22 = vpop.eup %1774 }
 0x3d0   :  { %v496_v44 = vmul.f32 %v1775_v22, %v1984_v43 }
 0x3d2   :  { %v498_v23 = vadd.f32 %v496_v44, %v2005_v2  ;;  %v718_v44 = vsel %vm1656_vm13, 1, %v1829_v27  ;;  %vm1675_vm13 = vcmp.gt.s32.totalorder %v2035_v32, 2 }
 0x3d4   :  { %505 = vrot.lane.b32.xlu0 %v498_v23, %s1831_s1  ;;  %v500_v40 = vmul.f32 %v498_v23, %v2106_v37 }
 0x42b   :  { %v504_v24 = vpop.permute.xlu1 %503 }
 0x42c   :  { %v509_v26 = vmul.f32 %v504_v24, %v497_v11  ;;  %v719_v24 = vsel %vm1657_vm14, 1, %v1829_v27 }
 0x42e   :  { %513 = vrot.lane.b32.xlu1 %v509_v26, %s1832_s15 }
 0x432   :  { %540 = vperm.xlu1 %1763, %v537_v28  }
 0x446   :  { %v506_v15 = vpop.permute.xlu0 %505 }
 0x447   :  { %v510_v29 = vmul.f32 %v506_v15, %v498_v23 }
 0x449   :  { %515 = vrot.lane.b32.xlu0 %v510_v29, %s1832_s15 }
 0x44d   :  { %543 = vperm.xlu0 %1762, %v538_v30  }
 0x4a0   :  { %v514_v34 = vpop.permute.xlu1 %513 }
 0x4a1   :  { %v2099_v35 = vadd.f32 %v514_v34, %v499_v33 }
 0x4a3   :  { %1776 = vtanh.f32 %v2099_v35 }
 0x4ad   :  { %v1777_v36 = vpop.eup %1776 }
 0x4ae   :  { %525 = vrot.lane.b32.xlu1 %v1777_v36, %s1831_s1 }
 0x4b1   :  { %v2113_v46 = vpop.permute.xlu1 %540 }
 0x4b2   :  { %vm545_vm11 = vcmp.eq.s32.totalorder %v2113_v46, 1 }
 0x4b3   :  { %v2167_v26 = vsel %vm545_vm11, %v2099_v35, %v2096_v31 }
 0x4bb   :  { %v516_v41 = vpop.permute.xlu0 %515 }
 0x4bc   :  { %v2109_v38 = vadd.f32 %v516_v41, %v500_v40 }
 0x4be   :  { %1778 = vtanh.f32 %v2109_v38 }
 0x4c8   :  { %v1779_v42 = vpop.eup %1778 }
 0x4c9   :  { %527 = vrot.lane.b32.xlu0 %v1779_v42, %s1831_s1 }
 0x4cc   :  { %v2126_v47 = vpop.permute.xlu0 %543 }
 0x4cd   :  { %vm546_vm12 = vcmp.eq.s32.totalorder %v2126_v47, 1 }
 0x4ce   :  { %v2178_v33 = vsel %vm546_vm12, %v2109_v38, %v2106_v37 }
 0x520   :  { %v526_v49 = vpop.permute.xlu1 %525 }
 0x521   :  { %v2115_v50 = vmul.f32 %v526_v49, %v497_v11 }
 0x523   :  { %v2122_v45 = vsel %vm545_vm11, %v2115_v50, %v2051_v53 }
 0x524   :  { %583 = vrot.lane.b32.xlu1 %v2122_v45, %s1832_s15 }
 0x53b   :  { %v528_v51 = vpop.permute.xlu0 %527 }
 0x53c   :  { %v2128_v54 = vmul.f32 %v528_v51, %v498_v23 }
 0x53e   :  { %v2135_v56 = vsel %vm546_vm12, %v2128_v54, %v2058_v57 }
 0x53f   :  { %585 = vrot.lane.b32.xlu0 %v2135_v56, %s1832_s15 }
 0x596   :  { %v584_v53 = vpop.permute.xlu1 %583 }
 0x597   :  { %1654 = vmatmul.mubr.msk.f32.vlgmr.msra.gmra.mrb[8].mxu1 %vm230_vm8, %v584_v53 }
 0x598   :  { %661 = vmatprep.mubr.f32.mxu1 %v1828_v3  ;;  %1720 = vmatpush1.bf16.msra.mxu1 %v1896_v12 }
 0x599   :  { %1722 = vmatprep.subr.bf16.mxu1 %v1911_v17 }
 0x59c   :  { %1724 = vmatpush1.bf16.msra.mxu1 %v1917_v19 }
 0x59d   :  { %1734 = vmatprep.subr.bf16.mxu1 %v1888_v8 }
 0x5b1   :  { %v586_v59 = vpop.permute.xlu0 %585 }
 0x5b2   :  { %1655 = vmatmul.mubr.msk.f32.gmra.mrb[10].mxu1 %vm230_vm8, %v586_v59 }
 0x5b3   :  { %836 = vmatprep.mubr.f32.mxu1 %v1828_v3 }
 0x66a   :  { %v657_v57 = vpop.f32.mrb[8].mxu1 }
 0x66b   :  { %v670_v61 = vadd.f32 %v657_v57, %v1991_v52  ;;  %v659_v63 = vpop.f32.mrb[9].mxu1 }
 0x66d   :  { %v672_v1 = vmul.f32 %v670_v61, %v1984_v43 }
 0x66f   :  { %1780 = vtanh.f32 %v672_v1 }
 0x679   :  { %v1781_v4 = vpop.eup %1780 }
 0x67a   :  { %v676_v6 = vmul.f32 %v1781_v4, %v1984_v43 }
 0x67c   :  { %v678_v7 = vadd.f32 %v676_v6, %v2005_v2 }
 0x67e   :  { %684 = vrot.lane.b32.xlu1 %v678_v7, %s1831_s1  ;;  %v680_v28 = vmul.f32 %v678_v7, %v2167_v26 }
 0x685   :  { %v663_v8 = vpop.f32.mrb[10].mxu1 }
 0x686   :  { %v665_v10 = vpop.f32.mrb[11].mxu1 }
 0x687   :  { %v671_v11 = vadd.f32 %v665_v10, %v2010_v9 }
 0x689   :  { %v673_v14 = vmul.f32 %v671_v11, %v1984_v43 }
 0x68b   :  { %1782 = vtanh.f32 %v673_v14 }
 0x695   :  { %v1783_v16 = vpop.eup %1782 }
 0x696   :  { %v677_v52 = vmul.f32 %v1783_v16, %v1984_v43  ;;  %v899_v16 = vsel %vm1662_vm1, 1, %v1829_v27 }
 0x698   :  { %v679_v20 = vadd.f32 %v677_v52, %v2005_v2 }
 0x69a   :  { %686 = vrot.lane.b32.xlu0 %v679_v20, %s1831_s1  ;;  %v681_v34 = vmul.f32 %v679_v20, %v2178_v33 }
 0x6f0   :  { %v685_v21 = vpop.permute.xlu1 %684 }
 0x6f1   :  { %v690_v22 = vmul.f32 %v685_v21, %v678_v7 }
 0x6f3   :  { %694 = vrot.lane.b32.xlu1 %v690_v22, %s1832_s15 }
 0x6f7   :  { %721 = vperm.xlu1 %1763, %v718_v44  }
 0x70c   :  { %v687_v9 = vpop.permute.xlu0 %686 }
 0x70d   :  { %v691_v23 = vmul.f32 %v687_v9, %v679_v20 }
 0x70f   :  { %696 = vrot.lane.b32.xlu0 %v691_v23, %s1832_s15 }
 0x713   :  { %724 = vperm.xlu0 %1762, %v719_v24  }
 0x765   :  { %v695_v15 = vpop.permute.xlu1 %694 }
 0x766   :  { %v2170_v29 = vadd.f32 %v695_v15, %v680_v28 }
 0x768   :  { %1784 = vtanh.f32 %v2170_v29 }
 0x772   :  { %v1785_v30 = vpop.eup %1784 }
 0x773   :  { %706 = vrot.lane.b32.xlu1 %v1785_v30, %s1831_s1 }
 0x776   :  { %v2185_v40 = vpop.permute.xlu1 %721 }
 0x777   :  { %vm726_vm15 = vcmp.eq.s32.totalorder %v2185_v40, 1 }
 0x778   :  { %v2238_v21 = vsel %vm726_vm15, %v2170_v29, %v2167_v26 }
 0x781   :  { %v697_v31 = vpop.permute.xlu0 %696 }
 0x782   :  { %v2181_v35 = vadd.f32 %v697_v31, %v681_v34 }
 0x784   :  { %1786 = vtanh.f32 %v2181_v35 }
 0x78e   :  { %v1787_v36 = vpop.eup %1786 }
 0x78f   :  { %708 = vrot.lane.b32.xlu0 %v1787_v36, %s1831_s1 }
 0x792   :  { %v2198_v38 = vpop.permute.xlu0 %724 }
 0x793   :  { %vm727_vm0 = vcmp.eq.s32.totalorder %v2198_v38, 1 }
 0x794   :  { %v2246_v24 = vsel %vm727_vm0, %v2181_v35, %v2178_v33 }
 0x7e5   :  { %v707_v41 = vpop.permute.xlu1 %706 }
 0x7e6   :  { %v2187_v42 = vmul.f32 %v707_v41, %v678_v7 }
 0x7e8   :  { %v2194_v37 = vsel %vm726_vm15, %v2187_v42, %v2122_v45 }
 0x7e9   :  { %764 = vrot.lane.b32.xlu1 %v2194_v37, %s1832_s15 }
 0x801   :  { %v709_v49 = vpop.permute.xlu0 %708 }
 0x802   :  { %v2200_v51 = vmul.f32 %v709_v49, %v679_v20  ;;  %v900_v20 = vsel %vm1663_vm2, 1, %v1829_v27  ;;  %vm1680_vm2 = vcmp.gt.s32.totalorder %v2024_v25, 6 }
 0x804   :  { %v2207_v53 = vsel %vm727_vm0, %v2200_v51, %v2135_v56 }
 0x805   :  { %766 = vrot.lane.b32.xlu0 %v2207_v53, %s1832_s15 }
 0x85b   :  { %v765_v45 = vpop.permute.xlu1 %764 }
 0x85c   :  { %1660 = vmatmul.mubr.msk.f32.vlgmr.msra.gmra.mrb[12].mxu1 %vm230_vm8, %v765_v45 }
 0x85d   :  { %842 = vmatprep.mubr.f32.mxu1 %v1828_v3  ;;  %1736 = vmatpush1.bf16.msra.mxu1 %v1896_v12 }
 0x85e   :  { %1738 = vmatprep.subr.bf16.mxu1 %v1911_v17 }
 0x861   :  { %1740 = vmatpush1.bf16.msra.mxu1 %v1917_v19 }
 0x877   :  { %v767_v59 = vpop.permute.xlu0 %766 }
 0x878   :  { %1661 = vmatmul.mubr.msk.f32.gmra.mrb[14].mxu1 %vm230_vm8, %v767_v59 }
 0x879   :  { %1186 = vmatprep.mubr.f32.mxu1 %v1828_v3 }
 0x92f   :  { %v838_v56 = vpop.f32.mrb[12].mxu1 }
 0x930   :  { %v851_v57 = vadd.f32 %v838_v56, %v1995_v58  ;;  %v840_v61 = vpop.f32.mrb[13].mxu1 }
 0x932   :  { %v853_v63 = vmul.f32 %v851_v57, %v1984_v43 }
 0x934   :  { %1788 = vtanh.f32 %v853_v63 }
 0x93e   :  { %v1789_v1 = vpop.eup %1788 }
 0x93f   :  { %v857_v4 = vmul.f32 %v1789_v1, %v1984_v43 }
 0x941   :  { %v859_v12 = vadd.f32 %v857_v4, %v2005_v2 }
 0x943   :  { %865 = vrot.lane.b32.xlu1 %v859_v12, %s1831_s1  ;;  %v861_v22 = vmul.f32 %v859_v12, %v2238_v21 }
 0x94b   :  { %v844_v17 = vpop.f32.mrb[14].mxu1 }
 0x94c   :  { %v846_v19 = vpop.f32.mrb[15].mxu1 }
 0x94d   :  { %v852_v6 = vadd.f32 %v846_v19, %v2001_v0 }
 0x94f   :  { %v854_v7 = vmul.f32 %v852_v6, %v1984_v43 }
 0x951   :  { %1790 = vtanh.f32 %v854_v7 }
 0x95b   :  { %v1791_v8 = vpop.eup %1790 }
 0x95c   :  { %v858_v58 = vmul.f32 %v1791_v8, %v1984_v43 }
 0x95e   :  { %v860_v10 = vadd.f32 %v858_v58, %v2005_v2 }
 0x960   :  { %867 = vrot.lane.b32.xlu0 %v860_v10, %s1831_s1  ;;  %v862_v28 = vmul.f32 %v860_v10, %v2246_v24 }
 0x9b5   :  { %v866_v11 = vpop.permute.xlu1 %865 }
 0x9b6   :  { %v871_v14 = vmul.f32 %v866_v11, %v859_v12 }
 0x9b8   :  { %875 = vrot.lane.b32.xlu1 %v871_v14, %s1832_s15  ;;  %v1075_v14 = vsel %vm1669_vm6, 1, %v1829_v27 }
 0x9bc   :  { %902 = vperm.xlu1 %1763, %v899_v16  }
 0x9d2   :  { %v868_v0 = vpop.permute.xlu0 %867 }
 0x9d3   :  { %v872_v52 = vmul.f32 %v868_v0, %v860_v10 }
 0x9d5   :  { %877 = vrot.lane.b32.xlu0 %v872_v52, %s1832_s15 }
 0x9d9   :  { %905 = vperm.xlu0 %1762, %v900_v20  }
 0xa2a   :  { %v876_v44 = vpop.permute.xlu1 %875 }
 0xa2b   :  { %v881_v9 = vadd.f32 %v876_v44, %v861_v22 }
 0xa2d   :  { %1792 = vtanh.f32 %v881_v9 }
 0xa37   :  { %v1793_v23 = vpop.eup %1792 }
 0xa38   :  { %887 = vrot.lane.b32.xlu1 %v1793_v23, %s1831_s1 }
 0xa3b   :  { %v2250_v29 = vpop.permute.xlu1 %902 }
 0xa3c   :  { %vm907_vm3 = vcmp.eq.s32.totalorder %v2250_v29, 1 }
 0xa3d   :  { %v2299_v16 = vsel %vm907_vm3, %v881_v9, %v2238_v21 }
 0xa47   :  { %v878_v15 = vpop.permute.xlu0 %877 }
 0xa48   :  { %v882_v30 = vadd.f32 %v878_v15, %v862_v28 }
 0xa4a   :  { %1794 = vtanh.f32 %v882_v30 }
 0xa54   :  { %v1795_v26 = vpop.eup %1794 }
 0xa55   :  { %889 = vrot.lane.b32.xlu0 %v1795_v26, %s1831_s1 }
 0xa58   :  { %v2263_v35 = vpop.permute.xlu0 %905 }
 0xa59   :  { %vm908_vm4 = vcmp.eq.s32.totalorder %v2263_v35, 1 }
 0xa5a   :  { %v2306_v44 = vsel %vm908_vm4, %v882_v30, %v2246_v24 }
 0xaaa   :  { %v888_v34 = vpop.permute.xlu1 %887 }
 0xaab   :  { %v2252_v31 = vmul.f32 %v888_v34, %v859_v12 }
 0xaad   :  { %v2259_v33 = vsel %vm907_vm3, %v2252_v31, %v2194_v37 }
 0xaae   :  { %939 = vrot.lane.b32.xlu1 %v2259_v33, %s1832_s15 }
 0xac7   :  { %v890_v36 = vpop.permute.xlu0 %889 }
 0xac8   :  { %v2265_v41 = vmul.f32 %v890_v36, %v860_v10  ;;  %v1074_v10 = vsel %vm1668_vm5, 1, %v1829_v27  ;;  %vm1681_vm5 = vcmp.gt.s32.totalorder %v2035_v32, 1 }
 0xaca   :  { %v2272_v49 = vsel %vm908_vm4, %v2265_v41, %v2207_v53 }
 0xacb   :  { %941 = vrot.lane.b32.xlu0 %v2272_v49, %s1832_s15 }
 0xb20   :  { %v940_v37 = vpop.permute.xlu1 %939 }
 0xb21   :  { %1666 = vmatmul.mubr.msk.f32.vlgmr.msra.gmra.mrb[16].mxu0 %vm230_vm8, %v940_v37 }
 0xb22   :  { %1017 = vmatprep.mubr.f32.mxu0 %v1828_v3 }
 0xb3d   :  { %v942_v45 = vpop.permute.xlu0 %941 }
 0xb3e   :  { %1667 = vmatmul.mubr.msk.f32.gmra.mrb[18].mxu0 %vm230_vm8, %v942_v45 }
 0xb3f   :  { %1361 = vmatprep.mubr.f32.mxu0 %v1828_v3 }
 0xbf4   :  { %v1013_v59 = vpop.f32.mrb[16].mxu0 }
 0xbf5   :  { %v1026_v56 = vadd.f32 %v1013_v59, %v1999_v62  ;;  %v1015_v57 = vpop.f32.mrb[17].mxu0 }
 0xbf7   :  { %v1028_v53 = vmul.f32 %v1026_v56, %v1984_v43 }
 0xbf9   :  { %1796 = vtanh.f32 %v1028_v53 }
 0xc03   :  { %v1797_v61 = vpop.eup %1796 }
 0xc04   :  { %v1032_v63 = vmul.f32 %v1797_v61, %v1984_v43 }
 0xc06   :  { %v1034_v1 = vadd.f32 %v1032_v63, %v2005_v2 }
 0xc08   :  { %1040 = vrot.lane.b32.xlu1 %v1034_v1, %s1831_s1  ;;  %v1036_v0 = vmul.f32 %v1034_v1, %v2299_v16 }
 0xc11   :  { %v1019_v4 = vpop.f32.mrb[18].mxu0 }
 0xc12   :  { %v1021_v12 = vpop.f32.mrb[19].mxu0 }
 0xc13   :  { %v1027_v17 = vadd.f32 %v1021_v12, %v1997_v60 }
 0xc15   :  { %v1029_v19 = vmul.f32 %v1027_v17, %v1984_v43 }
 0xc17   :  { %1798 = vtanh.f32 %v1029_v19 }
 0xc21   :  { %v1799_v6 = vpop.eup %1798 }
 0xc22   :  { %v1033_v62 = vmul.f32 %v1799_v6, %v1984_v43 }
 0xc24   :  { %v1035_v7 = vadd.f32 %v1033_v62, %v2005_v2 }
 0xc26   :  { %1042 = vrot.lane.b32.xlu0 %v1035_v7, %s1831_s1  ;;  %v1037_v23 = vmul.f32 %v1035_v7, %v2306_v44 }
 0xc7a   :  { %v1041_v8 = vpop.permute.xlu1 %1040 }
 0xc7b   :  { %v1046_v58 = vmul.f32 %v1041_v8, %v1034_v1 }
 0xc7d   :  { %1050 = vrot.lane.b32.xlu1 %v1046_v58, %s1832_s15  ;;  %v1249_v58 = vsel %vm1674_vm10, 1, %v1829_v27 }
 0xc81   :  { %1077 = vperm.xlu1 %1763, %v1074_v10  }
 0xc98   :  { %v1043_v60 = vpop.permute.xlu0 %1042 }
 0xc99   :  { %v1047_v11 = vmul.f32 %v1043_v60, %v1035_v7  ;;  %v1250_v60 = vsel %vm1675_vm13, 1, %v1829_v27  ;;  %vm1686_vm13 = vcmp.gt.s32.totalorder %v2024_v25, 7 }
 0xc9b   :  { %1052 = vrot.lane.b32.xlu0 %v1047_v11, %s1832_s15 }
 0xc9f   :  { %1080 = vperm.xlu0 %1762, %v1075_v14  }
 0xcef   :  { %v1051_v52 = vpop.permute.xlu1 %1050 }
 0xcf0   :  { %v1056_v20 = vadd.f32 %v1051_v52, %v1036_v0 }
 0xcf2   :  { %1800 = vtanh.f32 %v1056_v20 }
 0xcfc   :  { %v1801_v22 = vpop.eup %1800 }
 0xcfd   :  { %1062 = vrot.lane.b32.xlu1 %v1801_v22, %s1831_s1 }
 0xd00   :  { %v2310_v9 = vpop.permute.xlu1 %1077 }
 0xd01   :  { %vm1082_vm7 = vcmp.eq.s32.totalorder %v2310_v9, 1 }
 0xd02   :  { %v2359_v11 = vsel %vm1082_vm7, %v1056_v20, %v2299_v16  ;;  %v1280_v20 = vld [vmem:[%s2619_s4 + $0x8] sm:$0xff] }
 0xd0d   :  { %v1053_v28 = vpop.permute.xlu0 %1052 }
 0xd0e   :  { %v1057_v15 = vadd.f32 %v1053_v28, %v1037_v23 }
 0xd10   :  { %1802 = vtanh.f32 %v1057_v15 }
 0xd1a   :  { %v1803_v21 = vpop.eup %1802 }
 0xd1b   :  { %1064 = vrot.lane.b32.xlu0 %v1803_v21, %s1831_s1 }
 0xd1e   :  { %v2323_v30 = vpop.permute.xlu0 %1080 }
 0xd1f   :  { %vm1083_vm9 = vcmp.eq.s32.totalorder %v2323_v30, 1 }
 0xd20   :  { %v2369_v23 = vsel %vm1083_vm9, %v1057_v15, %v2306_v44  ;;  %v1279_v44 = vld [vmem:[%s2619_s4] sm:$0xff] }
 0xd6f   :  { %v1063_v26 = vpop.permute.xlu1 %1062 }
 0xd70   :  { %v2312_v34 = vmul.f32 %v1063_v26, %v1034_v1  ;;  %v1282_v26 = vld [vmem:[%s2619_s4 + $0x18] sm:$0xff] }
 0xd71   :  { %v1741_v15 = vpack.c.bf16 %v1282_v26, %v1280_v20 }
 0xd72   :  { %v2319_v24 = vsel %vm1082_vm7, %v2312_v34, %v2259_v33 }
 0xd73   :  { %1114 = vrot.lane.b32.xlu1 %v2319_v24, %s1832_s15  ;;  %1742 = vmatprep.subr.bf16.mxu0 %v1741_v15 }
 0xd74   :  { %1750 = vmatprep.subr.bf16.mxu1 %v1741_v15 }
 0xd8d   :  { %v1065_v36 = vpop.permute.xlu0 %1064 }
 0xd8e   :  { %v2325_v37 = vmul.f32 %v1065_v36, %v1035_v7  ;;  %v1281_v36 = vld [vmem:[%s2619_s4 + $0x10] sm:$0xff] }
 0xd90   :  { %v2332_v45 = vsel %vm1083_vm9, %v2325_v37, %v2272_v49 }
 0xd91   :  { %1116 = vrot.lane.b32.xlu0 %v2332_v45, %s1832_s15 }
 0xde5   :  { %v1115_v33 = vpop.permute.xlu1 %1114 }
 0xde6   :  { %1672 = vmatmul.mubr.msk.f32.vlgmr.msra.gmra.mrb[16].mxu1 %vm230_vm8, %v1115_v33  ;;  %v1284_v33 = vld [vmem:[%s2619_s4 + $0x28] sm:$0xff] }
 0xde7   :  { %1192 = vmatprep.mubr.f32.mxu1 %v1828_v3 }
 0xe03   :  { %v1117_v59 = vpop.permute.xlu0 %1116 }
 0xe04   :  { %1673 = vmatmul.mubr.msk.f32.gmra.mrb[18].mxu1 %vm230_vm8, %v1117_v59  ;;  %v1286_v59 = vld [vmem:[%s2619_s4 + $0x38] sm:$0xff] }
 0xe05   :  { %1536 = vmatprep.mubr.f32.mxu1 %v1828_v3 }
 0xeb9   :  { %v1188_v56 = vpop.f32.mrb[16].mxu1 }
 0xeba   :  { %v1201_v57 = vadd.f32 %v1188_v56, %v2007_v5  ;;  %v1190_v53 = vpop.f32.mrb[17].mxu1  ;;  %v1743_v56 = vpack.c.bf16 %v1281_v36, %v1279_v44  ;;  %v1424_v36 = vsel %vm1680_vm2, 1, %v1829_v27  ;;  %vm1687_vm2 = vcmp.gt.s32.totalorder %v2035_v32, 0 }
 0xebb   :  { %v1283_v53 = vld [vmem:[%s2619_s4 + $0x20] sm:$0xff]  ;;  %v551_v32 = vsel %vm545_vm11, %v2115_v50, 0.0 }
 0xebc   :  { %v1203_v49 = vmul.f32 %v1201_v57, %v1984_v43  ;;  %v1745_v57 = vpack.c.bf16 %v1286_v59, %v1284_v33  ;;  %1744 = vmatpush1.bf16.msra.mxu0 %v1743_v56  ;;  %1752 = vmatpush1.bf16.msra.mxu1 %v1743_v56  ;;  %v1425_v59 = vsel %vm1681_vm5, 1, %v1829_v27 }
 0xebe   :  { %1804 = vtanh.f32 %v1203_v49  ;;  %v1285_v49 = vld [vmem:[%s2619_s4 + $0x30] sm:$0xff]  ;;  %1746 = vmatprep.subr.bf16.mxu0 %v1745_v57  ;;  %1754 = vmatprep.subr.bf16.mxu1 %v1745_v57 }
 0xec8   :  { %v1805_v61 = vpop.eup %1804 }
 0xec9   :  { %v1207_v63 = vmul.f32 %v1805_v61, %v1984_v43  ;;  %v1747_v61 = vpack.c.bf16 %v1285_v49, %v1283_v53 }
 0xecb   :  { %v1209_v1 = vadd.f32 %v1207_v63, %v2005_v2  ;;  %1748 = vmatpush1.bf16.msra.mxu0 %v1747_v61  ;;  %1756 = vmatpush1.bf16.msra.mxu1 %v1747_v61 }
 0xecd   :  { %1215 = vrot.lane.b32.xlu1 %v1209_v1, %s1831_s1  ;;  %v1211_v14 = vmul.f32 %v1209_v1, %v2359_v11 }
 0xed7   :  { %v1194_v4 = vpop.f32.mrb[18].mxu1 }
 0xed8   :  { %v1196_v12 = vpop.f32.mrb[19].mxu1 }
 0xed9   :  { %v1202_v17 = vadd.f32 %v1196_v12, %v1993_v55 }
 0xedb   :  { %v1204_v19 = vmul.f32 %v1202_v17, %v1984_v43 }
 0xedd   :  { %1806 = vtanh.f32 %v1204_v19 }
 0xee7   :  { %v1807_v6 = vpop.eup %1806 }
 0xee8   :  { %v1208_v5 = vmul.f32 %v1807_v6, %v1984_v43 }
 0xeea   :  { %v1210_v62 = vadd.f32 %v1208_v5, %v2005_v2 }
 0xeec   :  { %1217 = vrot.lane.b32.xlu0 %v1210_v62, %s1831_s1  ;;  %v1212_v28 = vmul.f32 %v1210_v62, %v2369_v23 }
 0xf3f   :  { %v1216_v7 = vpop.permute.xlu1 %1215 }
 0xf40   :  { %v1221_v8 = vmul.f32 %v1216_v7, %v1209_v1 }
 0xf42   :  { %1225 = vrot.lane.b32.xlu1 %v1221_v8, %s1832_s15 }
 0xf46   :  { %1252 = vperm.xlu1 %1763, %v1249_v58  }
 0xf5e   :  { %v1218_v55 = vpop.permute.xlu0 %1217 }
 0xf5f   :  { %v1222_v10 = vmul.f32 %v1218_v55, %v1210_v62 }
 0xf61   :  { %1227 = vrot.lane.b32.xlu0 %v1222_v10, %s1832_s15 }
 0xf65   :  { %1255 = vperm.xlu0 %1762, %v1250_v60  }
 0xfb4   :  { %v1226_v0 = vpop.permute.xlu1 %1225 }
 0xfb5   :  { %v2362_v52 = vadd.f32 %v1226_v0, %v1211_v14 }
 0xfb7   :  { %1808 = vtanh.f32 %v2362_v52 }
 0xfc1   :  { %v1809_v22 = vpop.eup %1808 }
 0xfc2   :  { %1237 = vrot.lane.b32.xlu1 %v1809_v22, %s1831_s1 }
 0xfc5   :  { %v2400_v4 = vpop.permute.xlu1 %1252 }
 0xfc6   :  { %vm1257_vm14 = vcmp.eq.s32.totalorder %v2400_v4, 1  ;;  %v733_v4 = vsel %vm727_vm0, %v2200_v51, 0.0 }
 0xfc7   :  { %v1261_v56 = vsel %vm1257_vm14, %v2362_v52, %v2359_v11 }
 0xfd3   :  { %v1228_v21 = vpop.permute.xlu0 %1227 }
 0xfd4   :  { %v2372_v16 = vadd.f32 %v1228_v21, %v1212_v28 }
 0xfd6   :  { %1810 = vtanh.f32 %v2372_v16 }
 0xfe0   :  { %v1811_v63 = vpop.eup %1810 }
 0xfe1   :  { %1239 = vrot.lane.b32.xlu0 %v1811_v63, %s1831_s1 }
 0xfe4   :  { %v2410_v6 = vpop.permute.xlu0 %1255 }
 0xfe5   :  { %vm1258_vm1 = vcmp.eq.s32.totalorder %v2410_v6, 1 }
 0xfe6   :  { %v2448_v63 = vsel %vm1258_vm1, %v2372_v16, %v2369_v23 }
0x1034   :  { %v1238_v12 = vpop.permute.xlu1 %1237 }
0x1035   :  { %v2402_v17 = vmul.f32 %v1238_v12, %v1209_v1 }
0x1037   :  { %v1259_v19 = vsel %vm1257_vm14, %v2402_v17, %v2319_v24  ;;  %v1263_v40 = vsel %vm1257_vm14, %v2402_v17, 0.0  ;;  %v914_v17 = vsel %vm908_vm4, %v2265_v41, 0.0 }
0x1038   :  { %1289 = vrot.lane.b32.xlu1 %v1259_v19, %s1832_s15 }
0x1053   :  { %v1240_v5 = vpop.permute.xlu0 %1239 }
0x1054   :  { %v2412_v7 = vmul.f32 %v1240_v5, %v1210_v62 }
0x1056   :  { %v1260_v1 = vsel %vm1258_vm1, %v2412_v7, %v2332_v45  ;;  %v1264_v47 = vsel %vm1258_vm1, %v2412_v7, 0.0 }
0x1057   :  { %1291 = vrot.lane.b32.xlu0 %v1260_v1, %s1832_s15 }
0x10aa   :  { %v1290_v8 = vpop.permute.xlu1 %1289 }
0x10ab   :  { %1678 = vmatmul.mubr.msk.f32.vlgmr.msra.gmra.mrb[20].mxu0 %vm230_vm8, %v1290_v8 }
0x10ac   :  { %1367 = vmatprep.mubr.f32.mxu0 %v1828_v3 }
0x10c9   :  { %v1292_v24 = vpop.permute.xlu0 %1291 }
0x10ca   :  { %1679 = vmatmul.mubr.msk.f32.gmra.mrb[22].mxu0 %vm230_vm8, %v1292_v24 }
0x117e   :  { %v1363_v58 = vpop.f32.mrb[20].mxu0 }
0x117f   :  { %v1376_v62 = vadd.f32 %v1363_v58, %v2013_v13  ;;  %v1365_v55 = vpop.f32.mrb[21].mxu0 }
0x1181   :  { %v1378_v10 = vmul.f32 %v1376_v62, %v1984_v43 }
0x1183   :  { %1812 = vtanh.f32 %v1378_v10 }
0x118d   :  { %v1813_v60 = vpop.eup %1812 }
0x118e   :  { %v1382_v45 = vmul.f32 %v1813_v60, %v1984_v43 }
0x1190   :  { %v1384_v14 = vadd.f32 %v1382_v45, %v2005_v2 }
0x1192   :  { %1390 = vrot.lane.b32.xlu1 %v1384_v14, %s1831_s1  ;;  %v1386_v57 = vmul.f32 %v1384_v14, %v1261_v56 }
0x119d   :  { %v1369_v0 = vpop.f32.mrb[22].mxu0 }
0x119e   :  { %v1371_v22 = vpop.f32.mrb[23].mxu0 }
0x119f   :  { %v1377_v28 = vadd.f32 %v1371_v22, %v1988_v48 }
0x11a1   :  { %v1379_v21 = vmul.f32 %v1377_v28, %v1984_v43 }
0x11a3   :  { %1814 = vtanh.f32 %v1379_v21 }
0x11ad   :  { %v1815_v20 = vpop.eup %1814 }
0x11ae   :  { %v1383_v13 = vmul.f32 %v1815_v20, %v1984_v43 }
0x11b0   :  { %v1385_v26 = vadd.f32 %v1383_v13, %v2005_v2 }
0x11b2   :  { %1392 = vrot.lane.b32.xlu0 %v1385_v26, %s1831_s1  ;;  %v1387_v12 = vmul.f32 %v1385_v26, %v2448_v63 }
0x1204   :  { %v1391_v44 = vpop.permute.xlu1 %1390 }
0x1205   :  { %v1396_v15 = vmul.f32 %v1391_v44, %v1384_v14 }
0x1207   :  { %1400 = vrot.lane.b32.xlu1 %v1396_v15, %s1832_s15 }
0x120b   :  { %1427 = vperm.xlu1 %1763, %v1424_v36  }
0x1224   :  { %v1393_v48 = vpop.permute.xlu0 %1392 }
0x1225   :  { %v1397_v33 = vmul.f32 %v1393_v48, %v1385_v26 }
0x1227   :  { %1402 = vrot.lane.b32.xlu0 %v1397_v33, %s1832_s15 }
0x122b   :  { %1430 = vperm.xlu0 %1762, %v1425_v59  }
0x1279   :  { %v1401_v53 = vpop.permute.xlu1 %1400 }
0x127a   :  { %v1406_v49 = vadd.f32 %v1401_v53, %v1386_v57 }
0x127c   :  { %1816 = vtanh.f32 %v1406_v49 }
0x1286   :  { %v1817_v61 = vpop.eup %1816 }
0x1287   :  { %1412 = vrot.lane.b32.xlu1 %v1817_v61, %s1831_s1 }
0x128a   :  { %v2455_v52 = vpop.permute.xlu1 %1427 }
0x128b   :  { %vm1432_vm6 = vcmp.eq.s32.totalorder %v2455_v52, 1 }
0x1299   :  { %v1403_v5 = vpop.permute.xlu0 %1402 }
0x129a   :  { %v2451_v8 = vadd.f32 %v1403_v5, %v1387_v12 }
0x129c   :  { %1818 = vtanh.f32 %v2451_v8 }
0x12a6   :  { %v1819_v11 = vpop.eup %1818 }
0x12a7   :  { %1414 = vrot.lane.b32.xlu0 %v1819_v11, %s1831_s1 }
0x12aa   :  { %v2464_v16 = vpop.permute.xlu0 %1430 }
0x12ab   :  { %vm1433_vm10 = vcmp.eq.s32.totalorder %v2464_v16, 1 }
0x12ac   :  { %v1437_v46 = vsel %vm1433_vm10, %v2451_v8, %v2448_v63  ;;  %v1089_v63 = vsel %vm1083_vm9, %v2325_v37, 0.0 }
0x12f9   :  { %v1413_v24 = vpop.permute.xlu1 %1412 }
0x12fa   :  { %v2457_v58 = vmul.f32 %v1413_v24, %v1384_v14 }
0x12fc   :  { %v1434_v23 = vsel %vm1432_vm6, %v2457_v58, %v1259_v19 }
0x12fd   :  { %1464 = vrot.lane.b32.xlu1 %v1434_v23, %s1832_s15 }
0x1319   :  { %v1415_v62 = vpop.permute.xlu0 %1414 }
0x131a   :  { %v2466_v55 = vmul.f32 %v1415_v62, %v1385_v26 }
0x131c   :  { %v1435_v10 = vsel %vm1433_vm10, %v2466_v55, %v1260_v1 }
0x131d   :  { %1466 = vrot.lane.b32.xlu0 %v1435_v10, %s1832_s15 }
0x136f   :  { %v1465_v60 = vpop.permute.xlu1 %1464 }
0x1370   :  { %1684 = vmatmul.mubr.msk.f32.vlgmr.msra.gmra.mrb[20].mxu1 %vm230_vm8, %v1465_v60 }
0x1371   :  { %1542 = vmatprep.mubr.f32.mxu1 %v1828_v3 }
0x138f   :  { %v1467_v19 = vpop.permute.xlu0 %1466 }
0x1390   :  { %1685 = vmatmul.mubr.msk.f32.gmra.mrb[22].mxu1 %vm230_vm8, %v1467_v19 }
0x1443   :  { %v1538_v45 = vpop.f32.mrb[20].mxu1 }
0x1444   :  { %v1551_v14 = vadd.f32 %v1538_v45, %v2018_v18  ;;  %v1540_v0 = vpop.f32.mrb[21].mxu1 }
0x1446   :  { %v1553_v22 = vmul.f32 %v1551_v14, %v1984_v43 }
0x1448   :  { %1820 = vtanh.f32 %v1553_v22 }
0x1452   :  { %v1821_v28 = vpop.eup %1820 }
0x1453   :  { %v1557_v1 = vmul.f32 %v1821_v28, %v1984_v43 }
0x1455   :  { %v2480_v21 = vadd.f32 %v1557_v1, %v2005_v2 }
0x1457   :  { %1565 = vrot.lane.b32.xlu1 %v2480_v21, %s1831_s1 }
0x1463   :  { %v1544_v3 = vpop.f32.mrb[22].mxu1 }
0x1464   :  { %v1546_v20 = vpop.f32.mrb[23].mxu1 }
0x1465   :  { %v1552_v13 = vadd.f32 %v1546_v20, %v1980_v39  ;;  %v1599_v39 = vsel %vm1686_vm13, 1, %v1829_v27 }
0x1467   :  { %v1554_v26 = vmul.f32 %v1552_v13, %v1984_v43 }
0x1469   :  { %1822 = vtanh.f32 %v1554_v26 }
0x1473   :  { %v1823_v18 = vpop.eup %1822 }
0x1474   :  { %v1558_v44 = vmul.f32 %v1823_v18, %v1984_v43  ;;  %v1600_v43 = vsel %vm1687_vm2, 1, %v1829_v27  ;;  %v732_v27 = vsel %vm726_vm15, %v2187_v42, 0.0 }
0x1476   :  { %v2488_v15 = vadd.f32 %v1558_v44, %v2005_v2  ;;  %v1436_v2 = vsel %vm1432_vm6, %v1406_v49, %v1261_v56  ;;  %v913_v56 = vsel %vm907_vm3, %v2252_v31, 0.0  ;;  %v1088_v49 = vsel %vm1082_vm7, %v2312_v34, 0.0 }
0x1477   :  { %v1561_v25 = vmul.f32 %v2480_v21, %v1436_v2  ;;  %v1438_v31 = vsel %vm1432_vm6, %v2457_v58, 0.0  ;;  %v552_v34 = vsel %vm546_vm12, %v2128_v54, 0.0  ;;  %v1439_v54 = vsel %vm1433_vm10, %v2466_v55, 0.0 }
0x1478   :  { %1567 = vrot.lane.b32.xlu0 %v2488_v15, %s1831_s1  ;;  %v1562_v50 = vmul.f32 %v2488_v15, %v1437_v46 }
0x14c9   :  { %v1566_v36 = vpop.permute.xlu1 %1565 }
0x14ca   :  { %v1571_v48 = vmul.f32 %v1566_v36, %v2480_v21 }
0x14cc   :  { %1575 = vrot.lane.b32.xlu1 %v1571_v48, %s1832_s15 }
0x14d0   :  { %1602 = vperm.xlu1 %1763, %v1599_v39  }
0x14ea   :  { %v1568_v33 = vpop.permute.xlu0 %1567 }
0x14eb   :  { %v1572_v59 = vmul.f32 %v1568_v33, %v2488_v15 }
0x14ed   :  { %1577 = vrot.lane.b32.xlu0 %v1572_v59, %s1832_s15 }
0x14f1   :  { %1605 = vperm.xlu0 %1762, %v1600_v43  }
0x153e   :  { %v1576_v57 = vpop.permute.xlu1 %1575 }
0x153f   :  { %v1581_v53 = vadd.f32 %v1576_v57, %v1561_v25 }
0x1541   :  { %1824 = vtanh.f32 %v1581_v53 }
0x154b   :  { %v1825_v61 = vpop.eup %1824 }
0x154c   :  { %1587 = vrot.lane.b32.xlu1 %v1825_v61, %s1831_s1 }
0x154f   :  { %v1603_v38 = vpop.permute.xlu1 %1602 }
0x1550   :  { %554 = vrot.lane.b32.xlu1 %v551_v32, %s1832_s15  ;;  %vm1607_vm11 = vcmp.eq.s32.totalorder %v1603_v38, 1 }
0x1554   :  { %735 = vrot.lane.b32.xlu1 %v732_v27, %s1832_s15 }
0x1558   :  { %916 = vrot.lane.b32.xlu1 %v913_v56, %s1832_s15 }
0x155c   :  { %1091 = vrot.lane.b32.xlu1 %v1088_v49, %s1832_s15 }
0x155f   :  { %v1578_v42 = vpop.permute.xlu0 %1577 }
0x1560   :  { %1266 = vrot.lane.b32.xlu1 %v1263_v40, %s1832_s15  ;;  %v1582_v29 = vadd.f32 %v1578_v42, %v1562_v50 }
0x1562   :  { %1826 = vtanh.f32 %v1582_v29 }
0x1564   :  { %1441 = vrot.lane.b32.xlu1 %v1438_v31, %s1832_s15 }
0x156c   :  { %v1827_v9 = vpop.eup %1826 }
0x156d   :  { %1589 = vrot.lane.b32.xlu0 %v1827_v9, %s1831_s1 }
0x1570   :  { %v1606_v8 = vpop.permute.xlu0 %1605 }
0x1571   :  { %560 = vrot.lane.b32.xlu0 %v552_v34, %s1832_s15  ;;  %vm1608_vm12 = vcmp.eq.s32.totalorder %v1606_v8, 1 }
0x1575   :  { %741 = vrot.lane.b32.xlu0 %v733_v4, %s1832_s15 }
0x1579   :  { %922 = vrot.lane.b32.xlu0 %v914_v17, %s1832_s15 }
0x157d   :  { %1097 = vrot.lane.b32.xlu0 %v1089_v63, %s1832_s15 }
0x1581   :  { %1272 = vrot.lane.b32.xlu0 %v1264_v47, %s1832_s15 }
0x1585   :  { %1447 = vrot.lane.b32.xlu0 %v1439_v54, %s1832_s15 }
0x15be   :  { %v1588_v51 = vpop.permute.xlu1 %1587 }
0x15bf   :  { %v1593_v35 = vmul.f32 %v1588_v51, %v2480_v21 }
0x15c1   :  { %v1609_v41 = vsel %vm1607_vm11, %v1593_v35, 0.0 }
0x15c2   :  { %1612 = vrot.lane.b32.xlu1 %v1609_v41, %s1832_s15  ;;  %v555_v30 = vpop.permute.xlu1 %554 }
0x15c3   :  { %1652 = vst.msk [vmem:[%s2623_s5 + $0x8] sm:$0xff] %vm230_vm8, %v555_v30 }
0x15c6   :  { %v736_v37 = vpop.permute.xlu1 %735 }
0x15c7   :  { %1658 = vst.msk [vmem:[%s2623_s5 + $0x10] sm:$0xff] %vm230_vm8, %v736_v37 }
0x15ca   :  { %v917_v6 = vpop.permute.xlu1 %916 }
0x15cb   :  { %1664 = vst.msk [vmem:[%s2623_s5 + $0x18] sm:$0xff] %vm230_vm8, %v917_v6 }
0x15ce   :  { %v1092_v7 = vpop.permute.xlu1 %1091 }
0x15cf   :  { %1670 = vst.msk [vmem:[%s2623_s5 + $0x20] sm:$0xff] %vm230_vm8, %v1092_v7 }
0x15d2   :  { %v1267_v12 = vpop.permute.xlu1 %1266 }
0x15d3   :  { %1676 = vst.msk [vmem:[%s2623_s5 + $0x28] sm:$0xff] %vm230_vm8, %v1267_v12 }
0x15d6   :  { %v1442_v5 = vpop.permute.xlu1 %1441 }
0x15d7   :  { %1682 = vst.msk [vmem:[%s2623_s5 + $0x30] sm:$0xff] %vm230_vm8, %v1442_v5 }
0x15df   :  { %v1590_v11 = vpop.permute.xlu0 %1589 }
0x15e0   :  { %v1594_v52 = vmul.f32 %v1590_v11, %v2488_v15 }
0x15e2   :  { %v1610_v24 = vsel %vm1608_vm12, %v1594_v52, 0.0 }
0x15e3   :  { %1618 = vrot.lane.b32.xlu0 %v1610_v24, %s1832_s15  ;;  %v561_v58 = vpop.permute.xlu0 %560 }
0x15e4   :  { %1653 = vst.msk [vmem:[%s2624_s6 + $0x30] sm:$0xff] %vm230_vm8, %v561_v58 }
0x15e7   :  { %v742_v23 = vpop.permute.xlu0 %741 }
0x15e8   :  { %1659 = vst.msk [vmem:[%s2624_s6 + $0x28] sm:$0xff] %vm230_vm8, %v742_v23 }
0x15eb   :  { %v923_v16 = vpop.permute.xlu0 %922 }
0x15ec   :  { %1665 = vst.msk [vmem:[%s2624_s6 + $0x20] sm:$0xff] %vm230_vm8, %v923_v16 }
0x15ef   :  { %v1098_v62 = vpop.permute.xlu0 %1097 }
0x15f0   :  { %1671 = vst.msk [vmem:[%s2624_s6 + $0x18] sm:$0xff] %vm230_vm8, %v1098_v62 }
0x15f3   :  { %v1273_v55 = vpop.permute.xlu0 %1272 }
0x15f4   :  { %1677 = vst.msk [vmem:[%s2624_s6 + $0x10] sm:$0xff] %vm230_vm8, %v1273_v55 }
0x15f7   :  { %v1448_v10 = vpop.permute.xlu0 %1447 }
0x15f8   :  { %1683 = vst.msk [vmem:[%s2624_s6 + $0x8] sm:$0xff] %vm230_vm8, %v1448_v10 }
0x1634   :  { %v1613_v60 = vpop.permute.xlu1 %1612 }
0x1635   :  { %1688 = vst.msk [vmem:[%s2623_s5 + $0x38] sm:$0xff] %vm230_vm8, %v1613_v60 }
0x1655   :  { %v1619_v19 = vpop.permute.xlu0 %1618 }
0x1656   :  { %1621 = vst.msk [vmem:[%s2624_s6] sm:$0xff] %vm230_vm8, %v1619_v19 }

// kernel: lstm_model_forward.3
= control target key start
LH: loop header
LB: loop body
LE: loop exit
PB: predicated region body
PF: predicated region fallthrough
CT: control target
= control target key end

     0   :  { %v1825_v3 = vmov 0.0   ;;  %vm62_vm0 = vcmask 523264   ;;  %v1826_v45 = vmov 0   ;;  %v52_v46 = vlaneseq  ;;  %s1829_s20 = smov 32   ;;  %s2450_s2 = inlined_call_operand.vmem [shape: f32[64,256], index: 2, kind: input, shape index: {}]   ;;  %s2451_s4 = inlined_call_operand.vmem [shape: f32[32,256], index: 4, kind: input, shape index: {}]   ;;  %s2452_s1 = inlined_call_operand.vmem [shape: f32[64,64], index: 1, kind: input, shape index: {}]   ;;  %s2453_s3 = inlined_call_operand.vmem [shape: f32[1,256], index: 3, kind: input, shape index: {}]   ;;  %s2454_s0 = inlined_call_operand.vmem [shape: s32[16,1], index: 0, kind: input, shape index: {}]   ;;  %s2455_s5 = inlined_call_operand.vmem [shape: f32[64,3], index: 5, kind: input, shape index: {}]   ;;  %s2456_s6 = inlined_call_operand.vmem [shape: f32[1,3], index: 6, kind: input, shape index: {}]   ;;  %s2457_s7 = inlined_call_operand.vmem [shape: f32[8,3], index: 7, kind: output, shape index: {}]  }
   0x1   :  { %v35_v0 = vld [vmem:[%s2450_s2 + $0x8] sm:$0xff]  ;;  %v37_v1 = vld [vmem:[%s2450_s2 + $0x18] sm:$0xff]  ;;  %v34_v2 = vld [vmem:[%s2450_s2] sm:$0xff]  ;;  %151 = vmatprep.mubr.f32.mxu0 %v1825_v3  ;;  %314 = vmatprep.mubr.f32.mxu1 %v1825_v3  ;;  %v1827_v62 = vmov 0.5   ;;  %vm246_vm8 = vcmask 261120  }
   0x2   :  { %v1660_v4 = vpack.c.bf16 %v37_v1, %v35_v0  ;;  %v36_v5 = vld [vmem:[%s2450_s2 + $0x10] sm:$0xff]  ;;  %v39_v6 = vld [vmem:[%s2450_s2 + $0x28] sm:$0xff]  ;;  %v41_v7 = vld [vmem:[%s2450_s2 + $0x38] sm:$0xff]  ;;  %1759 = vset.pattern.permute.xlu0 %v1826_v45  ;;  %1760 = vset.pattern.permute.xlu1 %v1826_v45  ;;  %v53_v47 = vshrl.u32 %v52_v46, 7  ;;  %v224_v48 = vand.u32 127, %v52_v46 }
   0x3   :  { %v1662_v8 = vpack.c.bf16 %v36_v5, %v34_v2  ;;  %v1664_v9 = vpack.c.bf16 %v41_v7, %v39_v6  ;;  %v38_v10 = vld [vmem:[%s2450_s2 + $0x20] sm:$0xff]  ;;  %v40_v11 = vld [vmem:[%s2450_s2 + $0x30] sm:$0xff]  ;;  %v43_v12 = vld [vmem:[%s2450_s2 + $0x48] sm:$0xff] }
   0x4   :  { %1661 = vmatprep.subr.bf16.mxu0 %v1660_v4  ;;  %v45_v13 = vld [vmem:[%s2450_s2 + $0x58] sm:$0xff]  ;;  %v1666_v14 = vpack.c.bf16 %v40_v11, %v38_v10  ;;  %v239_v15 = vld [vmem:[%s2451_s4 + $0x8] sm:$0xff]  ;;  %v238_v17 = vld [vmem:[%s2451_s4] sm:$0xff]  ;;  %v54_v49 = vsub.s32 0, %v53_v47  ;;  %v58_v51 = vsub.s32 1, %v53_v47  ;;  %vm225_vm1 = vcmp.ge.s32.totalorder %v224_v48, 64 }
   0x5   :  { %1663 = vmatpush1.bf16.msra.mxu0 %v1662_v8  ;;  %v241_v16 = vld [vmem:[%s2451_s4 + $0x18] sm:$0xff]  ;;  %v1668_v18 = vpack.c.bf16 %v45_v13, %v43_v12  ;;  %v42_v19 = vld [vmem:[%s2450_s2 + $0x40] sm:$0xff]  ;;  %v44_v20 = vld [vmem:[%s2450_s2 + $0x50] sm:$0xff]  ;;  %vm226_vm2 = vcmp.lt.s32.totalorder %v224_v48, 96 }
   0x6   :  { %1665 = vmatprep.subr.bf16.mxu0 %v1664_v9  ;;  %v1919_v21 = vpack.c.bf16 %v241_v16, %v239_v15  ;;  %v240_v22 = vld [vmem:[%s2451_s4 + $0x10] sm:$0xff]  ;;  %v47_v24 = vld [vmem:[%s2450_s2 + $0x68] sm:$0xff]  ;;  %v49_v25 = vld [vmem:[%s2450_s2 + $0x78] sm:$0xff]  ;;  %v1670_v30 = vpack.c.bf16 %v44_v20, %v42_v19 }
   0x7   :  { %v1924_v23 = vpack.c.bf16 %v240_v22, %v238_v17  ;;  %v243_v26 = vld [vmem:[%s2451_s4 + $0x28] sm:$0xff]  ;;  %v245_v27 = vld [vmem:[%s2451_s4 + $0x38] sm:$0xff]  ;;  %v242_v28 = vld [vmem:[%s2451_s4 + $0x20] sm:$0xff]  ;;  %v1672_v33 = vpack.c.bf16 %v49_v25, %v47_v24 }
   0x8   :  { %1677 = vmatprep.subr.bf16.mxu1 %v1919_v21  ;;  %v244_v29 = vld [vmem:[%s2451_s4 + $0x30] sm:$0xff]  ;;  %v1946_v31 = vpack.c.bf16 %v245_v27, %v243_v26  ;;  %v46_v34 = vld [vmem:[%s2450_s2 + $0x60] sm:$0xff]  ;;  %v27_v38 = vld [vmem:[%s2452_s1 + $0x8] sm:$0xff] }
   0x9   :  { %1667 = vmatpush1.bf16.msra.mxu0 %v1666_v14  ;;  %1679 = vmatpush1.bf16.msra.mxu1 %v1924_v23  ;;  %v1948_v32 = vpack.c.bf16 %v244_v29, %v242_v28  ;;  %v48_v35 = vld [vmem:[%s2450_s2 + $0x70] sm:$0xff]  ;;  %v26_v37 = vld [vmem:[%s2452_s1] sm:$0xff]  ;;  %v29_v40 = vld [vmem:[%s2452_s1 + $0x18] sm:$0xff] }
   0xa   :  { %1669 = vmatprep.subr.bf16.mxu0 %v1668_v18  ;;  %1681 = vmatprep.subr.bf16.mxu1 %v1946_v31  ;;  %v1674_v36 = vpack.c.bf16 %v48_v35, %v46_v34  ;;  %v28_v39 = vld [vmem:[%s2452_s1 + $0x10] sm:$0xff]  ;;  %v30_v41 = vld [vmem:[%s2452_s1 + $0x20] sm:$0xff]  ;;  %v31_v42 = vld [vmem:[%s2452_s1 + $0x28] sm:$0xff] }
   0xb   :  { %v32_v43 = vld [vmem:[%s2452_s1 + $0x30] sm:$0xff]  ;;  %v33_v44 = vld [vmem:[%s2452_s1 + $0x38] sm:$0xff]  ;;  %v50_v50 = vld [vmem:[%s2453_s3] sm:$0x3]  ;;  %s1828_s1 = smov 64  }
   0xc   :  { %v55_v53 = vrot.slane %v50_v50, %v54_v49  ;;  %v59_v55 = vrot.slane %v50_v50, %v58_v51  ;;  %vm2017_vm3 = vmand %vm225_vm1, %vm226_vm2  ;;  %v2076_v50 = vld [vmem:[%s2454_s0 + $0x8] sm:$0xff] }
   0xd   :  { %1671 = vmatpush1.bf16.msra.mxu0 %v1670_v30  ;;  %1683 = vmatpush1.bf16.msra.mxu1 %v1948_v32  ;;  %v2023_v63 = vsel %vm2017_vm3, 1.0, %v1827_v62  ;;  %v2042_v18 = vsel %vm2017_vm3, 0.0, %v1827_v62  ;;  %vm1601_vm5 = vcmp.gt.s32.totalorder %v2076_v50, 7  ;;  %vm1605_vm10 = vcmp.gt.s32.totalorder %v2076_v50, 6 }
   0xe   :  { %1673 = vmatprep.subr.bf16.mxu0 %v1672_v33  ;;  %1685 = vmatprep.subr.bf16.mxu1 %v1919_v21  ;;  %vm1609_vm14 = vcmp.gt.s32.totalorder %v2076_v50, 5  ;;  %vm1613_vm3 = vcmp.gt.s32.totalorder %v2076_v50, 4 }
  0x10   :  { %315 = vmatmul.mubr.f32.vlgmr.msra.gmra.mrb[0].mxu1 %v1825_v3 }
  0x11   :  { %1675 = vmatpush1.bf16.msra.mxu0 %v1674_v36  ;;  %320 = vmatprep.mubr.f32.mxu1 %v1825_v3 }
  0x12   :  { %1687 = vmatpush1.bf16.msra.mxu1 %v1924_v23  ;;  %1717 = vmatprep.subr.bf16.mxu0 %v1919_v21 }
  0x13   :  { %1689 = vmatprep.subr.bf16.mxu1 %v1946_v31 }
  0x14   :  { %1592 = vmatmul.mubr.msk.f32.vlgmr.msra.gmra.mrb[0].mxu0 %vm62_vm0, %v26_v37  ;;  %321 = vmatmul.mubr.f32.gmra.mrb[2].mxu1 %v1825_v3 }
  0x15   :  { %157 = vmatprep.mubr.f32.mxu0 %v1825_v3  ;;  %477 = vmatprep.mubr.f32.mxu1 %v1825_v3 }
  0x16   :  { %1691 = vmatpush1.bf16.msra.mxu1 %v1948_v32  ;;  %1719 = vmatpush1.bf16.msra.mxu0 %v1924_v23 }
  0x17   :  { %1693 = vmatprep.subr.bf16.mxu1 %v1919_v21  ;;  %1721 = vmatprep.subr.bf16.mxu0 %v1946_v31 }
  0x18   :  { %1593 = vmatmul.mubr.msk.f32.gmra.mrb[2].mxu0 %vm62_vm0, %v27_v38 }
  0x19   :  { %163 = vmatprep.mubr.f32.mxu0 %v1825_v3 }
  0x1a   :  { %1723 = vmatpush1.bf16.msra.mxu0 %v1948_v32 }
  0x1b   :  { %1733 = vmatprep.subr.bf16.mxu0 %v1919_v21 }
  0x1c   :  { %1594 = vmatmul.mubr.msk.f32.gmra.mrb[4].mxu0 %vm62_vm0, %v28_v39 }
  0x1d   :  { %169 = vmatprep.mubr.f32.mxu0 %v1825_v3 }
  0x20   :  { %1595 = vmatmul.mubr.msk.f32.gmra.mrb[6].mxu0 %vm62_vm0, %v29_v40 }
  0x21   :  { %175 = vmatprep.mubr.f32.mxu0 %v1825_v3 }
  0x24   :  { %1596 = vmatmul.mubr.msk.f32.gmra.mrb[8].mxu0 %vm62_vm0, %v30_v41 }
  0x25   :  { %181 = vmatprep.mubr.f32.mxu0 %v1825_v3 }
  0x28   :  { %1597 = vmatmul.mubr.msk.f32.gmra.mrb[10].mxu0 %vm62_vm0, %v31_v42 }
  0x29   :  { %187 = vmatprep.mubr.f32.mxu0 %v1825_v3 }
  0x2c   :  { %1598 = vmatmul.mubr.msk.f32.gmra.mrb[12].mxu0 %vm62_vm0, %v32_v43  ;;  %v2065_v43 = vld [vmem:[%s2454_s0] sm:$0xff] }
  0x2d   :  { %193 = vmatprep.mubr.f32.mxu0 %v1825_v3  ;;  %vm1600_vm4 = vcmp.gt.s32.totalorder %v2065_v43, 0  ;;  %vm1604_vm9 = vcmp.gt.s32.totalorder %v2065_v43, 1  ;;  %vm1608_vm13 = vcmp.gt.s32.totalorder %v2065_v43, 2  ;;  %vm1612_vm2 = vcmp.gt.s32.totalorder %v2065_v43, 3 }
  0x2e   :  { %v381_v47 = vsel %vm1600_vm4, 1, %v1826_v45 }
  0x30   :  { %1599 = vmatmul.mubr.msk.f32.gmra.mrb[14].mxu0 %vm62_vm0, %v33_v44 }
  0x31   :  { %1101 = vmatprep.mubr.f32.mxu0 %v1825_v3 }
  0xe3   :  { %v316_v52 = vpop.f32.mrb[0].mxu1 }
  0xe4   :  { %v318_v54 = vpop.f32.mrb[1].mxu1 }
  0xe7   :  { %v153_v57 = vpop.f32.mrb[0].mxu0  ;;  %v322_v58 = vpop.f32.mrb[2].mxu1 }
  0xe8   :  { %v154_v59 = vadd.f32 %v153_v57, %v55_v53  ;;  %v155_v60 = vpop.f32.mrb[1].mxu0  ;;  %v324_v61 = vpop.f32.mrb[3].mxu1 }
  0xe9   :  { %v2025_v0 = vadd.f32 %v155_v60, %v59_v55 }
  0xea   :  { %v333_v1 = vadd.f32 %v316_v52, %v154_v59 }
  0xeb   :  { %v159_v2 = vpop.f32.mrb[2].mxu0 }
  0xec   :  { %v335_v4 = vmul.f32 %v333_v1, %v2023_v63  ;;  %v2028_v5 = vadd.f32 %v159_v2, %v55_v53  ;;  %v161_v6 = vpop.f32.mrb[3].mxu0 }
  0xed   :  { %v2030_v7 = vadd.f32 %v161_v6, %v59_v55 }
  0xee   :  { %1761 = vtanh.f32 %v335_v4 }
  0xef   :  { %v165_v8 = vpop.f32.mrb[4].mxu0 }
  0xf0   :  { %v2032_v9 = vadd.f32 %v165_v8, %v55_v53  ;;  %v167_v10 = vpop.f32.mrb[5].mxu0 }
  0xf1   :  { %v2034_v11 = vadd.f32 %v167_v10, %v59_v55 }
  0xf3   :  { %v171_v12 = vpop.f32.mrb[6].mxu0 }
  0xf4   :  { %v2036_v13 = vadd.f32 %v171_v12, %v55_v53  ;;  %v173_v14 = vpop.f32.mrb[7].mxu0 }
  0xf5   :  { %v2038_v15 = vadd.f32 %v173_v14, %v59_v55 }
  0xf7   :  { %v177_v16 = vpop.f32.mrb[8].mxu0 }
  0xf8   :  { %v1762_v17 = vpop.eup %1761  ;;  %v2044_v19 = vadd.f32 %v177_v16, %v55_v53  ;;  %v179_v20 = vpop.f32.mrb[9].mxu0 }
  0xf9   :  { %v2046_v22 = vadd.f32 %v179_v20, %v59_v55  ;;  %v339_v24 = vmul.f32 %v1762_v17, %v2023_v63 }
  0xfb   :  { %v183_v25 = vpop.f32.mrb[10].mxu0  ;;  %v341_v26 = vadd.f32 %v339_v24, %v2042_v18 }
  0xfc   :  { %v2050_v27 = vadd.f32 %v183_v25, %v55_v53  ;;  %v185_v28 = vpop.f32.mrb[11].mxu0 }
  0xfd   :  { %v2052_v29 = vadd.f32 %v185_v28, %v59_v55  ;;  %347 = vrot.lane.b32.xlu0 %v341_v26, %s1828_s1  ;;  %v343_v54 = vmul.f32 0.0, %v341_v26 }
  0xff   :  { %v189_v30 = vpop.f32.mrb[12].mxu0 }
 0x100   :  { %v2055_v33 = vadd.f32 %v189_v30, %v55_v53  ;;  %v191_v34 = vpop.f32.mrb[13].mxu0 }
 0x101   :  { %v2057_v35 = vadd.f32 %v191_v34, %v59_v55 }
 0x103   :  { %v195_v36 = vpop.f32.mrb[14].mxu0 }
 0x104   :  { %v2059_v37 = vadd.f32 %v195_v36, %v55_v53  ;;  %v197_v38 = vpop.f32.mrb[15].mxu0  ;;  %v382_v53 = vsel %vm1601_vm5, 1, %v1826_v45 }
 0x105   :  { %v198_v39 = vadd.f32 %v197_v38, %v59_v55 }
 0x107   :  { %v334_v40 = vadd.f32 %v324_v61, %v198_v39 }
 0x109   :  { %v336_v41 = vmul.f32 %v334_v40, %v2023_v63 }
 0x10b   :  { %1763 = vtanh.f32 %v336_v41 }
 0x115   :  { %v1764_v42 = vpop.eup %1763 }
 0x116   :  { %v340_v44 = vmul.f32 %v1764_v42, %v2023_v63 }
 0x118   :  { %v342_v46 = vadd.f32 %v340_v44, %v2042_v18 }
 0x11a   :  { %349 = vrot.lane.b32.xlu0 %v342_v46, %s1828_s1  ;;  %v344_v58 = vmul.f32 0.0, %v342_v46 }
 0x11e   :  { %384 = vperm.xlu0 %1759, %v381_v47  }
 0x16f   :  { %v348_v48 = vpop.permute.xlu0 %347 }
 0x170   :  { %v353_v49 = vmul.f32 %v348_v48, %v341_v26  ;;  %v541_v48 = vsel %vm1605_vm10, 1, %v1826_v45 }
 0x172   :  { %357 = vrot.lane.b32.xlu1 %v353_v49, %s1829_s20 }
 0x18c   :  { %v350_v51 = vpop.permute.xlu0 %349 }
 0x18d   :  { %v354_v52 = vmul.f32 %v350_v51, %v342_v46 }
 0x18f   :  { %359 = vrot.lane.b32.xlu1 %v354_v52, %s1829_s20 }
 0x193   :  { %387 = vperm.xlu1 %1760, %v382_v53  }
 0x19d   :  { %v385_v1 = vpop.permute.xlu0 %384 }
 0x19e   :  { %vm389_vm6 = vcmp.eq.s32.totalorder %v385_v1, 1 }
 0x1e4   :  { %v358_v55 = vpop.permute.xlu1 %357 }
 0x1e5   :  { %v2081_v56 = vadd.f32 %v358_v55, %v343_v54 }
 0x1e7   :  { %1765 = vtanh.f32 %v2081_v56  ;;  %v2125_v49 = vsel %vm389_vm6, %v2081_v56, 0.0 }
 0x1f1   :  { %v1766_v57 = vpop.eup %1765 }
 0x1f2   :  { %369 = vrot.lane.b32.xlu1 %v1766_v57, %s1828_s1 }
 0x201   :  { %v360_v59 = vpop.permute.xlu1 %359 }
 0x202   :  { %v2085_v60 = vadd.f32 %v360_v59, %v344_v58 }
 0x204   :  { %1767 = vtanh.f32 %v2085_v60 }
 0x20e   :  { %v1768_v61 = vpop.eup %1767 }
 0x20f   :  { %371 = vrot.lane.b32.xlu0 %v1768_v61, %s1828_s1 }
 0x212   :  { %v388_v62 = vpop.permute.xlu1 %387 }
 0x213   :  { %vm390_vm7 = vcmp.eq.s32.totalorder %v388_v62, 1 }
 0x214   :  { %v2134_v55 = vsel %vm390_vm7, %v2085_v60, 0.0 }
 0x264   :  { %v370_v2 = vpop.permute.xlu1 %369 }
 0x265   :  { %v375_v4 = vmul.f32 %v370_v2, %v341_v26 }
 0x267   :  { %v2090_v6 = vsel %vm389_vm6, %v375_v4, 0.0  ;;  %vm1616_vm6 = vcmp.gt.s32.totalorder %v2065_v43, 4 }
 0x268   :  { %405 = vrot.lane.b32.xlu1 %v2090_v6, %s1829_s20 }
 0x281   :  { %v372_v8 = vpop.permute.xlu0 %371 }
 0x282   :  { %v376_v10 = vmul.f32 %v372_v8, %v342_v46  ;;  %v540_v46 = vsel %vm1604_vm9, 1, %v1826_v45 }
 0x284   :  { %v2095_v12 = vsel %vm390_vm7, %v376_v10, 0.0  ;;  %vm1617_vm7 = vcmp.gt.s32.totalorder %v2076_v50, 3 }
 0x285   :  { %407 = vrot.lane.b32.xlu0 %v2095_v12, %s1829_s20 }
 0x2da   :  { %v406_v14 = vpop.permute.xlu1 %405 }
 0x2db   :  { %1602 = vmatmul.mubr.msk.f32.vlgmr.msra.gmra.mrb[4].mxu1 %vm246_vm8, %v406_v14 }
 0x2dc   :  { %483 = vmatprep.mubr.f32.mxu1 %v1825_v3  ;;  %1695 = vmatpush1.bf16.msra.mxu1 %v1924_v23 }
 0x2dd   :  { %1697 = vmatprep.subr.bf16.mxu1 %v1946_v31 }
 0x2e0   :  { %1699 = vmatpush1.bf16.msra.mxu1 %v1948_v32 }
 0x2e1   :  { %1701 = vmatprep.subr.bf16.mxu1 %v1919_v21 }
 0x2f7   :  { %v408_v16 = vpop.permute.xlu0 %407 }
 0x2f8   :  { %1603 = vmatmul.mubr.msk.f32.gmra.mrb[6].mxu1 %vm246_vm8, %v408_v16 }
 0x2f9   :  { %636 = vmatprep.mubr.f32.mxu1 %v1825_v3 }
 0x3ae   :  { %v479_v17 = vpop.f32.mrb[4].mxu1 }
 0x3af   :  { %v492_v20 = vadd.f32 %v479_v17, %v2028_v5  ;;  %v481_v24 = vpop.f32.mrb[5].mxu1 }
 0x3b1   :  { %v494_v25 = vmul.f32 %v492_v20, %v2023_v63 }
 0x3b3   :  { %1769 = vtanh.f32 %v494_v25 }
 0x3bd   :  { %v1770_v26 = vpop.eup %1769 }
 0x3be   :  { %v498_v28 = vmul.f32 %v1770_v26, %v2023_v63 }
 0x3c0   :  { %v500_v30 = vadd.f32 %v498_v28, %v2042_v18 }
 0x3c2   :  { %506 = vrot.lane.b32.xlu1 %v500_v30, %s1828_s1  ;;  %v502_v51 = vmul.f32 %v500_v30, %v2125_v49 }
 0x3cb   :  { %v485_v34 = vpop.f32.mrb[6].mxu1 }
 0x3cc   :  { %v487_v36 = vpop.f32.mrb[7].mxu1 }
 0x3cd   :  { %v493_v38 = vadd.f32 %v487_v36, %v2057_v35 }
 0x3cf   :  { %v495_v39 = vmul.f32 %v493_v38, %v2023_v63 }
 0x3d1   :  { %1771 = vtanh.f32 %v495_v39 }
 0x3db   :  { %v1772_v40 = vpop.eup %1771 }
 0x3dc   :  { %v499_v5 = vmul.f32 %v1772_v40, %v2023_v63 }
 0x3de   :  { %v501_v41 = vadd.f32 %v499_v5, %v2042_v18 }
 0x3e0   :  { %508 = vrot.lane.b32.xlu0 %v501_v41, %s1828_s1  ;;  %v503_v57 = vmul.f32 %v501_v41, %v2134_v55 }
 0x434   :  { %v507_v42 = vpop.permute.xlu1 %506 }
 0x435   :  { %v512_v44 = vmul.f32 %v507_v42, %v500_v30 }
 0x437   :  { %516 = vrot.lane.b32.xlu1 %v512_v44, %s1829_s20  ;;  %v700_v44 = vsel %vm1609_vm14, 1, %v1826_v45 }
 0x43b   :  { %543 = vperm.xlu1 %1760, %v540_v46  }
 0x452   :  { %v509_v35 = vpop.permute.xlu0 %508 }
 0x453   :  { %v513_v47 = vmul.f32 %v509_v35, %v501_v41 }
 0x455   :  { %518 = vrot.lane.b32.xlu0 %v513_v47, %s1829_s20 }
 0x459   :  { %546 = vperm.xlu0 %1759, %v541_v48  }
 0x4a9   :  { %v517_v52 = vpop.permute.xlu1 %516 }
 0x4aa   :  { %v2128_v53 = vadd.f32 %v517_v52, %v502_v51 }
 0x4ac   :  { %1773 = vtanh.f32 %v2128_v53 }
 0x4b6   :  { %v1774_v54 = vpop.eup %1773 }
 0x4b7   :  { %528 = vrot.lane.b32.xlu1 %v1774_v54, %s1828_s1 }
 0x4ba   :  { %v544_v61 = vpop.permute.xlu1 %543 }
 0x4bb   :  { %vm548_vm11 = vcmp.eq.s32.totalorder %v544_v61, 1 }
 0x4bc   :  { %v2180_v46 = vsel %vm548_vm11, %v2128_v53, %v2125_v49 }
 0x4c7   :  { %v519_v58 = vpop.permute.xlu0 %518 }
 0x4c8   :  { %v2137_v59 = vadd.f32 %v519_v58, %v503_v57 }
 0x4ca   :  { %1775 = vtanh.f32 %v2137_v59 }
 0x4d4   :  { %v1776_v56 = vpop.eup %1775 }
 0x4d5   :  { %530 = vrot.lane.b32.xlu0 %v1776_v56, %s1828_s1 }
 0x4d8   :  { %v547_v60 = vpop.permute.xlu0 %546 }
 0x4d9   :  { %vm549_vm12 = vcmp.eq.s32.totalorder %v547_v60, 1 }
 0x4da   :  { %v2190_v52 = vsel %vm549_vm12, %v2137_v59, %v2134_v55 }
 0x529   :  { %v529_v1 = vpop.permute.xlu1 %528 }
 0x52a   :  { %v534_v2 = vmul.f32 %v529_v1, %v500_v30 }
 0x52c   :  { %v2143_v4 = vsel %vm548_vm11, %v534_v2, %v2090_v6  ;;  %vm1620_vm11 = vcmp.gt.s32.totalorder %v2065_v43, 5 }
 0x52d   :  { %564 = vrot.lane.b32.xlu1 %v2143_v4, %s1829_s20 }
 0x547   :  { %v531_v62 = vpop.permute.xlu0 %530 }
 0x548   :  { %v535_v8 = vmul.f32 %v531_v62, %v501_v41  ;;  %v699_v41 = vsel %vm1608_vm13, 1, %v1826_v45 }
 0x54a   :  { %v2149_v10 = vsel %vm549_vm12, %v535_v8, %v2095_v12  ;;  %vm1621_vm12 = vcmp.gt.s32.totalorder %v2076_v50, 2 }
 0x54b   :  { %566 = vrot.lane.b32.xlu0 %v2149_v10, %s1829_s20 }
 0x59f   :  { %v565_v14 = vpop.permute.xlu1 %564 }
 0x5a0   :  { %1606 = vmatmul.mubr.msk.f32.vlgmr.msra.gmra.mrb[8].mxu1 %vm246_vm8, %v565_v14 }
 0x5a1   :  { %642 = vmatprep.mubr.f32.mxu1 %v1825_v3  ;;  %1703 = vmatpush1.bf16.msra.mxu1 %v1924_v23 }
 0x5a2   :  { %1705 = vmatprep.subr.bf16.mxu1 %v1946_v31 }
 0x5a5   :  { %1707 = vmatpush1.bf16.msra.mxu1 %v1948_v32 }
 0x5a6   :  { %1709 = vmatprep.subr.bf16.mxu1 %v1919_v21 }
 0x5bd   :  { %v567_v6 = vpop.permute.xlu0 %566 }
 0x5be   :  { %1607 = vmatmul.mubr.msk.f32.gmra.mrb[10].mxu1 %vm246_vm8, %v567_v6 }
 0x5bf   :  { %795 = vmatprep.mubr.f32.mxu1 %v1825_v3 }
 0x673   :  { %v638_v12 = vpop.f32.mrb[8].mxu1 }
 0x674   :  { %v651_v16 = vadd.f32 %v638_v12, %v2032_v9  ;;  %v640_v17 = vpop.f32.mrb[9].mxu1 }
 0x676   :  { %v653_v20 = vmul.f32 %v651_v16, %v2023_v63 }
 0x678   :  { %1777 = vtanh.f32 %v653_v20 }
 0x682   :  { %v1778_v24 = vpop.eup %1777 }
 0x683   :  { %v657_v25 = vmul.f32 %v1778_v24, %v2023_v63 }
 0x685   :  { %v659_v26 = vadd.f32 %v657_v25, %v2042_v18 }
 0x687   :  { %665 = vrot.lane.b32.xlu1 %v659_v26, %s1828_s1  ;;  %v661_v35 = vmul.f32 %v659_v26, %v2180_v46 }
 0x691   :  { %v644_v28 = vpop.f32.mrb[10].mxu1 }
 0x692   :  { %v646_v30 = vpop.f32.mrb[11].mxu1 }
 0x693   :  { %v652_v34 = vadd.f32 %v646_v30, %v2052_v29 }
 0x695   :  { %v654_v36 = vmul.f32 %v652_v34, %v2023_v63 }
 0x697   :  { %1779 = vtanh.f32 %v654_v36  ;;  %v858_v36 = vsel %vm1612_vm2, 1, %v1826_v45 }
 0x6a1   :  { %v1780_v38 = vpop.eup %1779 }
 0x6a2   :  { %v658_v9 = vmul.f32 %v1780_v38, %v2023_v63 }
 0x6a4   :  { %v660_v39 = vadd.f32 %v658_v9, %v2042_v18  ;;  %v859_v9 = vsel %vm1613_vm3, 1, %v1826_v45 }
 0x6a6   :  { %667 = vrot.lane.b32.xlu0 %v660_v39, %s1828_s1  ;;  %v662_v54 = vmul.f32 %v660_v39, %v2190_v52 }
 0x6f9   :  { %v666_v40 = vpop.permute.xlu1 %665 }
 0x6fa   :  { %v671_v5 = vmul.f32 %v666_v40, %v659_v26 }
 0x6fc   :  { %675 = vrot.lane.b32.xlu1 %v671_v5, %s1829_s20 }
 0x700   :  { %702 = vperm.xlu1 %1760, %v699_v41  }
 0x718   :  { %v668_v29 = vpop.permute.xlu0 %667 }
 0x719   :  { %v672_v42 = vmul.f32 %v668_v29, %v660_v39 }
 0x71b   :  { %677 = vrot.lane.b32.xlu0 %v672_v42, %s1829_s20 }
 0x71f   :  { %705 = vperm.xlu0 %1759, %v700_v44  }
 0x76e   :  { %v676_v47 = vpop.permute.xlu1 %675 }
 0x76f   :  { %v2183_v48 = vadd.f32 %v676_v47, %v661_v35 }
 0x771   :  { %1781 = vtanh.f32 %v2183_v48 }
 0x77b   :  { %v1782_v51 = vpop.eup %1781 }
 0x77c   :  { %687 = vrot.lane.b32.xlu1 %v1782_v51, %s1828_s1 }
 0x77f   :  { %v703_v58 = vpop.permute.xlu1 %702 }
 0x780   :  { %vm707_vm15 = vcmp.eq.s32.totalorder %v703_v58, 1 }
 0x78d   :  { %v678_v57 = vpop.permute.xlu0 %677 }
 0x78e   :  { %v2193_v49 = vadd.f32 %v678_v57, %v662_v54 }
 0x790   :  { %1783 = vtanh.f32 %v2193_v49 }
 0x79a   :  { %v1784_v53 = vpop.eup %1783 }
 0x79b   :  { %689 = vrot.lane.b32.xlu0 %v1784_v53, %s1828_s1 }
 0x79e   :  { %v706_v55 = vpop.permute.xlu0 %705 }
 0x79f   :  { %vm708_vm1 = vcmp.eq.s32.totalorder %v706_v55, 1 }
 0x7a0   :  { %v2246_v42 = vsel %vm708_vm1, %v2193_v49, %v2190_v52 }
 0x7ee   :  { %v688_v56 = vpop.permute.xlu1 %687 }
 0x7ef   :  { %v693_v61 = vmul.f32 %v688_v56, %v659_v26 }
 0x7f1   :  { %v2199_v1 = vsel %vm707_vm15, %v693_v61, %v2143_v4 }
 0x7f2   :  { %723 = vrot.lane.b32.xlu1 %v2199_v1, %s1829_s20 }
 0x80d   :  { %v690_v59 = vpop.permute.xlu0 %689 }
 0x80e   :  { %v694_v2 = vmul.f32 %v690_v59, %v660_v39  ;;  %v2236_v39 = vsel %vm707_vm15, %v2183_v48, %v2180_v46  ;;  %vm1624_vm15 = vcmp.gt.s32.totalorder %v2065_v43, 6 }
 0x810   :  { %v2205_v60 = vsel %vm708_vm1, %v694_v2, %v2149_v10  ;;  %vm1625_vm1 = vcmp.gt.s32.totalorder %v2076_v50, 1 }
 0x811   :  { %725 = vrot.lane.b32.xlu0 %v2205_v60, %s1829_s20 }
 0x864   :  { %v724_v62 = vpop.permute.xlu1 %723 }
 0x865   :  { %1610 = vmatmul.mubr.msk.f32.vlgmr.msra.gmra.mrb[12].mxu1 %vm246_vm8, %v724_v62 }
 0x866   :  { %801 = vmatprep.mubr.f32.mxu1 %v1825_v3  ;;  %1711 = vmatpush1.bf16.msra.mxu1 %v1924_v23 }
 0x867   :  { %1713 = vmatprep.subr.bf16.mxu1 %v1946_v31 }
 0x86a   :  { %1715 = vmatpush1.bf16.msra.mxu1 %v1948_v32 }
 0x86b   :  { %1725 = vmatprep.subr.bf16.mxu1 %v1919_v21 }
 0x883   :  { %v726_v4 = vpop.permute.xlu0 %725 }
 0x884   :  { %1611 = vmatmul.mubr.msk.f32.gmra.mrb[14].mxu1 %vm246_vm8, %v726_v4 }
 0x885   :  { %948 = vmatprep.mubr.f32.mxu1 %v1825_v3 }
 0x938   :  { %v797_v8 = vpop.f32.mrb[12].mxu1 }
 0x939   :  { %v810_v10 = vadd.f32 %v797_v8, %v2036_v13  ;;  %v799_v14 = vpop.f32.mrb[13].mxu1 }
 0x93b   :  { %v812_v6 = vmul.f32 %v810_v10, %v2023_v63 }
 0x93d   :  { %1785 = vtanh.f32 %v812_v6 }
 0x947   :  { %v1786_v12 = vpop.eup %1785 }
 0x948   :  { %v816_v16 = vmul.f32 %v1786_v12, %v2023_v63 }
 0x94a   :  { %v818_v17 = vadd.f32 %v816_v16, %v2042_v18 }
 0x94c   :  { %824 = vrot.lane.b32.xlu1 %v818_v17, %s1828_s1  ;;  %v820_v40 = vmul.f32 %v818_v17, %v2236_v39 }
 0x957   :  { %v803_v21 = vpop.f32.mrb[14].mxu1 }
 0x958   :  { %v805_v20 = vpop.f32.mrb[15].mxu1 }
 0x959   :  { %v811_v24 = vadd.f32 %v805_v20, %v2046_v22  ;;  %v1011_v20 = vsel %vm1616_vm6, 1, %v1826_v45 }
 0x95b   :  { %v813_v25 = vmul.f32 %v811_v24, %v2023_v63 }
 0x95d   :  { %1787 = vtanh.f32 %v813_v25  ;;  %v1012_v25 = vsel %vm1617_vm7, 1, %v1826_v45  ;;  %vm1831_vm7 = vmmov 0  }
 0x967   :  { %v1788_v26 = vpop.eup %1787 }
 0x968   :  { %v817_v13 = vmul.f32 %v1788_v26, %v2023_v63 }
 0x96a   :  { %v819_v28 = vadd.f32 %v817_v13, %v2042_v18 }
 0x96c   :  { %826 = vrot.lane.b32.xlu0 %v819_v28, %s1828_s1  ;;  %v821_v44 = vmul.f32 %v819_v28, %v2246_v42 }
 0x9be   :  { %v825_v30 = vpop.permute.xlu1 %824 }
 0x9bf   :  { %v830_v34 = vmul.f32 %v825_v30, %v818_v17 }
 0x9c1   :  { %834 = vrot.lane.b32.xlu1 %v830_v34, %s1829_s20 }
 0x9c5   :  { %861 = vperm.xlu1 %1760, %v858_v36  }
 0x9de   :  { %v827_v22 = vpop.permute.xlu0 %826 }
 0x9df   :  { %v831_v38 = vmul.f32 %v827_v22, %v819_v28 }
 0x9e1   :  { %836 = vrot.lane.b32.xlu0 %v831_v38, %s1829_s20 }
 0x9e5   :  { %864 = vperm.xlu0 %1759, %v859_v9  }
 0xa33   :  { %v835_v5 = vpop.permute.xlu1 %834 }
 0xa34   :  { %v2239_v41 = vadd.f32 %v835_v5, %v820_v40 }
 0xa36   :  { %1789 = vtanh.f32 %v2239_v41 }
 0xa40   :  { %v1790_v29 = vpop.eup %1789 }
 0xa41   :  { %846 = vrot.lane.b32.xlu1 %v1790_v29, %s1828_s1 }
 0xa44   :  { %v862_v48 = vpop.permute.xlu1 %861 }
 0xa45   :  { %vm866_vm4 = vcmp.eq.s32.totalorder %v862_v48, 1 }
 0xa46   :  { %v2291_v26 = vsel %vm866_vm4, %v2239_v41, %v2236_v39 }
 0xa53   :  { %v837_v35 = vpop.permute.xlu0 %836 }
 0xa54   :  { %v2249_v46 = vadd.f32 %v837_v35, %v821_v44 }
 0xa56   :  { %1791 = vtanh.f32 %v2249_v46 }
 0xa60   :  { %v1792_v47 = vpop.eup %1791 }
 0xa61   :  { %848 = vrot.lane.b32.xlu0 %v1792_v47, %s1828_s1 }
 0xa64   :  { %v865_v52 = vpop.permute.xlu0 %864 }
 0xa65   :  { %vm867_vm5 = vcmp.eq.s32.totalorder %v865_v52, 1 }
 0xa66   :  { %v2301_v36 = vsel %vm867_vm5, %v2249_v46, %v2246_v42 }
 0xab3   :  { %v847_v51 = vpop.permute.xlu1 %846 }
 0xab4   :  { %v852_v54 = vmul.f32 %v847_v51, %v818_v17 }
 0xab6   :  { %v2255_v57 = vsel %vm866_vm4, %v852_v54, %v2199_v1  ;;  %vm1628_vm4 = vcmp.gt.s32.totalorder %v2065_v43, 7 }
 0xab7   :  { %876 = vrot.lane.b32.xlu1 %v2255_v57, %s1829_s20 }
 0xad3   :  { %v849_v49 = vpop.permute.xlu0 %848 }
 0xad4   :  { %v853_v53 = vmul.f32 %v849_v49, %v819_v28 }
 0xad6   :  { %v2261_v58 = vsel %vm867_vm5, %v853_v53, %v2205_v60  ;;  %vm1629_vm5 = vcmp.gt.s32.totalorder %v2076_v50, 0 }
 0xad7   :  { %878 = vrot.lane.b32.xlu0 %v2261_v58, %s1829_s20 }
 0xb29   :  { %v877_v56 = vpop.permute.xlu1 %876 }
 0xb2a   :  { %1614 = vmatmul.mubr.msk.f32.vlgmr.msra.gmra.mrb[16].mxu1 %vm246_vm8, %v877_v56 }
 0xb2b   :  { %954 = vmatprep.mubr.f32.mxu1 %v1825_v3  ;;  %1727 = vmatpush1.bf16.msra.mxu1 %v1924_v23 }
 0xb2c   :  { %1729 = vmatprep.subr.bf16.mxu1 %v1946_v31 }
 0xb2f   :  { %1731 = vmatpush1.bf16.msra.mxu1 %v1948_v32 }
 0xb49   :  { %v879_v61 = vpop.permute.xlu0 %878 }
 0xb4a   :  { %1615 = vmatmul.mubr.msk.f32.gmra.mrb[18].mxu1 %vm246_vm8, %v879_v61 }
 0xb4b   :  { %1254 = vmatprep.mubr.f32.mxu1 %v1825_v3 }
 0xbfd   :  { %v950_v1 = vpop.f32.mrb[16].mxu1 }
 0xbfe   :  { %v963_v55 = vadd.f32 %v950_v1, %v2044_v19  ;;  %v952_v59 = vpop.f32.mrb[17].mxu1 }
 0xc00   :  { %v965_v2 = vmul.f32 %v963_v55, %v2023_v63 }
 0xc02   :  { %1793 = vtanh.f32 %v965_v2  ;;  %v1164_v2 = vsel %vm1620_vm11, 1, %v1826_v45 }
 0xc0c   :  { %v1794_v60 = vpop.eup %1793 }
 0xc0d   :  { %v969_v62 = vmul.f32 %v1794_v60, %v2023_v63 }
 0xc0f   :  { %v971_v4 = vadd.f32 %v969_v62, %v2042_v18  ;;  %v1165_v62 = vsel %vm1621_vm12, 1, %v1826_v45 }
 0xc11   :  { %977 = vrot.lane.b32.xlu1 %v971_v4, %s1828_s1  ;;  %v973_v13 = vmul.f32 %v971_v4, %v2291_v26 }
 0xc1d   :  { %v956_v8 = vpop.f32.mrb[18].mxu1 }
 0xc1e   :  { %v958_v10 = vpop.f32.mrb[19].mxu1 }
 0xc1f   :  { %v964_v14 = vadd.f32 %v958_v10, %v2038_v15 }
 0xc21   :  { %v966_v6 = vmul.f32 %v964_v14, %v2023_v63 }
 0xc23   :  { %1795 = vtanh.f32 %v966_v6 }
 0xc2d   :  { %v1796_v12 = vpop.eup %1795 }
 0xc2e   :  { %v970_v19 = vmul.f32 %v1796_v12, %v2023_v63 }
 0xc30   :  { %v972_v16 = vadd.f32 %v970_v19, %v2042_v18 }
 0xc32   :  { %979 = vrot.lane.b32.xlu0 %v972_v16, %s1828_s1  ;;  %v974_v22 = vmul.f32 %v972_v16, %v2301_v36 }
 0xc83   :  { %v978_v17 = vpop.permute.xlu1 %977 }
 0xc84   :  { %v983_v21 = vmul.f32 %v978_v17, %v971_v4 }
 0xc86   :  { %987 = vrot.lane.b32.xlu1 %v983_v21, %s1829_s20 }
 0xc8a   :  { %1014 = vperm.xlu1 %1760, %v1011_v20  }
 0xca4   :  { %v980_v15 = vpop.permute.xlu0 %979 }
 0xca5   :  { %v984_v24 = vmul.f32 %v980_v15, %v972_v16 }
 0xca7   :  { %989 = vrot.lane.b32.xlu0 %v984_v24, %s1829_s20 }
 0xcab   :  { %1017 = vperm.xlu0 %1759, %v1012_v25  }
 0xcf8   :  { %v988_v28 = vpop.permute.xlu1 %987 }
 0xcf9   :  { %v2294_v30 = vadd.f32 %v988_v28, %v973_v13 }
 0xcfb   :  { %1797 = vtanh.f32 %v2294_v30 }
 0xd05   :  { %v1798_v34 = vpop.eup %1797 }
 0xd06   :  { %999 = vrot.lane.b32.xlu1 %v1798_v34, %s1828_s1 }
 0xd09   :  { %v1015_v40 = vpop.permute.xlu1 %1014 }
 0xd0a   :  { %vm1019_vm9 = vcmp.eq.s32.totalorder %v1015_v40, 1 }
 0xd19   :  { %v990_v38 = vpop.permute.xlu0 %989 }
 0xd1a   :  { %v2304_v9 = vadd.f32 %v990_v38, %v974_v22 }
 0xd1c   :  { %1799 = vtanh.f32 %v2304_v9 }
 0xd26   :  { %v1800_v39 = vpop.eup %1799 }
 0xd27   :  { %1001 = vrot.lane.b32.xlu0 %v1800_v39, %s1828_s1 }
 0xd2a   :  { %v1018_v42 = vpop.permute.xlu0 %1017 }
 0xd2b   :  { %vm1020_vm10 = vcmp.eq.s32.totalorder %v1018_v42, 1 }
 0xd2c   :  { %v1024_v12 = vsel %vm1020_vm10, %v2304_v9, %v2301_v36 }
 0xd78   :  { %v1000_v5 = vpop.permute.xlu1 %999 }
 0xd79   :  { %v1005_v41 = vmul.f32 %v1000_v5, %v971_v4  ;;  %v1023_v4 = vsel %vm1019_vm9, %v2294_v30, %v2291_v26 }
 0xd7b   :  { %v2310_v29 = vsel %vm1019_vm9, %v1005_v41, %v2255_v57 }
 0xd7c   :  { %1029 = vrot.lane.b32.xlu1 %v2310_v29, %s1829_s20 }
 0xd99   :  { %v1002_v44 = vpop.permute.xlu0 %1001 }
 0xd9a   :  { %v1006_v35 = vmul.f32 %v1002_v44, %v972_v16 }
 0xd9c   :  { %v2316_v46 = vsel %vm1020_vm10, %v1006_v35, %v2261_v58  ;;  %vm1579_vm10 = vcmask 23552  }
 0xd9d   :  { %1031 = vrot.lane.b32.xlu0 %v2316_v46, %s1829_s20 }
 0xdee   :  { %v1030_v47 = vpop.permute.xlu1 %1029 }
 0xdef   :  { %1618 = vmatmul.mubr.msk.f32.vlgmr.msra.gmra.mrb[16].mxu0 %vm246_vm8, %v1030_v47 }
 0xdf0   :  { %1107 = vmatprep.mubr.f32.mxu0 %v1825_v3  ;;  %1735 = vmatpush1.bf16.msra.mxu0 %v1924_v23 }
 0xdf1   :  { %1737 = vmatprep.subr.bf16.mxu0 %v1946_v31 }
 0xdf4   :  { %1739 = vmatpush1.bf16.msra.mxu0 %v1948_v32 }
 0xe0f   :  { %v1032_v48 = vpop.permute.xlu0 %1031 }
 0xe10   :  { %1619 = vmatmul.mubr.msk.f32.gmra.mrb[18].mxu0 %vm246_vm8, %v1032_v48 }
 0xe11   :  { %1407 = vmatprep.mubr.f32.mxu0 %v1825_v3 }
 0xec2   :  { %v1103_v51 = vpop.f32.mrb[16].mxu0 }
 0xec3   :  { %v1116_v54 = vadd.f32 %v1103_v51, %v2050_v27  ;;  %v1105_v57 = vpop.f32.mrb[17].mxu0 }
 0xec5   :  { %v1118_v52 = vmul.f32 %v1116_v54, %v2023_v63  ;;  %v1317_v54 = vsel %vm1624_vm15, 1, %v1826_v45 }
 0xec7   :  { %1801 = vtanh.f32 %v1118_v52  ;;  %v1318_v52 = vsel %vm1625_vm1, 1, %v1826_v45 }
 0xed1   :  { %v1802_v49 = vpop.eup %1801 }
 0xed2   :  { %v1122_v53 = vmul.f32 %v1802_v49, %v2023_v63 }
 0xed4   :  { %v1124_v23 = vadd.f32 %v1122_v53, %v2042_v18 }
 0xed6   :  { %1130 = vrot.lane.b32.xlu1 %v1124_v23, %s1828_s1  ;;  %v1126_v8 = vmul.f32 %v1124_v23, %v1023_v4 }
 0xee3   :  { %v1109_v31 = vpop.f32.mrb[18].mxu0 }
 0xee4   :  { %v1111_v32 = vpop.f32.mrb[19].mxu0 }
 0xee5   :  { %v1117_v58 = vadd.f32 %v1111_v32, %v2034_v11 }
 0xee7   :  { %v1119_v56 = vmul.f32 %v1117_v58, %v2023_v63 }
 0xee9   :  { %1803 = vtanh.f32 %v1119_v56 }
 0xef3   :  { %v1804_v61 = vpop.eup %1803 }
 0xef4   :  { %v1123_v27 = vmul.f32 %v1804_v61, %v2023_v63 }
 0xef6   :  { %v1125_v1 = vadd.f32 %v1123_v27, %v2042_v18 }
 0xef8   :  { %1132 = vrot.lane.b32.xlu0 %v1125_v1, %s1828_s1  ;;  %v1127_v19 = vmul.f32 %v1125_v1, %v1024_v12 }
 0xf48   :  { %v1131_v55 = vpop.permute.xlu1 %1130 }
 0xf49   :  { %v1136_v59 = vmul.f32 %v1131_v55, %v1124_v23 }
 0xf4b   :  { %1140 = vrot.lane.b32.xlu1 %v1136_v59, %s1829_s20 }
 0xf4f   :  { %1167 = vperm.xlu1 %1760, %v1164_v2  }
 0xf6a   :  { %v1133_v11 = vpop.permute.xlu0 %1132 }
 0xf6b   :  { %v1137_v60 = vmul.f32 %v1133_v11, %v1125_v1 }
 0xf6d   :  { %1142 = vrot.lane.b32.xlu0 %v1137_v60, %s1829_s20 }
 0xf71   :  { %1170 = vperm.xlu0 %1759, %v1165_v62  }
 0xfbd   :  { %v1141_v10 = vpop.permute.xlu1 %1140 }
 0xfbe   :  { %v1146_v14 = vadd.f32 %v1141_v10, %v1126_v8 }
 0xfc0   :  { %1805 = vtanh.f32 %v1146_v14 }
 0xfca   :  { %v1806_v6 = vpop.eup %1805 }
 0xfcb   :  { %1152 = vrot.lane.b32.xlu1 %v1806_v6, %s1828_s1 }
 0xfce   :  { %v1168_v20 = vpop.permute.xlu1 %1167 }
 0xfcf   :  { %vm1172_vm13 = vcmp.eq.s32.totalorder %v1168_v20, 1 }
 0xfd0   :  { %v1176_v49 = vsel %vm1172_vm13, %v1146_v14, %v1023_v4 }
 0xfdf   :  { %v1143_v16 = vpop.permute.xlu0 %1142 }
 0xfe0   :  { %v1147_v17 = vadd.f32 %v1143_v16, %v1127_v19 }
 0xfe2   :  { %1807 = vtanh.f32 %v1147_v17 }
 0xfec   :  { %v1808_v21 = vpop.eup %1807 }
 0xfed   :  { %1154 = vrot.lane.b32.xlu0 %v1808_v21, %s1828_s1 }
 0xff0   :  { %v1171_v26 = vpop.permute.xlu0 %1170 }
 0xff1   :  { %vm1173_vm14 = vcmp.eq.s32.totalorder %v1171_v26, 1 }
 0xff2   :  { %v1177_v58 = vsel %vm1173_vm14, %v1147_v17, %v1024_v12 }
0x103d   :  { %v1153_v15 = vpop.permute.xlu1 %1152 }
0x103e   :  { %v1158_v24 = vmul.f32 %v1153_v15, %v1124_v23 }
0x1040   :  { %v1174_v25 = vsel %vm1172_vm13, %v1158_v24, %v2310_v29 }
0x1041   :  { %1182 = vrot.lane.b32.xlu1 %v1174_v25, %s1829_s20 }
0x105f   :  { %v1155_v13 = vpop.permute.xlu0 %1154 }
0x1060   :  { %v1159_v28 = vmul.f32 %v1155_v13, %v1125_v1 }
0x1062   :  { %v1175_v30 = vsel %vm1173_vm14, %v1159_v28, %v2316_v46 }
0x1063   :  { %1184 = vrot.lane.b32.xlu0 %v1175_v30, %s1829_s20 }
0x10b3   :  { %v1183_v34 = vpop.permute.xlu1 %1182 }
0x10b4   :  { %1622 = vmatmul.mubr.msk.f32.vlgmr.msra.gmra.mrb[20].mxu1 %vm246_vm8, %v1183_v34 }
0x10b5   :  { %1260 = vmatprep.mubr.f32.mxu1 %v1825_v3 }
0x10d5   :  { %v1185_v36 = vpop.permute.xlu0 %1184 }
0x10d6   :  { %1623 = vmatmul.mubr.msk.f32.gmra.mrb[22].mxu1 %vm246_vm8, %v1185_v36  ;;  %v1470_v36 = vsel %vm1628_vm4, 1, %v1826_v45 }
0x10d7   :  { %1657 = vmatprep.mubr.msk.f32.mxu1 %vm1831_vm7, %v1825_v3 }
0x1187   :  { %v1256_v22 = vpop.f32.mrb[20].mxu1 }
0x1188   :  { %v1269_v38 = vadd.f32 %v1256_v22, %v2055_v33  ;;  %v1258_v9 = vpop.f32.mrb[21].mxu1 }
0x118a   :  { %v1271_v39 = vmul.f32 %v1269_v38, %v2023_v63 }
0x118c   :  { %1809 = vtanh.f32 %v1271_v39 }
0x1196   :  { %v1810_v40 = vpop.eup %1809 }
0x1197   :  { %v1275_v5 = vmul.f32 %v1810_v40, %v2023_v63 }
0x1199   :  { %v1277_v41 = vadd.f32 %v1275_v5, %v2042_v18 }
0x119b   :  { %1283 = vrot.lane.b32.xlu1 %v1277_v41, %s1828_s1  ;;  %v1279_v53 = vmul.f32 %v1277_v41, %v1176_v49 }
0x11a9   :  { %v1262_v29 = vpop.f32.mrb[22].mxu1 }
0x11aa   :  { %v1264_v42 = vpop.f32.mrb[23].mxu1 }
0x11ab   :  { %v1270_v44 = vadd.f32 %v1264_v42, %v2030_v7  ;;  %v1491_v42 = vld [vmem:[%s2455_s5] sm:$0xff] }
0x11ad   :  { %v1272_v35 = vmul.f32 %v1270_v44, %v2023_v63  ;;  %v1492_v44 = vld [vmem:[%s2455_s5 + $0x8] sm:$0xff] }
0x11af   :  { %1811 = vtanh.f32 %v1272_v35  ;;  %v1493_v35 = vld [vmem:[%s2455_s5 + $0x10] sm:$0xff] }
0x11b9   :  { %v1812_v46 = vpop.eup %1811 }
0x11ba   :  { %v1276_v33 = vmul.f32 %v1812_v46, %v2023_v63  ;;  %v1741_v46 = vpack.c.bf16 %v1492_v44, %v1491_v42 }
0x11bc   :  { %v1278_v47 = vadd.f32 %v1276_v33, %v2042_v18  ;;  %v1494_v33 = vld [vmem:[%s2455_s5 + $0x18] sm:$0xff] }
0x11be   :  { %1285 = vrot.lane.b32.xlu0 %v1278_v47, %s1828_s1  ;;  %v1280_v56 = vmul.f32 %v1278_v47, %v1177_v58 }
0x120d   :  { %v1284_v48 = vpop.permute.xlu1 %1283 }
0x120e   :  { %v1289_v51 = vmul.f32 %v1284_v48, %v1277_v41  ;;  %v1495_v48 = vld [vmem:[%s2455_s5 + $0x20] sm:$0xff] }
0x1210   :  { %1293 = vrot.lane.b32.xlu1 %v1289_v51, %s1829_s20  ;;  %v1496_v51 = vld [vmem:[%s2455_s5 + $0x28] sm:$0xff] }
0x1214   :  { %1320 = vperm.xlu1 %1760, %v1317_v54  }
0x1230   :  { %v1286_v7 = vpop.permute.xlu0 %1285 }
0x1231   :  { %v1290_v57 = vmul.f32 %v1286_v7, %v1278_v47  ;;  %v1747_v7 = vpack.c.bf16 %v1496_v51, %v1495_v48 }
0x1233   :  { %1295 = vrot.lane.b32.xlu0 %v1290_v57, %s1829_s20  ;;  %v1497_v57 = vld [vmem:[%s2455_s5 + $0x30] sm:$0xff] }
0x1237   :  { %1323 = vperm.xlu0 %1759, %v1318_v52   ;;  %v1498_v52 = vld [vmem:[%s2455_s5 + $0x38] sm:$0xff] }
0x1282   :  { %v1294_v23 = vpop.permute.xlu1 %1293 }
0x1283   :  { %v1299_v31 = vadd.f32 %v1294_v23, %v1279_v53  ;;  %v1750_v23 = vpack.c.bf16 %v1498_v52, %v1497_v57 }
0x1285   :  { %1813 = vtanh.f32 %v1299_v31 }
0x128f   :  { %v1814_v32 = vpop.eup %1813 }
0x1290   :  { %1305 = vrot.lane.b32.xlu1 %v1814_v32, %s1828_s1 }
0x1293   :  { %v1321_v55 = vpop.permute.xlu1 %1320 }
0x1294   :  { %vm1325_vm2 = vcmp.eq.s32.totalorder %v1321_v55, 1 }
0x12a5   :  { %v1296_v61 = vpop.permute.xlu0 %1295 }
0x12a6   :  { %v1300_v27 = vadd.f32 %v1296_v61, %v1280_v56 }
0x12a8   :  { %1815 = vtanh.f32 %v1300_v27 }
0x12b2   :  { %v1816_v1 = vpop.eup %1815 }
0x12b3   :  { %1307 = vrot.lane.b32.xlu0 %v1816_v1, %s1828_s1 }
0x12b6   :  { %v1324_v60 = vpop.permute.xlu0 %1323 }
0x12b7   :  { %vm1326_vm3 = vcmp.eq.s32.totalorder %v1324_v60, 1 }
0x12b8   :  { %v1330_v40 = vsel %vm1326_vm3, %v1300_v27, %v1177_v58 }
0x1302   :  { %v1306_v59 = vpop.permute.xlu1 %1305 }
0x1303   :  { %v1311_v2 = vmul.f32 %v1306_v59, %v1277_v41  ;;  %v1630_v59 = vld [vmem:[%s2456_s6] ss:$0 sm:$0xff] }
0x1305   :  { %v2381_v11 = vsel %vm1325_vm2, %v1311_v2, %v1174_v25 }
0x1306   :  { %1335 = vrot.lane.b32.xlu1 %v2381_v11, %s1829_s20 }
0x1325   :  { %v1308_v62 = vpop.permute.xlu0 %1307 }
0x1326   :  { %v1312_v4 = vmul.f32 %v1308_v62, %v1278_v47  ;;  %v1744_v47 = vpack.c.bf16 %v1494_v33, %v1493_v35 }
0x1328   :  { %v2386_v8 = vsel %vm1326_vm3, %v1312_v4, %v1175_v30 }
0x1329   :  { %1337 = vrot.lane.b32.xlu0 %v2386_v8, %s1829_s20 }
0x1378   :  { %v1336_v10 = vpop.permute.xlu1 %1335 }
0x1379   :  { %1626 = vmatmul.mubr.msk.f32.vlgmr.msra.gmra.mrb[20].mxu0 %vm246_vm8, %v1336_v10 }
0x137a   :  { %1413 = vmatprep.mubr.f32.mxu0 %v1825_v3 }
0x139b   :  { %v1338_v14 = vpop.permute.xlu0 %1337 }
0x139c   :  { %1627 = vmatmul.mubr.msk.f32.gmra.mrb[22].mxu0 %vm246_vm8, %v1338_v14 }
0x144c   :  { %v1409_v6 = vpop.f32.mrb[20].mxu0 }
0x144d   :  { %v1422_v12 = vadd.f32 %v1409_v6, %v2059_v37  ;;  %v1411_v19 = vpop.f32.mrb[21].mxu0 }
0x144f   :  { %v1424_v16 = vmul.f32 %v1422_v12, %v2023_v63 }
0x1451   :  { %1817 = vtanh.f32 %v1424_v16 }
0x145b   :  { %v1818_v17 = vpop.eup %1817 }
0x145c   :  { %v1428_v21 = vmul.f32 %v1818_v17, %v2023_v63 }
0x145e   :  { %v1430_v20 = vadd.f32 %v1428_v21, %v2042_v18 }
0x1460   :  { %1436 = vrot.lane.b32.xlu1 %v1430_v20, %s1828_s1 }
0x146f   :  { %v1415_v15 = vpop.f32.mrb[22].mxu0 }
0x1470   :  { %v1417_v24 = vpop.f32.mrb[23].mxu0 }
0x1471   :  { %v1423_v25 = vadd.f32 %v1417_v24, %v2025_v0 }
0x1473   :  { %v1425_v26 = vmul.f32 %v1423_v25, %v2023_v63 }
0x1475   :  { %1819 = vtanh.f32 %v1425_v26 }
0x147f   :  { %v1820_v13 = vpop.eup %1819 }
0x1480   :  { %v1429_v37 = vmul.f32 %v1820_v13, %v2023_v63  ;;  %v1471_v63 = vsel %vm1629_vm5, 1, %v1826_v45  ;;  %v1830_v45 = vmov 0.0|0.0  }
0x1481   :  { %1740 = vmatprep.subr.bf16.mxu1 %v1830_v45 }
0x1482   :  { %v1431_v28 = vadd.f32 %v1429_v37, %v2042_v18  ;;  %v1329_v18 = vsel %vm1325_vm2, %v1299_v31, %v1176_v49  ;;  %1742 = vmatpush3.bf16.msra.mxu1 %v1741_v46 }
0x1483   :  { %v1432_v38 = vmul.f32 %v1430_v20, %v1329_v18  ;;  %1743 = vmatprep.subr.bf16.mxu1 %v1830_v45 }
0x1484   :  { %1438 = vrot.lane.b32.xlu0 %v1431_v28, %s1828_s1  ;;  %v1433_v5 = vmul.f32 %v1431_v28, %v1330_v40 }
0x1486   :  { %1745 = vmatpush3.bf16.msra.mxu1 %v1744_v47 }
0x1487   :  { %1746 = vmatprep.subr.bf16.mxu1 %v1830_v45 }
0x148a   :  { %1748 = vmatpush3.bf16.msra.mxu1 %v1747_v7 }
0x148b   :  { %1749 = vmatprep.subr.bf16.mxu1 %v1830_v45 }
0x148e   :  { %1751 = vmatpush3.bf16.msra.mxu1 %v1750_v23 }
0x14d2   :  { %v1437_v30 = vpop.permute.xlu1 %1436 }
0x14d3   :  { %v1442_v34 = vmul.f32 %v1437_v30, %v1430_v20 }
0x14d5   :  { %1446 = vrot.lane.b32.xlu1 %v1442_v34, %s1829_s20 }
0x14d9   :  { %1473 = vperm.xlu1 %1760, %v1470_v36  }
0x14f6   :  { %v1439_v0 = vpop.permute.xlu0 %1438 }
0x14f7   :  { %v1443_v22 = vmul.f32 %v1439_v0, %v1431_v28 }
0x14f9   :  { %1448 = vrot.lane.b32.xlu0 %v1443_v22, %s1829_s20 }
0x14fd   :  { %1476 = vperm.xlu0 %1759, %v1471_v63  }
0x1547   :  { %v1447_v9 = vpop.permute.xlu1 %1446 }
0x1548   :  { %v1452_v39 = vadd.f32 %v1447_v9, %v1432_v38 }
0x154a   :  { %1821 = vtanh.f32 %v1452_v39 }
0x1554   :  { %v1822_v43 = vpop.eup %1821 }
0x1555   :  { %1458 = vrot.lane.b32.xlu1 %v1822_v43, %s1828_s1 }
0x1558   :  { %v1474_v54 = vpop.permute.xlu1 %1473 }
0x1559   :  { %vm1478_vm6 = vcmp.eq.s32.totalorder %v1474_v54, 1 }
0x156b   :  { %v1449_v41 = vpop.permute.xlu0 %1448 }
0x156c   :  { %v1453_v29 = vadd.f32 %v1449_v41, %v1433_v5 }
0x156e   :  { %1823 = vtanh.f32 %v1453_v29 }
0x1578   :  { %v1824_v50 = vpop.eup %1823 }
0x1579   :  { %1460 = vrot.lane.b32.xlu0 %v1824_v50, %s1828_s1 }
0x157c   :  { %v1477_v32 = vpop.permute.xlu0 %1476 }
0x157d   :  { %vm1479_vm9 = vcmp.eq.s32.totalorder %v1477_v32, 1 }
0x15c7   :  { %v1459_v49 = vpop.permute.xlu1 %1458 }
0x15c8   :  { %v1464_v53 = vmul.f32 %v1459_v49, %v1430_v20 }
0x15ca   :  { %v1480_v31 = vsel %vm1478_vm6, %v1464_v53, %v2381_v11 }
0x15cb   :  { %1483 = vrot.lane.b32.xlu1 %v1480_v31, %s1829_s20 }
0x15eb   :  { %v1461_v58 = vpop.permute.xlu0 %1460 }
0x15ec   :  { %v1465_v56 = vmul.f32 %v1461_v58, %v1431_v28 }
0x15ee   :  { %v1481_v61 = vsel %vm1479_vm9, %v1465_v56, %v2386_v8 }
0x15ef   :  { %1487 = vrot.lane.b32.xlu0 %v1481_v61, %s1828_s1 }
0x163d   :  { %v1484_v27 = vpop.permute.xlu1 %1483 }
0x1661   :  { %v1488_v1 = vpop.permute.xlu0 %1487 }
0x1662   :  { %v1490_v55 = vsel %vm246_vm8, %v1484_v27, %v1488_v1 }
0x1663   :  { %1658 = vmatmul.mubr.msk.f32.vlgmr.msra.gmra.mrb[24].mxu1 %vm62_vm0, %v1490_v55 }
0x1736   :  { %v1575_v2 = vpop.f32.mrb[24].mxu1 }
0x1737   :  { %v1576_v3 = vadd.f32 %v1630_v59, %v1575_v2  ;;  %v1659_v11 = vpop.f32.mrb[25].mxu1 }
0x1739   :  { %1580 = vst.msk [vmem:[%s2457_s7] sm:$0xff] %vm1579_vm10, %v1576_v3 }

</bundles_post_ra>
